<compile_context>
chip_gen: v7x
topology: tpu7x:2x2x1
jax: 0.10.0
libtpu: 0.0.40
codegen_flags: <defaults>
</compile_context>

<pallas_src>
import functools

import jax
import jax.numpy as jnp
from jax.experimental import pallas as pl
from jax.experimental.pallas import tpu as pltpu

EPS = 1e-5
NEG_SLOPE = 0.2


def _lrelu(x):
    return jnp.where(x > 0, x, NEG_SLOPE * x)


def _vmem_limit_bytes():
    # Generation-aware scoped-VMEM limit: ~5/8 of per-core VMEM, capped at
    # 96 MiB (v5e/v6e: 128 MiB -> 80 MiB; v7x: 64 MiB/TC -> 40 MiB).
    try:
        cap = int(pltpu.get_tpu_info().vmem_capacity_bytes)
    except Exception:
        cap = 64 * 1024 * 1024
    return int(min(cap * 5 // 8, 96 * 1024 * 1024))


# ----------------------------------------------------------------------
# Fused per-batch kernel:
#   pairwise knn scores -> k argmax passes (== top_k, lowest-index ties)
#   fused with adjacency-mask build -> symmetric gcn normalization ->
#   GCNConv1+bn1+lrelu -> GCNConv2 (reassociated)+bn2+lrelu -> MLP head.
# ----------------------------------------------------------------------
def _gcn_s_kernel(xcf_ref, xcl_ref, wc1_ref, st1_ref, wc2_ref, st2_ref,
                  w1_ref, st6_ref, w2_ref, st7_ref, w3_ref, b3_ref,
                  o_ref, *, k):
    x_cn = xcf_ref[0]                                   # (3, N) f32, lane-dense
    x_nc = xcl_ref[0]                                   # (N, 3) f32
    n = x_cn.shape[1]

    # ---- pairwise knn score on the MXU ---------------------------------
    # score[j, i] = 2<x_j, x_i> - ||x_j||^2  (candidates j on sublanes,
    # queries i on lanes).  The reference's extra per-query constant
    # -||x_i||^2 does not change per-query top-k order, so it is dropped.
    g = jnp.dot(x_nc, x_cn, preferred_element_type=jnp.float32)        # (N, N)
    sq_j = jnp.sum(x_nc * x_nc, axis=1, keepdims=True)                 # (N, 1)
    score = 2.0 * g - sq_j

    cand_j = jax.lax.broadcasted_iota(jnp.int32, (n, 1), 0)            # candidate idx
    query_i = jax.lax.broadcasted_iota(jnp.int32, (1, n), 1)           # query idx

    # ---- knn selection fused with the adjacency-mask build -------------
    # k iterative argmax passes reproduce lax.top_k (lowest index wins ties);
    # each selection one-hot IS an adjacency column, so
    #   M[j, i] = [j in knn(i)]
    # is accumulated as a bool OR with no scatter and no extra compare pass.
    # gcn_norm(add_remaining_self_loops): the diagonal is forced to 1.
    def pick(_, carry):
        sc, mb = carry
        mmax = jnp.max(sc, axis=0, keepdims=True)                      # (1, N)
        j_star = jnp.min(jnp.where(sc >= mmax, cand_j, n),
                         axis=0, keepdims=True)                        # (1, N)
        onehot = cand_j == j_star                                      # (N, N) bool
        return jnp.where(onehot, -jnp.inf, sc), mb | onehot

    _, mb = jax.lax.fori_loop(0, k, pick, (score, cand_j == query_i),
                              unroll=True)

    # ---- symmetric gcn normalization:  A_hat = D^-1/2 M D^-1/2 ---------
    # deg[j] = sum_i M[j, i]  (in-degree at the target node, as in gcn_norm).
    m = mb.astype(jnp.float32)                                         # single convert
    deg = jnp.sum(m, axis=1, keepdims=True)                            # (N, 1) >= 1
    dinv = jax.lax.rsqrt(deg)
    a_hat = (dinv * m * jnp.transpose(dinv)).astype(jnp.bfloat16)      # (N, N)

    # ---- GCNConv1 (bias folded into bn1 shift) + bn1 + leaky_relu -------
    st1 = st1_ref[...]
    xw1 = jnp.dot(x_nc, wc1_ref[...], preferred_element_type=jnp.float32)  # (N, 128)
    h1 = jnp.dot(a_hat, xw1.astype(jnp.bfloat16),
                 preferred_element_type=jnp.float32)
    h1 = _lrelu(h1 * st1[0:1, :] + st1[1:2, :]).astype(jnp.bfloat16)

    # ---- GCNConv2 reassociated: (A_hat @ H1) @ W2, + bn2 + leaky_relu ---
    st2 = st2_ref[...]
    ah1 = jnp.dot(a_hat, h1, preferred_element_type=jnp.float32)       # (N, 128)
    h2 = jnp.dot(ah1.astype(jnp.bfloat16), wc2_ref[...],
                 preferred_element_type=jnp.float32)                   # (N, 1024)
    h2 = _lrelu(h2 * st2[0:1, :] + st2[1:2, :]).astype(jnp.bfloat16)

    # ---- MLP head (dropout == identity in eval) -------------------------
    st6 = st6_ref[...]
    h = jnp.dot(h2, w1_ref[...], preferred_element_type=jnp.float32)   # (N, 512)
    h = _lrelu(h * st6[0:1, :] + st6[1:2, :]).astype(jnp.bfloat16)
    st7 = st7_ref[...]
    h = jnp.dot(h, w2_ref[...], preferred_element_type=jnp.float32)    # (N, 256)
    h = _lrelu(h * st7[0:1, :] + st7[1:2, :]).astype(jnp.bfloat16)     # linear2 bias folded
    o_ref[0] = (jnp.dot(h, w3_ref[...], preferred_element_type=jnp.float32)
                + b3_ref[...])                                         # (N, OP) f32


def gcn_s_fused(x_cf, x_cl, p, *, k):
    B, C, N = x_cf.shape
    OP = p["w3"].shape[1]
    # TODO(synk): for very large N (>~2048) row-tile this kernel
    # (grid=(B, N//tm)); whole-(N,N) score/adjacency blocks fit VMEM up to
    # N~2048 on all generations.
    # TODO(synk): for B == 1 on v7x add a second "parallel" grid axis (row
    # tiles over N) so both TensorCores get work.
    const = lambda b: (0, 0)
    return pl.pallas_call(
        functools.partial(_gcn_s_kernel, k=k),
        out_shape=jax.ShapeDtypeStruct((B, N, OP), jnp.float32),
        grid=(B,),
        in_specs=[
            pl.BlockSpec((1, C, N), lambda b: (b, 0, 0)),   # x, channels-first
            pl.BlockSpec((1, N, C), lambda b: (b, 0, 0)),   # x, channels-last
            # TODO(synk): mark these constant-index weight specs
            # pipeline_mode=pl.Buffered(1) (single buffer) to save VMEM once
            # verified on all target generations; they never change per step.
            pl.BlockSpec(p["w_c1"].shape, const),           # conv1 weight (f32)
            pl.BlockSpec(p["st1"].shape, const),            # bn1 scale / shift(+bias)
            pl.BlockSpec(p["w_c2"].shape, const),           # conv2 weight (bf16)
            pl.BlockSpec(p["st2"].shape, const),            # bn2 scale / shift(+bias)
            pl.BlockSpec(p["w1"].shape, const),             # linear1 (bf16)
            pl.BlockSpec(p["st6"].shape, const),            # bn6 scale / shift
            pl.BlockSpec(p["w2"].shape, const),             # linear2 (bf16)
            pl.BlockSpec(p["st7"].shape, const),            # bn7 scale / shift(+bias)
            pl.BlockSpec(p["w3"].shape, const),             # linear3 (bf16, lane-padded)
            pl.BlockSpec(p["b3"].shape, const),             # linear3 bias (lane-padded)
        ],
        out_specs=pl.BlockSpec((1, N, OP), lambda b: (b, 0, 0)),
        compiler_params=pltpu.CompilerParams(
            dimension_semantics=("parallel",),
            vmem_limit_bytes=_vmem_limit_bytes()),
    )(x_cf, x_cl, p["w_c1"], p["st1"], p["w_c2"], p["st2"],
      p["w1"], p["st6"], p["w2"], p["st7"], p["w3"], p["b3"])


# ----------------------------------------------------------------------
# Full forward
# ----------------------------------------------------------------------
def gcn_s_forward(x, params, k, output_channels):
    # x: (B, 3, num_points) -- same layout the PyTorch module receives.
    B, C, N = x.shape
    x_cf = x.astype(jnp.float32)                          # (B, 3, N) lane-dense
    x_cl = jnp.transpose(x_cf, (0, 2, 1))                 # (B, N, 3)
    logits = gcn_s_fused(x_cf, x_cl, params, k=k)         # (B, N, OP_pad)
    # global_mean_pool / global_add_pool are dead code in the reference
    # forward -> omitted.
    return logits.reshape(B * N, -1)[:, :output_channels]  # drop lane padding


# ----------------------------------------------------------------------
# Deterministic parameter initialization (synthetic weights), with eval-mode
# BatchNorm folded to scale/shift and conv/linear biases folded into shifts.
# ----------------------------------------------------------------------
def init_params(key, emb_dims=1024, output_channels=40):
    ks = iter(jax.random.split(key, 32))

    def nrm(shape, scale):
        return jax.random.normal(next(ks), shape, jnp.float32) * scale

    def glorot(fin, fout):
        s = jnp.sqrt(2.0 / (fin + fout)).astype(jnp.float32)
        return jax.random.normal(next(ks), (fin, fout), jnp.float32) * s

    def bn_affine(Cn):
        # eval BatchNorm1d:  y = gamma * (x - mean) / sqrt(var + eps) + beta
        gamma = jax.random.uniform(next(ks), (1, Cn), jnp.float32, 0.5, 1.5)
        beta = nrm((1, Cn), 0.1)
        mean = nrm((1, Cn), 0.1)
        var = jax.random.uniform(next(ks), (1, Cn), jnp.float32, 0.5, 1.5)
        scale = gamma / jnp.sqrt(var + EPS)
        shift = beta - mean * scale
        return scale, shift

    w_c1 = glorot(3, 128)                          # GCNConv1 weight (Cin, Cout)
    b_c1 = jnp.zeros((1, 128), jnp.float32)
    s1, t1 = bn_affine(128)
    w_c2 = glorot(128, 1024)
    b_c2 = jnp.zeros((1, 1024), jnp.float32)
    s2, t2 = bn_affine(1024)
    w1 = glorot(emb_dims, 512)                     # linear1, bias=False
    s6, t6 = bn_affine(512)
    w2 = glorot(512, 256)                          # linear2
    b2 = nrm((1, 256), 0.05)
    s7, t7 = bn_affine(256)
    w3 = glorot(256, output_channels)              # linear3
    b3 = nrm((1, output_channels), 0.05)

    pad_cols = (-output_channels) % 128            # lane-dense head output

    p = {}
    p["w_c1"] = w_c1                                                   # f32, tiny (3,128)
    p["st1"] = jnp.concatenate([s1, t1 + s1 * b_c1], axis=0)           # (2, 128) f32
    p["w_c2"] = w_c2.astype(jnp.bfloat16)
    p["st2"] = jnp.concatenate([s2, t2 + s2 * b_c2], axis=0)           # (2, 1024) f32
    p["w1"] = w1.astype(jnp.bfloat16)
    p["st6"] = jnp.concatenate([s6, t6], axis=0)                       # (2, 512) f32
    p["w2"] = w2.astype(jnp.bfloat16)
    p["st7"] = jnp.concatenate([s7, t7 + s7 * b2], axis=0)             # (2, 256) f32
    p["w3"] = jnp.pad(w3, ((0, 0), (0, pad_cols))).astype(jnp.bfloat16)
    p["b3"] = jnp.pad(b3, ((0, 0), (0, pad_cols)))
    return p


if __name__ == "__main__":
    B, N, K = 2, 32, 8                    # small shapes; args.k=8, emb_dims=1024
    OUT = 40
    key = jax.random.PRNGKey(0)
    kx, kp = jax.random.split(key)
    x = jax.random.normal(kx, (B, 3, N), jnp.float32)   # (B, C=3, num_points)
    params = init_params(kp, emb_dims=1024, output_channels=OUT)

    fwd = jax.jit(functools.partial(gcn_s_forward, k=K, output_channels=OUT))
    out = jax.block_until_ready(fwd(x, params))
    assert out.shape == (B * N, OUT), out.shape
    assert bool(jnp.all(jnp.isfinite(out)))
    print("KERNEL_OK")
</pallas_src>

<mosaic_0001>
module attributes {stable_mosaic.version = 11 : i64} {
  func.func @_gcn_s_kernel(%arg0: i32, %arg1: memref<1x3x32xf32, #tpu.memory_space<vmem>>, %arg2: memref<1x32x3xf32, #tpu.memory_space<vmem>>, %arg3: memref<3x128xf32, #tpu.memory_space<vmem>>, %arg4: memref<2x128xf32, #tpu.memory_space<vmem>>, %arg5: memref<128x1024xbf16, #tpu.memory_space<vmem>>, %arg6: memref<2x1024xf32, #tpu.memory_space<vmem>>, %arg7: memref<1024x512xbf16, #tpu.memory_space<vmem>>, %arg8: memref<2x512xf32, #tpu.memory_space<vmem>>, %arg9: memref<512x256xbf16, #tpu.memory_space<vmem>>, %arg10: memref<2x256xf32, #tpu.memory_space<vmem>>, %arg11: memref<256x128xbf16, #tpu.memory_space<vmem>>, %arg12: memref<1x128xf32, #tpu.memory_space<vmem>>, %arg13: memref<1x32x128xf32, #tpu.memory_space<vmem>>) attributes {dimension_semantics = [#tpu.dimension_semantics<parallel>], iteration_bounds = array<i64: 2>, scalar_prefetch = 0 : i64, scratch_operands = 0 : i64, tpu.core_type = #tpu.core_type<tc>, window_params = [{transform_indices = @transform_0, window_bounds = array<i64: 1, 3, 32>}, {transform_indices = @transform_1, window_bounds = array<i64: 1, 32, 3>}, {pipeline_mode = #tpu.pipeline_mode<synchronous>, transform_indices = @transform_2, window_bounds = array<i64: 3, 128>}, {pipeline_mode = #tpu.pipeline_mode<synchronous>, transform_indices = @transform_3, window_bounds = array<i64: 2, 128>}, {pipeline_mode = #tpu.pipeline_mode<synchronous>, transform_indices = @transform_4, window_bounds = array<i64: 128, 1024>}, {pipeline_mode = #tpu.pipeline_mode<synchronous>, transform_indices = @transform_5, window_bounds = array<i64: 2, 1024>}, {pipeline_mode = #tpu.pipeline_mode<synchronous>, transform_indices = @transform_6, window_bounds = array<i64: 1024, 512>}, {pipeline_mode = #tpu.pipeline_mode<synchronous>, transform_indices = @transform_7, window_bounds = array<i64: 2, 512>}, {pipeline_mode = #tpu.pipeline_mode<synchronous>, transform_indices = @transform_8, window_bounds = array<i64: 512, 256>}, {pipeline_mode = #tpu.pipeline_mode<synchronous>, transform_indices = @transform_9, window_bounds = array<i64: 2, 256>}, {pipeline_mode = #tpu.pipeline_mode<synchronous>, transform_indices = @transform_10, window_bounds = array<i64: 256, 128>}, {pipeline_mode = #tpu.pipeline_mode<synchronous>, transform_indices = @transform_11, window_bounds = array<i64: 1, 128>}, {transform_indices = @transform_12, window_bounds = array<i64: 1, 32, 128>}]} {
    %c0 = arith.constant 0 : index
    %c0_0 = arith.constant 0 : index
    %c0_1 = arith.constant 0 : index
    %0 = vector.load %arg1[%c0, %c0_0, %c0_1] : memref<1x3x32xf32, #tpu.memory_space<vmem>>, vector<1x3x32xf32>
    %1 = vector.shape_cast %0 : vector<1x3x32xf32> to vector<3x32xf32>
    %c0_2 = arith.constant 0 : index
    %c0_3 = arith.constant 0 : index
    %c0_4 = arith.constant 0 : index
    %2 = vector.load %arg2[%c0_2, %c0_3, %c0_4] : memref<1x32x3xf32, #tpu.memory_space<vmem>>, vector<1x32x3xf32>
    %3 = vector.shape_cast %2 : vector<1x32x3xf32> to vector<32x3xf32>
    %cst = arith.constant dense<0.000000e+00> : vector<32x32xf32>
    %4 = tpu.matmul %3, %1, %cst {dimension_numbers = #tpu.dot_dimension_numbers<[1], [0], [0], [1], [0, 0, 1, 1], [], []>} : vector<32x3xf32>, vector<3x32xf32>, vector<32x32xf32> -> vector<32x32xf32>
    %5 = arith.mulf %3, %3 : vector<32x3xf32>
    %cst_5 = arith.constant dense<0.000000e+00> : vector<32xf32>
    %6 = vector.multi_reduction <add>, %5, %cst_5 [1] : vector<32x3xf32> to vector<32xf32>
    %7 = vector.shape_cast %6 : vector<32xf32> to vector<32x1xf32>
    %cst_6 = arith.constant 2.000000e+00 : f32
    %8 = vector.broadcast %cst_6 : f32 to vector<32x32xf32>
    %9 = arith.mulf %8, %4 : vector<32x32xf32>
    %10 = vector.broadcast %7 : vector<32x1xf32> to vector<32x32xf32>
    %11 = arith.subf %9, %10 : vector<32x32xf32>
    %12 = tpu.iota {dimensions = array<i32: 0>} : vector<32x1xi32>
    %13 = tpu.iota {dimensions = array<i32: 1>} : vector<1x32xi32>
    %14 = vector.broadcast %12 : vector<32x1xi32> to vector<32x32xi32>
    %15 = vector.broadcast %13 : vector<1x32xi32> to vector<32x32xi32>
    %16 = arith.cmpi eq, %14, %15 : vector<32x32xi32>
    %c0_i32 = arith.constant 0 : i32
    %cst_7 = arith.constant dense<0xFF800000> : vector<32xf32>
    %17 = vector.multi_reduction <maximumf>, %11, %cst_7 [0] : vector<32x32xf32> to vector<32xf32>
    %18 = vector.shape_cast %17 : vector<32xf32> to vector<1x32xf32>
    %19 = vector.broadcast %18 : vector<1x32xf32> to vector<32x32xf32>
    %20 = arith.cmpf oge, %11, %19 : vector<32x32xf32>
    %c32_i32 = arith.constant 32 : i32
    %21 = vector.shape_cast %12 : vector<32x1xi32> to vector<32x1xi32>
    %22 = vector.broadcast %21 : vector<32x1xi32> to vector<32x32xi32>
    %23 = vector.broadcast %c32_i32 : i32 to vector<32x32xi32>
    %24 = arith.select %20, %22, %23 : vector<32x32xi1>, vector<32x32xi32>
    %cst_8 = arith.constant dense<2147483647> : vector<32xi32>
    %25 = vector.multi_reduction <minsi>, %24, %cst_8 [0] : vector<32x32xi32> to vector<32xi32>
    %26 = vector.shape_cast %25 : vector<32xi32> to vector<1x32xi32>
    %27 = vector.broadcast %12 : vector<32x1xi32> to vector<32x32xi32>
    %28 = vector.broadcast %26 : vector<1x32xi32> to vector<32x32xi32>
    %29 = arith.cmpi eq, %27, %28 : vector<32x32xi32>
    %cst_9 = arith.constant 0xFF800000 : f32
    %30 = vector.broadcast %cst_9 : f32 to vector<32x32xf32>
    %31 = arith.select %29, %30, %11 : vector<32x32xi1>, vector<32x32xf32>
    %32 = arith.ori %16, %29 : vector<32x32xi1>
    %c1_i32 = arith.constant 1 : i32
    %cst_10 = arith.constant dense<0xFF800000> : vector<32xf32>
    %33 = vector.multi_reduction <maximumf>, %31, %cst_10 [0] : vector<32x32xf32> to vector<32xf32>
    %34 = vector.shape_cast %33 : vector<32xf32> to vector<1x32xf32>
    %35 = vector.broadcast %34 : vector<1x32xf32> to vector<32x32xf32>
    %36 = arith.cmpf oge, %31, %35 : vector<32x32xf32>
    %c32_i32_11 = arith.constant 32 : i32
    %37 = vector.shape_cast %12 : vector<32x1xi32> to vector<32x1xi32>
    %38 = vector.broadcast %37 : vector<32x1xi32> to vector<32x32xi32>
    %39 = vector.broadcast %c32_i32_11 : i32 to vector<32x32xi32>
    %40 = arith.select %36, %38, %39 : vector<32x32xi1>, vector<32x32xi32>
    %cst_12 = arith.constant dense<2147483647> : vector<32xi32>
    %41 = vector.multi_reduction <minsi>, %40, %cst_12 [0] : vector<32x32xi32> to vector<32xi32>
    %42 = vector.shape_cast %41 : vector<32xi32> to vector<1x32xi32>
    %43 = vector.broadcast %12 : vector<32x1xi32> to vector<32x32xi32>
    %44 = vector.broadcast %42 : vector<1x32xi32> to vector<32x32xi32>
    %45 = arith.cmpi eq, %43, %44 : vector<32x32xi32>
    %cst_13 = arith.constant 0xFF800000 : f32
    %46 = vector.broadcast %cst_13 : f32 to vector<32x32xf32>
    %47 = arith.select %45, %46, %31 : vector<32x32xi1>, vector<32x32xf32>
    %48 = arith.ori %32, %45 : vector<32x32xi1>
    %c2_i32 = arith.constant 2 : i32
    %cst_14 = arith.constant dense<0xFF800000> : vector<32xf32>
    %49 = vector.multi_reduction <maximumf>, %47, %cst_14 [0] : vector<32x32xf32> to vector<32xf32>
    %50 = vector.shape_cast %49 : vector<32xf32> to vector<1x32xf32>
    %51 = vector.broadcast %50 : vector<1x32xf32> to vector<32x32xf32>
    %52 = arith.cmpf oge, %47, %51 : vector<32x32xf32>
    %c32_i32_15 = arith.constant 32 : i32
    %53 = vector.shape_cast %12 : vector<32x1xi32> to vector<32x1xi32>
    %54 = vector.broadcast %53 : vector<32x1xi32> to vector<32x32xi32>
    %55 = vector.broadcast %c32_i32_15 : i32 to vector<32x32xi32>
    %56 = arith.select %52, %54, %55 : vector<32x32xi1>, vector<32x32xi32>
    %cst_16 = arith.constant dense<2147483647> : vector<32xi32>
    %57 = vector.multi_reduction <minsi>, %56, %cst_16 [0] : vector<32x32xi32> to vector<32xi32>
    %58 = vector.shape_cast %57 : vector<32xi32> to vector<1x32xi32>
    %59 = vector.broadcast %12 : vector<32x1xi32> to vector<32x32xi32>
    %60 = vector.broadcast %58 : vector<1x32xi32> to vector<32x32xi32>
    %61 = arith.cmpi eq, %59, %60 : vector<32x32xi32>
    %cst_17 = arith.constant 0xFF800000 : f32
    %62 = vector.broadcast %cst_17 : f32 to vector<32x32xf32>
    %63 = arith.select %61, %62, %47 : vector<32x32xi1>, vector<32x32xf32>
    %64 = arith.ori %48, %61 : vector<32x32xi1>
    %c3_i32 = arith.constant 3 : i32
    %cst_18 = arith.constant dense<0xFF800000> : vector<32xf32>
    %65 = vector.multi_reduction <maximumf>, %63, %cst_18 [0] : vector<32x32xf32> to vector<32xf32>
    %66 = vector.shape_cast %65 : vector<32xf32> to vector<1x32xf32>
    %67 = vector.broadcast %66 : vector<1x32xf32> to vector<32x32xf32>
    %68 = arith.cmpf oge, %63, %67 : vector<32x32xf32>
    %c32_i32_19 = arith.constant 32 : i32
    %69 = vector.shape_cast %12 : vector<32x1xi32> to vector<32x1xi32>
    %70 = vector.broadcast %69 : vector<32x1xi32> to vector<32x32xi32>
    %71 = vector.broadcast %c32_i32_19 : i32 to vector<32x32xi32>
    %72 = arith.select %68, %70, %71 : vector<32x32xi1>, vector<32x32xi32>
    %cst_20 = arith.constant dense<2147483647> : vector<32xi32>
    %73 = vector.multi_reduction <minsi>, %72, %cst_20 [0] : vector<32x32xi32> to vector<32xi32>
    %74 = vector.shape_cast %73 : vector<32xi32> to vector<1x32xi32>
    %75 = vector.broadcast %12 : vector<32x1xi32> to vector<32x32xi32>
    %76 = vector.broadcast %74 : vector<1x32xi32> to vector<32x32xi32>
    %77 = arith.cmpi eq, %75, %76 : vector<32x32xi32>
    %cst_21 = arith.constant 0xFF800000 : f32
    %78 = vector.broadcast %cst_21 : f32 to vector<32x32xf32>
    %79 = arith.select %77, %78, %63 : vector<32x32xi1>, vector<32x32xf32>
    %80 = arith.ori %64, %77 : vector<32x32xi1>
    %c4_i32 = arith.constant 4 : i32
    %cst_22 = arith.constant dense<0xFF800000> : vector<32xf32>
    %81 = vector.multi_reduction <maximumf>, %79, %cst_22 [0] : vector<32x32xf32> to vector<32xf32>
    %82 = vector.shape_cast %81 : vector<32xf32> to vector<1x32xf32>
    %83 = vector.broadcast %82 : vector<1x32xf32> to vector<32x32xf32>
    %84 = arith.cmpf oge, %79, %83 : vector<32x32xf32>
    %c32_i32_23 = arith.constant 32 : i32
    %85 = vector.shape_cast %12 : vector<32x1xi32> to vector<32x1xi32>
    %86 = vector.broadcast %85 : vector<32x1xi32> to vector<32x32xi32>
    %87 = vector.broadcast %c32_i32_23 : i32 to vector<32x32xi32>
    %88 = arith.select %84, %86, %87 : vector<32x32xi1>, vector<32x32xi32>
    %cst_24 = arith.constant dense<2147483647> : vector<32xi32>
    %89 = vector.multi_reduction <minsi>, %88, %cst_24 [0] : vector<32x32xi32> to vector<32xi32>
    %90 = vector.shape_cast %89 : vector<32xi32> to vector<1x32xi32>
    %91 = vector.broadcast %12 : vector<32x1xi32> to vector<32x32xi32>
    %92 = vector.broadcast %90 : vector<1x32xi32> to vector<32x32xi32>
    %93 = arith.cmpi eq, %91, %92 : vector<32x32xi32>
    %cst_25 = arith.constant 0xFF800000 : f32
    %94 = vector.broadcast %cst_25 : f32 to vector<32x32xf32>
    %95 = arith.select %93, %94, %79 : vector<32x32xi1>, vector<32x32xf32>
    %96 = arith.ori %80, %93 : vector<32x32xi1>
    %c5_i32 = arith.constant 5 : i32
    %cst_26 = arith.constant dense<0xFF800000> : vector<32xf32>
    %97 = vector.multi_reduction <maximumf>, %95, %cst_26 [0] : vector<32x32xf32> to vector<32xf32>
    %98 = vector.shape_cast %97 : vector<32xf32> to vector<1x32xf32>
    %99 = vector.broadcast %98 : vector<1x32xf32> to vector<32x32xf32>
    %100 = arith.cmpf oge, %95, %99 : vector<32x32xf32>
    %c32_i32_27 = arith.constant 32 : i32
    %101 = vector.shape_cast %12 : vector<32x1xi32> to vector<32x1xi32>
    %102 = vector.broadcast %101 : vector<32x1xi32> to vector<32x32xi32>
    %103 = vector.broadcast %c32_i32_27 : i32 to vector<32x32xi32>
    %104 = arith.select %100, %102, %103 : vector<32x32xi1>, vector<32x32xi32>
    %cst_28 = arith.constant dense<2147483647> : vector<32xi32>
    %105 = vector.multi_reduction <minsi>, %104, %cst_28 [0] : vector<32x32xi32> to vector<32xi32>
    %106 = vector.shape_cast %105 : vector<32xi32> to vector<1x32xi32>
    %107 = vector.broadcast %12 : vector<32x1xi32> to vector<32x32xi32>
    %108 = vector.broadcast %106 : vector<1x32xi32> to vector<32x32xi32>
    %109 = arith.cmpi eq, %107, %108 : vector<32x32xi32>
    %cst_29 = arith.constant 0xFF800000 : f32
    %110 = vector.broadcast %cst_29 : f32 to vector<32x32xf32>
    %111 = arith.select %109, %110, %95 : vector<32x32xi1>, vector<32x32xf32>
    %112 = arith.ori %96, %109 : vector<32x32xi1>
    %c6_i32 = arith.constant 6 : i32
    %cst_30 = arith.constant dense<0xFF800000> : vector<32xf32>
    %113 = vector.multi_reduction <maximumf>, %111, %cst_30 [0] : vector<32x32xf32> to vector<32xf32>
    %114 = vector.shape_cast %113 : vector<32xf32> to vector<1x32xf32>
    %115 = vector.broadcast %114 : vector<1x32xf32> to vector<32x32xf32>
    %116 = arith.cmpf oge, %111, %115 : vector<32x32xf32>
    %c32_i32_31 = arith.constant 32 : i32
    %117 = vector.shape_cast %12 : vector<32x1xi32> to vector<32x1xi32>
    %118 = vector.broadcast %117 : vector<32x1xi32> to vector<32x32xi32>
    %119 = vector.broadcast %c32_i32_31 : i32 to vector<32x32xi32>
    %120 = arith.select %116, %118, %119 : vector<32x32xi1>, vector<32x32xi32>
    %cst_32 = arith.constant dense<2147483647> : vector<32xi32>
    %121 = vector.multi_reduction <minsi>, %120, %cst_32 [0] : vector<32x32xi32> to vector<32xi32>
    %122 = vector.shape_cast %121 : vector<32xi32> to vector<1x32xi32>
    %123 = vector.broadcast %12 : vector<32x1xi32> to vector<32x32xi32>
    %124 = vector.broadcast %122 : vector<1x32xi32> to vector<32x32xi32>
    %125 = arith.cmpi eq, %123, %124 : vector<32x32xi32>
    %cst_33 = arith.constant 0xFF800000 : f32
    %126 = vector.broadcast %cst_33 : f32 to vector<32x32xf32>
    %127 = arith.select %125, %126, %111 : vector<32x32xi1>, vector<32x32xf32>
    %128 = arith.ori %112, %125 : vector<32x32xi1>
    %c7_i32 = arith.constant 7 : i32
    %cst_34 = arith.constant dense<0xFF800000> : vector<32xf32>
    %129 = vector.multi_reduction <maximumf>, %127, %cst_34 [0] : vector<32x32xf32> to vector<32xf32>
    %130 = vector.shape_cast %129 : vector<32xf32> to vector<1x32xf32>
    %131 = vector.broadcast %130 : vector<1x32xf32> to vector<32x32xf32>
    %132 = arith.cmpf oge, %127, %131 : vector<32x32xf32>
    %c32_i32_35 = arith.constant 32 : i32
    %133 = vector.shape_cast %12 : vector<32x1xi32> to vector<32x1xi32>
    %134 = vector.broadcast %133 : vector<32x1xi32> to vector<32x32xi32>
    %135 = vector.broadcast %c32_i32_35 : i32 to vector<32x32xi32>
    %136 = arith.select %132, %134, %135 : vector<32x32xi1>, vector<32x32xi32>
    %cst_36 = arith.constant dense<2147483647> : vector<32xi32>
    %137 = vector.multi_reduction <minsi>, %136, %cst_36 [0] : vector<32x32xi32> to vector<32xi32>
    %138 = vector.shape_cast %137 : vector<32xi32> to vector<1x32xi32>
    %139 = vector.broadcast %12 : vector<32x1xi32> to vector<32x32xi32>
    %140 = vector.broadcast %138 : vector<1x32xi32> to vector<32x32xi32>
    %141 = arith.cmpi eq, %139, %140 : vector<32x32xi32>
    %cst_37 = arith.constant 0xFF800000 : f32
    %142 = vector.broadcast %cst_37 : f32 to vector<32x32xf32>
    %143 = arith.select %141, %142, %127 : vector<32x32xi1>, vector<32x32xf32>
    %144 = arith.ori %128, %141 : vector<32x32xi1>
    %145 = arith.extui %144 : vector<32x32xi1> to vector<32x32xi32>
    %146 = arith.sitofp %145 : vector<32x32xi32> to vector<32x32xf32>
    %cst_38 = arith.constant dense<0.000000e+00> : vector<32xf32>
    %147 = vector.multi_reduction <add>, %146, %cst_38 [1] : vector<32x32xf32> to vector<32xf32>
    %148 = vector.shape_cast %147 : vector<32xf32> to vector<32x1xf32>
    %149 = math.rsqrt %148 : vector<32x1xf32>
    %150 = vector.broadcast %149 : vector<32x1xf32> to vector<32x32xf32>
    %151 = arith.mulf %150, %146 : vector<32x32xf32>
    %152 = tpu.transpose %149, [1, 0] : vector<32x1xf32> -> vector<1x32xf32>
    %153 = vector.broadcast %152 : vector<1x32xf32> to vector<32x32xf32>
    %154 = arith.mulf %151, %153 : vector<32x32xf32>
    %155 = arith.truncf %154 : vector<32x32xf32> to vector<32x32xbf16>
    %c0_39 = arith.constant 0 : index
    %c0_40 = arith.constant 0 : index
    %156 = vector.load %arg4[%c0_39, %c0_40] : memref<2x128xf32, #tpu.memory_space<vmem>>, vector<2x128xf32>
    %c0_41 = arith.constant 0 : index
    %c0_42 = arith.constant 0 : index
    %157 = vector.load %arg3[%c0_41, %c0_42] : memref<3x128xf32, #tpu.memory_space<vmem>>, vector<3x128xf32>
    %cst_43 = arith.constant dense<0.000000e+00> : vector<32x128xf32>
    %158 = tpu.matmul %3, %157, %cst_43 {dimension_numbers = #tpu.dot_dimension_numbers<[1], [0], [0], [1], [0, 0, 1, 1], [], []>} : vector<32x3xf32>, vector<3x128xf32>, vector<32x128xf32> -> vector<32x128xf32>
    %159 = arith.truncf %158 : vector<32x128xf32> to vector<32x128xbf16>
    %cst_44 = arith.constant dense<0.000000e+00> : vector<32x128xf32>
    %160 = tpu.matmul %155, %159, %cst_44 {dimension_numbers = #tpu.dot_dimension_numbers<[1], [0], [0], [1], [0, 0, 1, 1], [], []>} : vector<32x32xbf16>, vector<32x128xbf16>, vector<32x128xf32> -> vector<32x128xf32>
    %161 = vector.extract_strided_slice %156 {offsets = [0, 0], sizes = [1, 128], strides = [1, 1]} : vector<2x128xf32> to vector<1x128xf32>
    %162 = vector.broadcast %161 : vector<1x128xf32> to vector<32x128xf32>
    %163 = arith.mulf %160, %162 : vector<32x128xf32>
    %164 = vector.extract_strided_slice %156 {offsets = [1, 0], sizes = [1, 128], strides = [1, 1]} : vector<2x128xf32> to vector<1x128xf32>
    %165 = vector.broadcast %164 : vector<1x128xf32> to vector<32x128xf32>
    %166 = arith.addf %163, %165 : vector<32x128xf32>
    %cst_45 = arith.constant 0.000000e+00 : f32
    %167 = vector.broadcast %cst_45 : f32 to vector<32x128xf32>
    %168 = arith.cmpf ogt, %166, %167 : vector<32x128xf32>
    %cst_46 = arith.constant 2.000000e-01 : f32
    %169 = vector.broadcast %cst_46 : f32 to vector<32x128xf32>
    %170 = arith.mulf %169, %166 : vector<32x128xf32>
    %171 = arith.select %168, %166, %170 : vector<32x128xi1>, vector<32x128xf32>
    %172 = arith.truncf %171 : vector<32x128xf32> to vector<32x128xbf16>
    %c0_47 = arith.constant 0 : index
    %c0_48 = arith.constant 0 : index
    %173 = vector.load %arg6[%c0_47, %c0_48] : memref<2x1024xf32, #tpu.memory_space<vmem>>, vector<2x1024xf32>
    %cst_49 = arith.constant dense<0.000000e+00> : vector<32x128xf32>
    %174 = tpu.matmul %155, %172, %cst_49 {dimension_numbers = #tpu.dot_dimension_numbers<[1], [0], [0], [1], [0, 0, 1, 1], [], []>} : vector<32x32xbf16>, vector<32x128xbf16>, vector<32x128xf32> -> vector<32x128xf32>
    %175 = arith.truncf %174 : vector<32x128xf32> to vector<32x128xbf16>
    %c0_50 = arith.constant 0 : index
    %c0_51 = arith.constant 0 : index
    %176 = vector.load %arg5[%c0_50, %c0_51] : memref<128x1024xbf16, #tpu.memory_space<vmem>>, vector<128x1024xbf16>
    %cst_52 = arith.constant dense<0.000000e+00> : vector<32x1024xf32>
    %177 = tpu.matmul %175, %176, %cst_52 {dimension_numbers = #tpu.dot_dimension_numbers<[1], [0], [0], [1], [0, 0, 1, 1], [], []>} : vector<32x128xbf16>, vector<128x1024xbf16>, vector<32x1024xf32> -> vector<32x1024xf32>
    %178 = vector.extract_strided_slice %173 {offsets = [0, 0], sizes = [1, 1024], strides = [1, 1]} : vector<2x1024xf32> to vector<1x1024xf32>
    %179 = vector.broadcast %178 : vector<1x1024xf32> to vector<32x1024xf32>
    %180 = arith.mulf %177, %179 : vector<32x1024xf32>
    %181 = vector.extract_strided_slice %173 {offsets = [1, 0], sizes = [1, 1024], strides = [1, 1]} : vector<2x1024xf32> to vector<1x1024xf32>
    %182 = vector.broadcast %181 : vector<1x1024xf32> to vector<32x1024xf32>
    %183 = arith.addf %180, %182 : vector<32x1024xf32>
    %cst_53 = arith.constant 0.000000e+00 : f32
    %184 = vector.broadcast %cst_53 : f32 to vector<32x1024xf32>
    %185 = arith.cmpf ogt, %183, %184 : vector<32x1024xf32>
    %cst_54 = arith.constant 2.000000e-01 : f32
    %186 = vector.broadcast %cst_54 : f32 to vector<32x1024xf32>
    %187 = arith.mulf %186, %183 : vector<32x1024xf32>
    %188 = arith.select %185, %183, %187 : vector<32x1024xi1>, vector<32x1024xf32>
    %189 = arith.truncf %188 : vector<32x1024xf32> to vector<32x1024xbf16>
    %c0_55 = arith.constant 0 : index
    %c0_56 = arith.constant 0 : index
    %190 = vector.load %arg8[%c0_55, %c0_56] : memref<2x512xf32, #tpu.memory_space<vmem>>, vector<2x512xf32>
    %c0_57 = arith.constant 0 : index
    %c0_58 = arith.constant 0 : index
    %191 = vector.load %arg7[%c0_57, %c0_58] : memref<1024x512xbf16, #tpu.memory_space<vmem>>, vector<1024x512xbf16>
    %cst_59 = arith.constant dense<0.000000e+00> : vector<32x512xf32>
    %192 = tpu.matmul %189, %191, %cst_59 {dimension_numbers = #tpu.dot_dimension_numbers<[1], [0], [0], [1], [0, 0, 1, 1], [], []>} : vector<32x1024xbf16>, vector<1024x512xbf16>, vector<32x512xf32> -> vector<32x512xf32>
    %193 = vector.extract_strided_slice %190 {offsets = [0, 0], sizes = [1, 512], strides = [1, 1]} : vector<2x512xf32> to vector<1x512xf32>
    %194 = vector.broadcast %193 : vector<1x512xf32> to vector<32x512xf32>
    %195 = arith.mulf %192, %194 : vector<32x512xf32>
    %196 = vector.extract_strided_slice %190 {offsets = [1, 0], sizes = [1, 512], strides = [1, 1]} : vector<2x512xf32> to vector<1x512xf32>
    %197 = vector.broadcast %196 : vector<1x512xf32> to vector<32x512xf32>
    %198 = arith.addf %195, %197 : vector<32x512xf32>
    %cst_60 = arith.constant 0.000000e+00 : f32
    %199 = vector.broadcast %cst_60 : f32 to vector<32x512xf32>
    %200 = arith.cmpf ogt, %198, %199 : vector<32x512xf32>
    %cst_61 = arith.constant 2.000000e-01 : f32
    %201 = vector.broadcast %cst_61 : f32 to vector<32x512xf32>
    %202 = arith.mulf %201, %198 : vector<32x512xf32>
    %203 = arith.select %200, %198, %202 : vector<32x512xi1>, vector<32x512xf32>
    %204 = arith.truncf %203 : vector<32x512xf32> to vector<32x512xbf16>
    %c0_62 = arith.constant 0 : index
    %c0_63 = arith.constant 0 : index
    %205 = vector.load %arg10[%c0_62, %c0_63] : memref<2x256xf32, #tpu.memory_space<vmem>>, vector<2x256xf32>
    %c0_64 = arith.constant 0 : index
    %c0_65 = arith.constant 0 : index
    %206 = vector.load %arg9[%c0_64, %c0_65] : memref<512x256xbf16, #tpu.memory_space<vmem>>, vector<512x256xbf16>
    %cst_66 = arith.constant dense<0.000000e+00> : vector<32x256xf32>
    %207 = tpu.matmul %204, %206, %cst_66 {dimension_numbers = #tpu.dot_dimension_numbers<[1], [0], [0], [1], [0, 0, 1, 1], [], []>} : vector<32x512xbf16>, vector<512x256xbf16>, vector<32x256xf32> -> vector<32x256xf32>
    %208 = vector.extract_strided_slice %205 {offsets = [0, 0], sizes = [1, 256], strides = [1, 1]} : vector<2x256xf32> to vector<1x256xf32>
    %209 = vector.broadcast %208 : vector<1x256xf32> to vector<32x256xf32>
    %210 = arith.mulf %207, %209 : vector<32x256xf32>
    %211 = vector.extract_strided_slice %205 {offsets = [1, 0], sizes = [1, 256], strides = [1, 1]} : vector<2x256xf32> to vector<1x256xf32>
    %212 = vector.broadcast %211 : vector<1x256xf32> to vector<32x256xf32>
    %213 = arith.addf %210, %212 : vector<32x256xf32>
    %cst_67 = arith.constant 0.000000e+00 : f32
    %214 = vector.broadcast %cst_67 : f32 to vector<32x256xf32>
    %215 = arith.cmpf ogt, %213, %214 : vector<32x256xf32>
    %cst_68 = arith.constant 2.000000e-01 : f32
    %216 = vector.broadcast %cst_68 : f32 to vector<32x256xf32>
    %217 = arith.mulf %216, %213 : vector<32x256xf32>
    %218 = arith.select %215, %213, %217 : vector<32x256xi1>, vector<32x256xf32>
    %219 = arith.truncf %218 : vector<32x256xf32> to vector<32x256xbf16>
    %c0_69 = arith.constant 0 : index
    %c0_70 = arith.constant 0 : index
    %220 = vector.load %arg11[%c0_69, %c0_70] : memref<256x128xbf16, #tpu.memory_space<vmem>>, vector<256x128xbf16>
    %cst_71 = arith.constant dense<0.000000e+00> : vector<32x128xf32>
    %221 = tpu.matmul %219, %220, %cst_71 {dimension_numbers = #tpu.dot_dimension_numbers<[1], [0], [0], [1], [0, 0, 1, 1], [], []>} : vector<32x256xbf16>, vector<256x128xbf16>, vector<32x128xf32> -> vector<32x128xf32>
    %c0_72 = arith.constant 0 : index
    %c0_73 = arith.constant 0 : index
    %222 = vector.load %arg12[%c0_72, %c0_73] : memref<1x128xf32, #tpu.memory_space<vmem>>, vector<1x128xf32>
    %223 = vector.broadcast %222 : vector<1x128xf32> to vector<32x128xf32>
    %224 = arith.addf %221, %223 : vector<32x128xf32>
    %c0_74 = arith.constant 0 : index
    %c0_75 = arith.constant 0 : index
    %c0_76 = arith.constant 0 : index
    %225 = vector.load %arg13[%c0_74, %c0_75, %c0_76] : memref<1x32x128xf32, #tpu.memory_space<vmem>>, vector<1x32x128xf32>
    %226 = vector.shape_cast %225 : vector<1x32x128xf32> to vector<32x128xf32>
    %227 = vector.shape_cast %224 : vector<32x128xf32> to vector<1x32x128xf32>
    tpu.vector_store %arg13[%c0_74, %c0_75, %c0_76], %227 {strides = array<i32>} : memref<1x32x128xf32, #tpu.memory_space<vmem>>, vector<1x32x128xf32>,
    return
  }
  func.func @transform_0(%arg0: i32) -> (i32, i32, i32) {
    %c0_i32 = arith.constant 0 : i32
    %c0_i32_0 = arith.constant 0 : i32
    %c0_i32_1 = arith.constant 0 : i32
    return %arg0, %c0_i32, %c0_i32_0 : i32, i32, i32
  }
  func.func @transform_1(%arg0: i32) -> (i32, i32, i32) {
    %c0_i32 = arith.constant 0 : i32
    %c0_i32_0 = arith.constant 0 : i32
    %c0_i32_1 = arith.constant 0 : i32
    return %arg0, %c0_i32, %c0_i32_0 : i32, i32, i32
  }
  func.func @transform_2(%arg0: i32) -> (i32, i32) {
    %c0_i32 = arith.constant 0 : i32
    %c0_i32_0 = arith.constant 0 : i32
    %c0_i32_1 = arith.constant 0 : i32
    return %c0_i32, %c0_i32_0 : i32, i32
  }
  func.func @transform_3(%arg0: i32) -> (i32, i32) {
    %c0_i32 = arith.constant 0 : i32
    %c0_i32_0 = arith.constant 0 : i32
    %c0_i32_1 = arith.constant 0 : i32
    return %c0_i32, %c0_i32_0 : i32, i32
  }
  func.func @transform_4(%arg0: i32) -> (i32, i32) {
    %c0_i32 = arith.constant 0 : i32
    %c0_i32_0 = arith.constant 0 : i32
    %c0_i32_1 = arith.constant 0 : i32
    return %c0_i32, %c0_i32_0 : i32, i32
  }
  func.func @transform_5(%arg0: i32) -> (i32, i32) {
    %c0_i32 = arith.constant 0 : i32
    %c0_i32_0 = arith.constant 0 : i32
    %c0_i32_1 = arith.constant 0 : i32
    return %c0_i32, %c0_i32_0 : i32, i32
  }
  func.func @transform_6(%arg0: i32) -> (i32, i32) {
    %c0_i32 = arith.constant 0 : i32
    %c0_i32_0 = arith.constant 0 : i32
    %c0_i32_1 = arith.constant 0 : i32
    return %c0_i32, %c0_i32_0 : i32, i32
  }
  func.func @transform_7(%arg0: i32) -> (i32, i32) {
    %c0_i32 = arith.constant 0 : i32
    %c0_i32_0 = arith.constant 0 : i32
    %c0_i32_1 = arith.constant 0 : i32
    return %c0_i32, %c0_i32_0 : i32, i32
  }
  func.func @transform_8(%arg0: i32) -> (i32, i32) {
    %c0_i32 = arith.constant 0 : i32
    %c0_i32_0 = arith.constant 0 : i32
    %c0_i32_1 = arith.constant 0 : i32
    return %c0_i32, %c0_i32_0 : i32, i32
  }
  func.func @transform_9(%arg0: i32) -> (i32, i32) {
    %c0_i32 = arith.constant 0 : i32
    %c0_i32_0 = arith.constant 0 : i32
    %c0_i32_1 = arith.constant 0 : i32
    return %c0_i32, %c0_i32_0 : i32, i32
  }
  func.func @transform_10(%arg0: i32) -> (i32, i32) {
    %c0_i32 = arith.constant 0 : i32
    %c0_i32_0 = arith.constant 0 : i32
    %c0_i32_1 = arith.constant 0 : i32
    return %c0_i32, %c0_i32_0 : i32, i32
  }
  func.func @transform_11(%arg0: i32) -> (i32, i32) {
    %c0_i32 = arith.constant 0 : i32
    %c0_i32_0 = arith.constant 0 : i32
    %c0_i32_1 = arith.constant 0 : i32
    return %c0_i32, %c0_i32_0 : i32, i32
  }
  func.func @transform_12(%arg0: i32) -> (i32, i32, i32) {
    %c0_i32 = arith.constant 0 : i32
    %c0_i32_0 = arith.constant 0 : i32
    %c0_i32_1 = arith.constant 0 : i32
    return %arg0, %c0_i32, %c0_i32_0 : i32, i32, i32
  }
}

</mosaic_0001>

<bundles_post_ra>
// kernel: gcn_s_forward.1
= control target key start
LH: loop header
LB: loop body
LE: loop exit
PB: predicated region body
PF: predicated region fallthrough
CT: control target
= control target key end

     0   :  { %17 = vsyncpa [#allocation3], 0  ;;  %s7551_s0 = inlined_call_operand.vmem [shape: f32[2,3,32], index: 0, kind: input, shape index: {}]   ;;  %s7552_s1 = inlined_call_operand.vmem [shape: f32[2,32,3], index: 1, kind: input, shape index: {}]   ;;  %s7553_s2 = inlined_call_operand.vmem [shape: f32[3,128], index: 2, kind: input, shape index: {}]   ;;  %s7554_s3 = inlined_call_operand.vmem [shape: f32[2,128], index: 3, kind: input, shape index: {}]   ;;  %s7555_s4 = inlined_call_operand.hbm [shape: bf16[128,1024], index: 4, kind: input, shape index: {}]   ;;  %s7556_s5 = inlined_call_operand.vmem [shape: f32[2,1024], index: 5, kind: input, shape index: {}]   ;;  %s7557_s6 = inlined_call_operand.hbm [shape: bf16[1024,512], index: 6, kind: input, shape index: {}]   ;;  %s7558_s7 = inlined_call_operand.vmem [shape: f32[2,512], index: 7, kind: input, shape index: {}]   ;;  %s7559_s8 = inlined_call_operand.hbm [shape: bf16[512,256], index: 8, kind: input, shape index: {}]   ;;  %s7560_s9 = inlined_call_operand.vmem [shape: f32[2,256], index: 9, kind: input, shape index: {}]   ;;  %s7561_s10 = inlined_call_operand.hbm [shape: bf16[256,128], index: 10, kind: input, shape index: {}]   ;;  %s7562_s11 = inlined_call_operand.vmem [shape: f32[1,128], index: 11, kind: input, shape index: {}]   ;;  %s7563_s12 = inlined_call_operand.vmem [shape: f32[2,32,128], index: 12, kind: output, shape index: {}]  }
   0x1   :  { %18 = vsyncpa [#allocation5], 0 }
   0x2   :  { %19 = vsyncpa [#allocation8], 0  ;;  %s6606_s21 = smov 0  }
   0x3 LB: > { %7567 = sst [smem:[#allocation12_spill]] %s6525_s21  ;;  %s6527_s22 = smov [#allocation4]   ;;  %s6525_s21 = sphi %s6606_s21, %s25_s21  }
   0x4   : > { %s352_s23 = sshll.u32 %s6527_s22, 4  ;;  %s6612_s24 = sadd.s32 4294967295, %s6525_s21   ;;  %s6617_s23 = int_to_ptr.vmem [resolvable:$true] %s352_s23 }
   0x5   : > { %p5256_p0 = scmp.ge.s32.totalorder %s6525_s21, 1  ;;  %p318_p1 = scmp.lt.s32.totalorder %s6525_s21, 3 }
   0x6   : > { %p7565_p2 = scmp.eq.s32.totalorder %s6612_s24, 0  ;;  %s6528_s26 = smov [#allocation2]  }
   0x7   : > { %p6619_p3 = pnand %p5256_p0, %p318_p1  ;;  %s336_s27 = sshll.u32 %s6528_s26, 4  ;;  %s6625_s27 = int_to_ptr.vmem [resolvable:$true] %s336_s27 }
   0x8   : > { %s6529_s29 = smov [#allocation6]   ;;  %s6395_s15 = scalar_lea.hbm %s7557_s6, 32768 }
   0x9   : > { %s7568_s25 = scalar_select %p6619_p3, 1, 0 }
   0xa   : > { %p5845_p4 = pneg %p6619_p3  ;;  %s6633_s30 = sshll.u32 %s6529_s29, 4  ;;  %s369_s30 = int_to_ptr.vmem [resolvable:$true] %s6633_s30 }
   0xb   : > { %p6396_p6 = scmp.ne.s32.totalorder %s7557_s6, %s6395_s15  ;;  %p6402_p10 = scmp.lt.u32.totalorder %s6395_s15, %s7557_s6 }
   0xc   : > { %p6629_p5 = pnand %p7565_p2, %p5845_p4 }
   0xe   : > { %p6643_p7 = pneg %p6629_p5 }
  0x10   : > { %p6398_p8 = pnand %p6643_p7, %p6396_p6 }
  0x12   : > { %p6399_p9 = pneg %p6398_p8 }
  0x14   : > { %p6404_p11 = pnand %p6402_p10, %p6399_p9 }
  0x16   : > { %6407 = shalt.err (!%p6404_p11)
}
  0x17   : > { %s6408_s22 = scalar_lea.vmem %s6617_s23, 32768  ;;  %p6416_p1 = scmp.lt.s32.totalorder %s6617_s23, %s6617_s23 }
  0x18   : > { %p6409_p12 = scmp.ne.s32.totalorder %s6617_s23, %s6408_s22  ;;  %p6417_p4 = scmp.lt.s32.totalorder %s6408_s22, %s6408_s22 }
  0x1a   : > { %p6411_p13 = pnand %p6409_p12, %p6643_p7  ;;  %p6418_p6 = por %p6417_p4, %p6416_p1 }
  0x1c   : > { %p6412_p0 = pneg %p6411_p13 }
  0x1e   : > { %p6419_p8 = pnand %p6418_p6, %p6412_p0 }
  0x20   : > { %6422 = shalt.err (!%p6419_p8)
}
  0x21   : > { %s6530_s26 = smov 256   ;;  %s6531_s29 = smov 16  }
  0x22   : > { %5851 = dma.hbm_to_vmem [thread:$0]  (!%p6629_p5), %s7557_s6, 32768, %s6617_s23, [#allocation5], %s6530_s26, %s6530_s26, %s6531_s29  }
  0x23   : > { %s6423_s17 = scalar_lea.hbm %s7555_s4, 8192 }
  0x24   : > { %p6424_p9 = scmp.ne.s32.totalorder %s7555_s4, %s6423_s17  ;;  %p6430_p12 = scmp.lt.u32.totalorder %s6423_s17, %s7555_s4 }
  0x26   : > { %p6426_p10 = pnand %p6424_p9, %p6643_p7 }
  0x28   : > { %p6427_p11 = pneg %p6426_p10 }
  0x2a   : > { %p6432_p13 = pnand %p6430_p12, %p6427_p11 }
  0x2c   : > { %6435 = shalt.err (!%p6432_p13)
}
  0x2d   : > { %s6436_s23 = scalar_lea.vmem %s6625_s27, 8192  ;;  %p6444_p6 = scmp.lt.s32.totalorder %s6625_s27, %s6625_s27 }
  0x2e   : > { %p6437_p0 = scmp.ne.s32.totalorder %s6625_s27, %s6436_s23  ;;  %p6445_p8 = scmp.lt.s32.totalorder %s6436_s23, %s6436_s23 }
  0x30   : > { %p6439_p1 = pnand %p6437_p0, %p6643_p7  ;;  %p6446_p9 = por %p6445_p8, %p6444_p6 }
  0x32   : > { %p6440_p4 = pneg %p6439_p1 }
  0x34   : > { %p6447_p10 = pnand %p6446_p9, %p6440_p4 }
  0x36   : > { %6450 = shalt.err (!%p6447_p10)
}
  0x37   : > { %s6532_s26 = smov 512   ;;  %s6533_s21 = smov 32  }
  0x38   : > { %5848 = dma.hbm_to_vmem [thread:$0]  (!%p6629_p5), %s7555_s4, 8192, %s6625_s27, [#allocation3], %s6532_s26, %s6532_s26, %s6533_s21  }
  0x39   : > { %s6451_s16 = scalar_lea.hbm %s7559_s8, 8192 }
  0x3a   : > { %p6452_p11 = scmp.ne.s32.totalorder %s7559_s8, %s6451_s16  ;;  %p6458_p0 = scmp.lt.u32.totalorder %s6451_s16, %s7559_s8 }
  0x3c   : > { %p6454_p12 = pnand %p6452_p11, %p6643_p7 }
  0x3e   : > { %p6455_p13 = pneg %p6454_p12 }
  0x40   : > { %p6460_p1 = pnand %p6458_p0, %p6455_p13 }
  0x42   : > { %6463 = shalt.err (!%p6460_p1)
}
  0x43   : > { %s6464_s23 = scalar_lea.vmem %s369_s30, 8192  ;;  %p6472_p9 = scmp.lt.s32.totalorder %s369_s30, %s369_s30 }
  0x44   : > { %p6465_p4 = scmp.ne.s32.totalorder %s369_s30, %s6464_s23  ;;  %p6473_p10 = scmp.lt.s32.totalorder %s6464_s23, %s6464_s23 }
  0x46   : > { %p6467_p6 = pnand %p6465_p4, %p6643_p7  ;;  %p6474_p2 = por %p6473_p10, %p6472_p9 }
  0x48   : > { %p6468_p8 = pneg %p6467_p6 }
  0x4a   : > { %p6475_p3 = pnand %p6474_p2, %p6468_p8 }
  0x4c   : > { %6478 = shalt.err (!%p6475_p3)
}
  0x4d   : > { %s6534_s27 = smov 128   ;;  %s6535_s26 = smov 8  }
  0x4e   : > { %5854 = dma.hbm_to_vmem [thread:$0]  (!%p6629_p5), %s7559_s8, 8192, %s369_s30, [#allocation5], %s6534_s27, %s6534_s27, %s6535_s26  }
  0x4f   : > { %s6536_s13 = smov [#allocation7]   ;;  %s6479_s17 = scalar_lea.hbm %s7561_s10, 2048 }
  0x50   : > { %s384_s14 = sshll.u32 %s6536_s13, 4  ;;  %p6480_p2 = scmp.ne.s32.totalorder %s7561_s10, %s6479_s17  ;;  %s385_s14 = int_to_ptr.vmem [resolvable:$true] %s384_s14 }
  0x51   : > { %p6486_p12 = scmp.lt.u32.totalorder %s6479_s17, %s7561_s10 }
  0x52   : > { %p6482_p3 = pnand %p6480_p2, %p6643_p7 }
  0x54   : > { %p6483_p11 = pneg %p6482_p3 }
  0x56   : > { %p6488_p13 = pnand %p6486_p12, %p6483_p11 }
  0x58   : > { %6491 = shalt.err (!%p6488_p13)
}
  0x59   : > { %s6492_s30 = scalar_lea.vmem %s385_s14, 2048  ;;  %p6500_p6 = scmp.lt.s32.totalorder %s385_s14, %s385_s14 }
  0x5a   : > { %p6493_p0 = scmp.ne.s32.totalorder %s385_s14, %s6492_s30  ;;  %p6501_p8 = scmp.lt.s32.totalorder %s6492_s30, %s6492_s30 }
  0x5c   : > { %p6495_p1 = pnand %p6493_p0, %p6643_p7  ;;  %p6502_p9 = por %p6501_p8, %p6500_p6 }
  0x5e   : > { %p6496_p4 = pneg %p6495_p1 }
  0x60   : > { %p6503_p10 = pnand %p6502_p9, %p6496_p4 }
  0x62   : > { %6506 = shalt.err (!%p6503_p10)
}
  0x63   : > { %s6537_s27 = smov 64   ;;  %s6538_s26 = smov 4  }
  0x64   : > { %5857 = dma.hbm_to_vmem [thread:$0]  (!%p6629_p5), %s7561_s10, 2048, %s385_s14, [#allocation8], %s6537_s27, %s6537_s27, %s6538_s26  }
  0x65   : > { %p7571_p2 = scmp.ne.s32.totalorder %s7568_s25, 0 }
  0x66   : > { %p7572_p3 = scmp.eq.s32.totalorder (!%p7571_p2), %s6612_s24, 0 }
  0x67   : > { %418 = sbr.rel (%p7571_p2) target bundleno = 2579 (0xa13), region = 68 }
  0x6e   : > { %6512 = dma.done.wait (%p7572_p3), [#allocation3], 8192   ;;  %p7573_p7 = pmov %p7572_p3 }
  0x6f   : > { %p7574_p11 = pmov %p7572_p3 }
  0x70   : > { %6514 = vsyncadd (%p7573_p7), [#allocation3], 4294959104 }
  0x71   : > { %6516 = dma.done.wait (%p7574_p11), [#allocation5], 40960   ;;  %p7575_p12 = pmov %p7572_p3 }
  0x72   : > { %p7576_p13 = pmov %p7572_p3 }
  0x73   : > { %6518 = vsyncadd (%p7575_p12), [#allocation5], 4294926336 }
  0x74   : > { %6520 = dma.done.wait (%p7576_p13), [#allocation8], 2048   ;;  %p7577_p5 = pmov %p7572_p3 }
  0x75   : > { %p476_p0 = scmp.lt.s32.totalorder %s6612_s24, 1  ;;  %vm509_vm0 = vcmask 1042432   ;;  %vm496_vm1 = vcmask 23552   ;;  %vm633_vm2 = vcmask 261120   ;;  %v622_v37 = vlaneseq }
  0x76   : > { %6522 = vsyncadd (%p7577_p5), [#allocation8], 4294965248 }
  0x77   : > { %s7636_s24 = smov (!%p476_p0, %s6612_s24), 1  ;;  %v6776_v40 = vshrl.u32 %v622_v37, 7  ;;  %v628_v61 = vand.u32 127, %v622_v37 }
  0x78   : > { %s5267_s25 = sshll.u32 %s7636_s24, 2  ;;  %s5693_s28 = sshll.u32 %s7636_s24, 5 }
  0x79   : > { %s479_s14 = scalar_lea.vmem %s7551_s0, %s5267_s25  ;;  %s6752_s17 = scalar_lea.vmem %s7552_s1, %s5693_s28  ;;  %v6779_v43 = vadd.s32 8, %v6776_v40  ;;  %v6782_v44 = vadd.s32 16, %v6776_v40  ;;  %v6785_v45 = vadd.s32 24, %v6776_v40  ;;  %vm629_vm15 = vcmp.eq.s32.totalorder %v6776_v40, %v628_v61 }
  0x7a   : > { %v491_v0 = vld [vmem:[%s479_s14] sm:$0x7]  ;;  %v493_v2 = vld [vmem:[%s6752_s17 + $0x8] sm:$0xff]  ;;  %v494_v3 = vld [vmem:[%s6752_s17 + $0x10] sm:$0xff]  ;;  %s489_s19 = scalar_lea.vmem %s7563_s12, %s5693_s28 }
  0x7b   : > { %v492_v1 = vld [vmem:[%s6752_s17] sm:$0xff]  ;;  %5741 = vmatprep.subr.msk.mxu1 %vm509_vm0, %v491_v0  ;;  %v495_v4 = vld [vmem:[%s6752_s17 + $0x18] sm:$0xff]  ;;  %v599_v6 = vmul.f32 %v493_v2, %v493_v2  ;;  %v600_v7 = vmul.f32 %v494_v3, %v494_v3  ;;  %vm632_vm12 = vcmp.eq.s32.totalorder %v6785_v45, %v628_v61  ;;  %vm630_vm14 = vcmp.eq.s32.totalorder %v6779_v43, %v628_v61 }
  0x7c   : > { %5743 = vmatprep.mubr.msk.f32.mxu1 %vm496_vm1, %v492_v1  ;;  %v598_v5 = vmul.f32 %v492_v1, %v492_v1  ;;  %5742 = vmatpush3.msk.msra.mxu1 %vm509_vm0, %v491_v0  ;;  %v601_v8 = vmul.f32 %v495_v4, %v495_v4 }
  0x7d   : > { %5744 = vmatmul.mubr.msk.f32.vlgmr.msra.gmra.mrb[0].mxu1 %vm496_vm1, %v493_v2  ;;  %v608_v10 = vsel %vm496_vm1, %v600_v7, 0.0  ;;  %v605_v11 = vsel %vm496_vm1, %v599_v6, 0.0 }
  0x7e   : > { %v602_v9 = vsel %vm496_vm1, %v598_v5, 0.0  ;;  %5746 = vmatprep.mubr.msk.f32.mxu1 %vm496_vm1, %v494_v3  ;;  %609 = vadd.xlane.f32.xlu1 %v608_v10  ;;  %v611_v12 = vsel %vm496_vm1, %v601_v8, 0.0 }
  0x7f   : > { %603 = vadd.xlane.f32.xlu0 %v602_v9 }
  0x81   : > { %5747 = vmatmul.mubr.msk.f32.gmra.mrb[2].mxu1 %vm496_vm1, %v495_v4 }
  0x82   : > { %5751 = vmatprep.mubr.msk.f32.mxu1 %vm496_vm1, %v492_v1  ;;  %612 = vadd.xlane.f32.xlu1 %v611_v12 }
  0x83   : > { %606 = vadd.xlane.f32.xlu0 %v605_v11 }
 0x10b   : > { %v610_v14 = vpop.xlane.xlu1 %609 }
 0x10c   : > { %v604_v13 = vpop.xlane.xlu0 %603 }
 0x10f   : > { %v613_v23 = vpop.xlane.xlu1 %612 }
 0x110   : > { %v607_v16 = vpop.xlane.xlu0 %606 }
 0x150   : > { %v5745_v15 = vpop.f32.mrb[0].mxu1 }
 0x151   : > { %v615_v17 = vmul.f32 2.0, %v5745_v15  ;;  %v579_v18 = vpop.f32.mrb[1].mxu1 }
 0x152   : > { %v614_v19 = vmul.f32 2.0, %v579_v18 }
 0x153   : > { %v6769_v20 = vsub.f32 %v615_v17, %v607_v16 }
 0x154   : > { %v618_v21 = vsub.f32 %v614_v19, %v604_v13  ;;  %v5748_v22 = vpop.f32.mrb[2].mxu1 }
 0x155   : > { %v635_v24 = vsel %vm633_vm2, %v6769_v20, -inf  ;;  %v617_v25 = vmul.f32 2.0, %v5748_v22  ;;  %v589_v26 = vpop.f32.mrb[3].mxu1 }
 0x156   : > { %v634_v27 = vsel %vm633_vm2, %v618_v21, -inf  ;;  %v616_v28 = vmul.f32 2.0, %v589_v26 }
 0x157   : > { %v638_v29 = vmax.f32 %v634_v27, %v635_v24  ;;  %v621_v30 = vsub.f32 %v617_v25, %v613_v23 }
 0x158   : > { %v620_v31 = vsub.f32 %v616_v28, %v610_v14 }
 0x159   : > { %v637_v32 = vsel %vm633_vm2, %v621_v30, -inf }
 0x15a   : > { %v636_v33 = vsel %vm633_vm2, %v620_v31, -inf }
 0x15b   : > { %v639_v34 = vmax.f32 %v636_v33, %v637_v32 }
 0x15d   : > { %v640_v35 = vmax.f32 %v638_v29, %v639_v34 }
 0x15f   : > { %v641_v36 = vrot.slane %v640_v35, 4 }
 0x161   : > { %v642_v38 = vmax.f32 %v640_v35, %v641_v36 }
 0x163   : > { %v643_v39 = vrot.slane %v642_v38, 2 }
 0x165   : > { %v644_v41 = vmax.f32 %v642_v38, %v643_v39 }
 0x167   : > { %v645_v42 = vrot.slane %v644_v41, 1 }
 0x169   : > { %v646_v46 = vmax.f32 %v644_v41, %v645_v42 }
 0x16b   : > { %vm647_vm3 = vcmp.ge.f32.partialorder %v618_v21, %v646_v46  ;;  %vm648_vm4 = vcmp.ge.f32.partialorder %v6769_v20, %v646_v46  ;;  %vm649_vm5 = vcmp.ge.f32.partialorder %v620_v31, %v646_v46  ;;  %vm650_vm6 = vcmp.ge.f32.partialorder %v621_v30, %v646_v46 }
 0x16c   : > { %v651_v47 = vsel %vm647_vm3, %v6776_v40, 32  ;;  %v652_v48 = vsel %vm648_vm4, %v6779_v43, 32  ;;  %v653_v49 = vsel %vm649_vm5, %v6782_v44, 32  ;;  %v654_v50 = vsel %vm650_vm6, %v6785_v45, 32 }
 0x16d   : > { %v655_v51 = vsel %vm633_vm2, %v651_v47, 2147483647  ;;  %v656_v52 = vsel %vm633_vm2, %v652_v48, 2147483647  ;;  %v657_v53 = vsel %vm633_vm2, %v653_v49, 2147483647  ;;  %vm631_vm3 = vcmp.eq.s32.totalorder %v6782_v44, %v628_v61 }
 0x16e   : > { %v658_v54 = vsel %vm633_vm2, %v654_v50, 2147483647  ;;  %vm659_vm7 = vcmp.lt.s32.totalorder %v655_v51, %v656_v52 }
 0x16f   : > { %v660_v55 = vsel %vm659_vm7, %v655_v51, %v656_v52  ;;  %vm661_vm8 = vcmp.lt.s32.totalorder %v657_v53, %v658_v54 }
 0x170   : > { %v662_v56 = vsel %vm661_vm8, %v657_v53, %v658_v54 }
 0x171   : > { %vm663_vm9 = vcmp.lt.s32.totalorder %v660_v55, %v662_v56 }
 0x172   : > { %v664_v57 = vsel %vm663_vm9, %v660_v55, %v662_v56 }
 0x173   : > { %v665_v58 = vrot.slane %v664_v57, 4 }
 0x175   : > { %vm666_vm10 = vcmp.lt.s32.totalorder %v664_v57, %v665_v58 }
 0x176   : > { %v667_v59 = vsel %vm666_vm10, %v664_v57, %v665_v58 }
 0x177   : > { %v668_v60 = vrot.slane %v667_v59, 2 }
 0x179   : > { %vm669_vm11 = vcmp.lt.s32.totalorder %v667_v59, %v668_v60 }
 0x17a   : > { %v670_v62 = vsel %vm669_vm11, %v667_v59, %v668_v60 }
 0x17b   : > { %v671_v63 = vrot.slane %v670_v62, 1 }
 0x17d   : > { %vm672_vm13 = vcmp.lt.s32.totalorder %v670_v62, %v671_v63 }
 0x17e   : > { %v673_v0 = vsel %vm672_vm13, %v670_v62, %v671_v63 }
 0x17f   : > { %vm674_vm4 = vcmp.eq.s32.totalorder %v6776_v40, %v673_v0  ;;  %vm675_vm5 = vcmp.eq.s32.totalorder %v6779_v43, %v673_v0  ;;  %vm676_vm6 = vcmp.eq.s32.totalorder %v6782_v44, %v673_v0  ;;  %vm677_vm7 = vcmp.eq.s32.totalorder %v6785_v45, %v673_v0 }
 0x180   : > { %v678_v1 = vsel %vm674_vm4, -inf, %v618_v21  ;;  %v679_v2 = vsel %vm675_vm5, -inf, %v6769_v20  ;;  %v680_v3 = vsel %vm676_vm6, -inf, %v620_v31  ;;  %v681_v4 = vsel %vm677_vm7, -inf, %v621_v30  ;;  %vm6809_vm8 = vmor %vm632_vm12, %vm677_vm7 }
 0x181   : > { %v686_v6 = vsel %vm633_vm2, %v678_v1, -inf  ;;  %v687_v7 = vsel %vm633_vm2, %v679_v2, -inf  ;;  %v688_v8 = vsel %vm633_vm2, %v680_v3, -inf  ;;  %v689_v9 = vsel %vm633_vm2, %v681_v4, -inf  ;;  %vm6819_vm9 = vmor %vm630_vm14, %vm675_vm5 }
 0x182   : > { %v690_v11 = vmax.f32 %v686_v6, %v687_v7  ;;  %v691_v12 = vmax.f32 %v688_v8, %v689_v9  ;;  %vm6827_vm10 = vmor %vm629_vm15, %vm674_vm4 }
 0x183   : > { %vm6835_vm11 = vmor %vm631_vm3, %vm676_vm6 }
 0x184   : > { %v692_v15 = vmax.f32 %v690_v11, %v691_v12 }
 0x186   : > { %v693_v16 = vrot.slane %v692_v15, 4 }
 0x188   : > { %v694_v17 = vmax.f32 %v692_v15, %v693_v16 }
 0x18a   : > { %v695_v18 = vrot.slane %v694_v17, 2 }
 0x18c   : > { %v696_v19 = vmax.f32 %v694_v17, %v695_v18 }
 0x18e   : > { %v697_v20 = vrot.slane %v696_v19, 1 }
 0x190   : > { %v698_v21 = vmax.f32 %v696_v19, %v697_v20 }
 0x192   : > { %vm699_vm12 = vcmp.ge.f32.partialorder %v678_v1, %v698_v21  ;;  %vm700_vm13 = vcmp.ge.f32.partialorder %v679_v2, %v698_v21  ;;  %vm701_vm14 = vcmp.ge.f32.partialorder %v680_v3, %v698_v21  ;;  %vm702_vm15 = vcmp.ge.f32.partialorder %v681_v4, %v698_v21 }
 0x193   : > { %v703_v22 = vsel %vm699_vm12, %v6776_v40, 32  ;;  %v704_v23 = vsel %vm700_vm13, %v6779_v43, 32  ;;  %v705_v24 = vsel %vm701_vm14, %v6782_v44, 32  ;;  %v706_v25 = vsel %vm702_vm15, %v6785_v45, 32 }
 0x194   : > { %v707_v26 = vsel %vm633_vm2, %v703_v22, 2147483647  ;;  %v708_v27 = vsel %vm633_vm2, %v704_v23, 2147483647  ;;  %v709_v28 = vsel %vm633_vm2, %v705_v24, 2147483647 }
 0x195   : > { %v710_v29 = vsel %vm633_vm2, %v706_v25, 2147483647  ;;  %vm711_vm3 = vcmp.lt.s32.totalorder %v707_v26, %v708_v27 }
 0x196   : > { %v712_v30 = vsel %vm711_vm3, %v707_v26, %v708_v27  ;;  %vm713_vm4 = vcmp.lt.s32.totalorder %v709_v28, %v710_v29 }
 0x197   : > { %v714_v31 = vsel %vm713_vm4, %v709_v28, %v710_v29 }
 0x198   : > { %vm715_vm5 = vcmp.lt.s32.totalorder %v712_v30, %v714_v31 }
 0x199   : > { %v716_v32 = vsel %vm715_vm5, %v712_v30, %v714_v31 }
 0x19a   : > { %v717_v33 = vrot.slane %v716_v32, 4 }
 0x19c   : > { %vm718_vm6 = vcmp.lt.s32.totalorder %v716_v32, %v717_v33 }
 0x19d   : > { %v719_v34 = vsel %vm718_vm6, %v716_v32, %v717_v33 }
 0x19e   : > { %v720_v35 = vrot.slane %v719_v34, 2 }
 0x1a0   : > { %vm721_vm7 = vcmp.lt.s32.totalorder %v719_v34, %v720_v35 }
 0x1a1   : > { %v722_v36 = vsel %vm721_vm7, %v719_v34, %v720_v35 }
 0x1a2   : > { %v723_v37 = vrot.slane %v722_v36, 1 }
 0x1a4   : > { %vm724_vm12 = vcmp.lt.s32.totalorder %v722_v36, %v723_v37 }
 0x1a5   : > { %v725_v38 = vsel %vm724_vm12, %v722_v36, %v723_v37 }
 0x1a6   : > { %vm726_vm13 = vcmp.eq.s32.totalorder %v6776_v40, %v725_v38  ;;  %vm727_vm14 = vcmp.eq.s32.totalorder %v6779_v43, %v725_v38  ;;  %vm728_vm15 = vcmp.eq.s32.totalorder %v6782_v44, %v725_v38  ;;  %vm729_vm3 = vcmp.eq.s32.totalorder %v6785_v45, %v725_v38 }
 0x1a7   : > { %v730_v39 = vsel %vm726_vm13, -inf, %v678_v1  ;;  %v731_v41 = vsel %vm727_vm14, -inf, %v679_v2  ;;  %v732_v42 = vsel %vm728_vm15, -inf, %v680_v3  ;;  %v733_v46 = vsel %vm729_vm3, -inf, %v681_v4  ;;  %vm6857_vm4 = vmor %vm6809_vm8, %vm729_vm3 }
 0x1a8   : > { %v738_v48 = vsel %vm633_vm2, %v730_v39, -inf  ;;  %v739_v49 = vsel %vm633_vm2, %v731_v41, -inf  ;;  %v740_v50 = vsel %vm633_vm2, %v732_v42, -inf  ;;  %v741_v51 = vsel %vm633_vm2, %v733_v46, -inf  ;;  %vm6867_vm5 = vmor %vm6819_vm9, %vm727_vm14 }
 0x1a9   : > { %v742_v53 = vmax.f32 %v738_v48, %v739_v49  ;;  %v743_v54 = vmax.f32 %v740_v50, %v741_v51  ;;  %vm6875_vm8 = vmor %vm6827_vm10, %vm726_vm13 }
 0x1aa   : > { %vm6883_vm6 = vmor %vm6835_vm11, %vm728_vm15 }
 0x1ab   : > { %v744_v57 = vmax.f32 %v742_v53, %v743_v54 }
 0x1ad   : > { %v745_v58 = vrot.slane %v744_v57, 4 }
 0x1af   : > { %v746_v59 = vmax.f32 %v744_v57, %v745_v58 }
 0x1b1   : > { %v747_v60 = vrot.slane %v746_v59, 2 }
 0x1b3   : > { %v748_v61 = vmax.f32 %v746_v59, %v747_v60 }
 0x1b5   : > { %v749_v62 = vrot.slane %v748_v61, 1 }
 0x1b7   : > { %v750_v63 = vmax.f32 %v748_v61, %v749_v62 }
 0x1b9   : > { %vm751_vm9 = vcmp.ge.f32.partialorder %v730_v39, %v750_v63  ;;  %vm752_vm10 = vcmp.ge.f32.partialorder %v731_v41, %v750_v63  ;;  %vm753_vm7 = vcmp.ge.f32.partialorder %v732_v42, %v750_v63  ;;  %vm754_vm12 = vcmp.ge.f32.partialorder %v733_v46, %v750_v63 }
 0x1ba   : > { %v755_v0 = vsel %vm751_vm9, %v6776_v40, 32  ;;  %v756_v1 = vsel %vm752_vm10, %v6779_v43, 32  ;;  %v757_v2 = vsel %vm753_vm7, %v6782_v44, 32  ;;  %v758_v3 = vsel %vm754_vm12, %v6785_v45, 32 }
 0x1bb   : > { %v759_v4 = vsel %vm633_vm2, %v755_v0, 2147483647  ;;  %v760_v5 = vsel %vm633_vm2, %v756_v1, 2147483647  ;;  %v761_v6 = vsel %vm633_vm2, %v757_v2, 2147483647 }
 0x1bc   : > { %v762_v7 = vsel %vm633_vm2, %v758_v3, 2147483647  ;;  %vm763_vm11 = vcmp.lt.s32.totalorder %v759_v4, %v760_v5 }
 0x1bd   : > { %v764_v8 = vsel %vm763_vm11, %v759_v4, %v760_v5  ;;  %vm765_vm13 = vcmp.lt.s32.totalorder %v761_v6, %v762_v7 }
 0x1be   : > { %v766_v9 = vsel %vm765_vm13, %v761_v6, %v762_v7 }
 0x1bf   : > { %vm767_vm14 = vcmp.lt.s32.totalorder %v764_v8, %v766_v9 }
 0x1c0   : > { %v768_v10 = vsel %vm767_vm14, %v764_v8, %v766_v9 }
 0x1c1   : > { %v769_v11 = vrot.slane %v768_v10, 4 }
 0x1c3   : > { %vm770_vm15 = vcmp.lt.s32.totalorder %v768_v10, %v769_v11 }
 0x1c4   : > { %v771_v12 = vsel %vm770_vm15, %v768_v10, %v769_v11 }
 0x1c5   : > { %v772_v13 = vrot.slane %v771_v12, 2 }
 0x1c7   : > { %vm773_vm3 = vcmp.lt.s32.totalorder %v771_v12, %v772_v13 }
 0x1c8   : > { %v774_v14 = vsel %vm773_vm3, %v771_v12, %v772_v13 }
 0x1c9   : > { %v775_v15 = vrot.slane %v774_v14, 1 }
 0x1cb   : > { %vm776_vm9 = vcmp.lt.s32.totalorder %v774_v14, %v775_v15 }
 0x1cc   : > { %v777_v16 = vsel %vm776_vm9, %v774_v14, %v775_v15 }
 0x1cd   : > { %vm780_vm10 = vcmp.eq.s32.totalorder %v6782_v44, %v777_v16  ;;  %vm781_vm7 = vcmp.eq.s32.totalorder %v6785_v45, %v777_v16  ;;  %vm778_vm12 = vcmp.eq.s32.totalorder %v6776_v40, %v777_v16  ;;  %vm779_vm11 = vcmp.eq.s32.totalorder %v6779_v43, %v777_v16 }
 0x1ce   : > { %v784_v17 = vsel %vm780_vm10, -inf, %v732_v42  ;;  %v785_v18 = vsel %vm781_vm7, -inf, %v733_v46  ;;  %v782_v19 = vsel %vm778_vm12, -inf, %v730_v39  ;;  %v783_v20 = vsel %vm779_vm11, -inf, %v731_v41  ;;  %vm6905_vm13 = vmor %vm6867_vm5, %vm779_vm11 }
 0x1cf   : > { %v792_v22 = vsel %vm633_vm2, %v784_v17, -inf  ;;  %v793_v23 = vsel %vm633_vm2, %v785_v18, -inf  ;;  %v790_v24 = vsel %vm633_vm2, %v782_v19, -inf  ;;  %v791_v25 = vsel %vm633_vm2, %v783_v20, -inf  ;;  %vm6915_vm14 = vmor %vm6875_vm8, %vm778_vm12 }
 0x1d0   : > { %v795_v27 = vmax.f32 %v792_v22, %v793_v23  ;;  %v794_v28 = vmax.f32 %v790_v24, %v791_v25  ;;  %vm6923_vm5 = vmor %vm6857_vm4, %vm781_vm7 }
 0x1d1   : > { %vm6931_vm15 = vmor %vm6883_vm6, %vm780_vm10 }
 0x1d2   : > { %v796_v31 = vmax.f32 %v794_v28, %v795_v27 }
 0x1d4   : > { %v797_v32 = vrot.slane %v796_v31, 4 }
 0x1d6   : > { %v798_v33 = vmax.f32 %v796_v31, %v797_v32  ;;  %v1117_v32 = vld [vmem:[%s7553_s2] sm:$0x7] }
 0x1d7   : > { %5749 = vmatprep.subr.msk.mxu1 %vm509_vm0, %v1117_v32 }
 0x1d8   : > { %v799_v34 = vrot.slane %v798_v33, 2  ;;  %5750 = vmatpush3.msk.msra.mxu1 %vm509_vm0, %v1117_v32 }
 0x1da   : > { %v800_v35 = vmax.f32 %v798_v33, %v799_v34 }
 0x1dc   : > { %v801_v36 = vrot.slane %v800_v35, 1 }
 0x1de   : > { %v802_v37 = vmax.f32 %v800_v35, %v801_v36 }
 0x1e0   : > { %vm803_vm8 = vcmp.ge.f32.partialorder %v782_v19, %v802_v37  ;;  %vm804_vm4 = vcmp.ge.f32.partialorder %v783_v20, %v802_v37  ;;  %vm805_vm3 = vcmp.ge.f32.partialorder %v784_v17, %v802_v37  ;;  %vm806_vm9 = vcmp.ge.f32.partialorder %v785_v18, %v802_v37 }
 0x1e1   : > { %v807_v38 = vsel %vm803_vm8, %v6776_v40, 32  ;;  %v808_v39 = vsel %vm804_vm4, %v6779_v43, 32  ;;  %v809_v41 = vsel %vm805_vm3, %v6782_v44, 32  ;;  %v810_v42 = vsel %vm806_vm9, %v6785_v45, 32 }
 0x1e2   : > { %v811_v46 = vsel %vm633_vm2, %v807_v38, 2147483647  ;;  %v812_v47 = vsel %vm633_vm2, %v808_v39, 2147483647  ;;  %v813_v48 = vsel %vm633_vm2, %v809_v41, 2147483647 }
 0x1e3   : > { %v814_v49 = vsel %vm633_vm2, %v810_v42, 2147483647  ;;  %vm815_vm6 = vcmp.lt.s32.totalorder %v811_v46, %v812_v47  ;;  %v6392_v39 = vld [vmem:[%s6752_s17 + $0x8] sm:$0xff] }
 0x1e4   : > { %v816_v50 = vsel %vm815_vm6, %v811_v46, %v812_v47  ;;  %vm817_vm10 = vcmp.lt.s32.totalorder %v813_v48, %v814_v49  ;;  %5752 = vmatmul.mubr.msk.f32.vlgmr.msra.gmra.mrb[4].mxu1 %vm496_vm1, %v6392_v39 }
 0x1e5   : > { %v818_v51 = vsel %vm817_vm10, %v813_v48, %v814_v49  ;;  %v6393_v49 = vld [vmem:[%s6752_s17 + $0x10] sm:$0xff] }
 0x1e6   : > { %vm819_vm7 = vcmp.lt.s32.totalorder %v816_v50, %v818_v51  ;;  %5754 = vmatprep.mubr.msk.f32.mxu1 %vm496_vm1, %v6393_v49 }
 0x1e7   : > { %v820_v52 = vsel %vm819_vm7, %v816_v50, %v818_v51 }
 0x1e8   : > { %v821_v53 = vrot.slane %v820_v52, 4 }
 0x1ea   : > { %vm822_vm12 = vcmp.lt.s32.totalorder %v820_v52, %v821_v53 }
 0x1eb   : > { %v823_v54 = vsel %vm822_vm12, %v820_v52, %v821_v53 }
 0x1ec   : > { %v824_v55 = vrot.slane %v823_v54, 2 }
 0x1ee   : > { %vm825_vm11 = vcmp.lt.s32.totalorder %v823_v54, %v824_v55 }
 0x1ef   : > { %v826_v56 = vsel %vm825_vm11, %v823_v54, %v824_v55  ;;  %v6394_v55 = vld [vmem:[%s6752_s17 + $0x18] sm:$0xff] }
 0x1f0   : > { %v827_v57 = vrot.slane %v826_v56, 1  ;;  %5755 = vmatmul.mubr.msk.f32.gmra.mrb[6].mxu1 %vm496_vm1, %v6394_v55 }
 0x1f2   : > { %vm828_vm8 = vcmp.lt.s32.totalorder %v826_v56, %v827_v57 }
 0x1f3   : > { %v829_v58 = vsel %vm828_vm8, %v826_v56, %v827_v57 }
 0x1f4   : > { %vm830_vm4 = vcmp.eq.s32.totalorder %v6776_v40, %v829_v58  ;;  %vm831_vm3 = vcmp.eq.s32.totalorder %v6779_v43, %v829_v58  ;;  %vm832_vm9 = vcmp.eq.s32.totalorder %v6782_v44, %v829_v58  ;;  %vm833_vm6 = vcmp.eq.s32.totalorder %v6785_v45, %v829_v58 }
 0x1f5   : > { %v834_v59 = vsel %vm830_vm4, -inf, %v782_v19  ;;  %v835_v60 = vsel %vm831_vm3, -inf, %v783_v20  ;;  %v836_v61 = vsel %vm832_vm9, -inf, %v784_v17  ;;  %v837_v62 = vsel %vm833_vm6, -inf, %v785_v18  ;;  %vm6951_vm10 = vmor %vm6905_vm13, %vm831_vm3 }
 0x1f6   : > { %v842_v0 = vsel %vm633_vm2, %v834_v59, -inf  ;;  %v843_v1 = vsel %vm633_vm2, %v835_v60, -inf  ;;  %v844_v2 = vsel %vm633_vm2, %v836_v61, -inf  ;;  %v845_v3 = vsel %vm633_vm2, %v837_v62, -inf  ;;  %vm6961_vm7 = vmor %vm6915_vm14, %vm830_vm4 }
 0x1f7   : > { %v846_v5 = vmax.f32 %v842_v0, %v843_v1  ;;  %v847_v6 = vmax.f32 %v844_v2, %v845_v3  ;;  %vm6967_vm13 = vmor %vm6923_vm5, %vm833_vm6 }
 0x1f8   : > { %vm6975_vm12 = vmor %vm6931_vm15, %vm832_vm9 }
 0x1f9   : > { %v848_v9 = vmax.f32 %v846_v5, %v847_v6 }
 0x1fb   : > { %v849_v10 = vrot.slane %v848_v9, 4 }
 0x1fd   : > { %v850_v11 = vmax.f32 %v848_v9, %v849_v10 }
 0x1ff   : > { %v851_v12 = vrot.slane %v850_v11, 2 }
 0x201   : > { %v852_v13 = vmax.f32 %v850_v11, %v851_v12 }
 0x203   : > { %v853_v14 = vrot.slane %v852_v13, 1 }
 0x205   : > { %v854_v15 = vmax.f32 %v852_v13, %v853_v14 }
 0x207   : > { %vm855_vm14 = vcmp.ge.f32.partialorder %v834_v59, %v854_v15  ;;  %vm856_vm5 = vcmp.ge.f32.partialorder %v835_v60, %v854_v15  ;;  %vm857_vm11 = vcmp.ge.f32.partialorder %v836_v61, %v854_v15  ;;  %vm858_vm8 = vcmp.ge.f32.partialorder %v837_v62, %v854_v15 }
 0x208   : > { %v859_v16 = vsel %vm855_vm14, %v6776_v40, 32  ;;  %v860_v17 = vsel %vm856_vm5, %v6779_v43, 32  ;;  %v861_v18 = vsel %vm857_vm11, %v6782_v44, 32  ;;  %v862_v19 = vsel %vm858_vm8, %v6785_v45, 32 }
 0x209   : > { %v863_v20 = vsel %vm633_vm2, %v859_v16, 2147483647  ;;  %v864_v21 = vsel %vm633_vm2, %v860_v17, 2147483647  ;;  %v865_v22 = vsel %vm633_vm2, %v861_v18, 2147483647 }
 0x20a   : > { %v866_v23 = vsel %vm633_vm2, %v862_v19, 2147483647  ;;  %vm867_vm15 = vcmp.lt.s32.totalorder %v863_v20, %v864_v21 }
 0x20b   : > { %v868_v24 = vsel %vm867_vm15, %v863_v20, %v864_v21  ;;  %vm869_vm4 = vcmp.lt.s32.totalorder %v865_v22, %v866_v23 }
 0x20c   : > { %v870_v25 = vsel %vm869_vm4, %v865_v22, %v866_v23 }
 0x20d   : > { %vm871_vm3 = vcmp.lt.s32.totalorder %v868_v24, %v870_v25 }
 0x20e   : > { %v872_v26 = vsel %vm871_vm3, %v868_v24, %v870_v25 }
 0x20f   : > { %v873_v27 = vrot.slane %v872_v26, 4 }
 0x211   : > { %vm874_vm9 = vcmp.lt.s32.totalorder %v872_v26, %v873_v27 }
 0x212   : > { %v875_v28 = vsel %vm874_vm9, %v872_v26, %v873_v27 }
 0x213   : > { %v876_v29 = vrot.slane %v875_v28, 2 }
 0x215   : > { %vm877_vm6 = vcmp.lt.s32.totalorder %v875_v28, %v876_v29 }
 0x216   : > { %v878_v30 = vsel %vm877_vm6, %v875_v28, %v876_v29 }
 0x217   : > { %v879_v31 = vrot.slane %v878_v30, 1 }
 0x219   : > { %vm880_vm14 = vcmp.lt.s32.totalorder %v878_v30, %v879_v31 }
 0x21a   : > { %v881_v33 = vsel %vm880_vm14, %v878_v30, %v879_v31 }
 0x21b   : > { %vm882_vm5 = vcmp.eq.s32.totalorder %v6776_v40, %v881_v33  ;;  %vm883_vm11 = vcmp.eq.s32.totalorder %v6779_v43, %v881_v33  ;;  %vm884_vm8 = vcmp.eq.s32.totalorder %v6782_v44, %v881_v33  ;;  %vm885_vm15 = vcmp.eq.s32.totalorder %v6785_v45, %v881_v33 }
 0x21c   : > { %v886_v34 = vsel %vm882_vm5, -inf, %v834_v59  ;;  %v887_v35 = vsel %vm883_vm11, -inf, %v835_v60  ;;  %v888_v36 = vsel %vm884_vm8, -inf, %v836_v61  ;;  %v889_v37 = vsel %vm885_vm15, -inf, %v837_v62  ;;  %vm7004_vm4 = vmor %vm6951_vm10, %vm883_vm11 }
 0x21d   : > { %v894_v41 = vsel %vm633_vm2, %v886_v34, -inf  ;;  %v895_v42 = vsel %vm633_vm2, %v887_v35, -inf  ;;  %v896_v46 = vsel %vm633_vm2, %v888_v36, -inf  ;;  %v897_v47 = vsel %vm633_vm2, %v889_v37, -inf  ;;  %vm7018_vm0 = vmor %vm6961_vm7, %vm882_vm5 }
 0x21e   : > { %v898_v50 = vmax.f32 %v894_v41, %v895_v42  ;;  %v899_v51 = vmax.f32 %v896_v46, %v897_v47  ;;  %vm7028_vm10 = vmor %vm6967_vm13, %vm885_vm15 }
 0x21f   : > { %vm7036_vm7 = vmor %vm6975_vm12, %vm884_vm8 }
 0x220   : > { %v900_v54 = vmax.f32 %v898_v50, %v899_v51 }
 0x222   : > { %v901_v56 = vrot.slane %v900_v54, 4 }
 0x224   : > { %v902_v57 = vmax.f32 %v900_v54, %v901_v56 }
 0x226   : > { %v903_v58 = vrot.slane %v902_v57, 2 }
 0x228   : > { %v904_v59 = vmax.f32 %v902_v57, %v903_v58 }
 0x22a   : > { %v905_v60 = vrot.slane %v904_v59, 1 }
 0x22c   : > { %v906_v61 = vmax.f32 %v904_v59, %v905_v60 }
 0x22e   : > { %vm907_vm13 = vcmp.ge.f32.partialorder %v886_v34, %v906_v61  ;;  %vm908_vm3 = vcmp.ge.f32.partialorder %v887_v35, %v906_v61  ;;  %vm909_vm9 = vcmp.ge.f32.partialorder %v888_v36, %v906_v61  ;;  %vm910_vm6 = vcmp.ge.f32.partialorder %v889_v37, %v906_v61 }
 0x22f   : > { %v911_v62 = vsel %vm907_vm13, %v6776_v40, 32  ;;  %v912_v63 = vsel %vm908_vm3, %v6779_v43, 32  ;;  %v913_v0 = vsel %vm909_vm9, %v6782_v44, 32  ;;  %v914_v1 = vsel %vm910_vm6, %v6785_v45, 32 }
 0x230   : > { %v915_v2 = vsel %vm633_vm2, %v911_v62, 2147483647  ;;  %v916_v3 = vsel %vm633_vm2, %v912_v63, 2147483647  ;;  %v917_v4 = vsel %vm633_vm2, %v913_v0, 2147483647 }
 0x231   : > { %v918_v5 = vsel %vm633_vm2, %v914_v1, 2147483647  ;;  %vm919_vm1 = vcmp.lt.s32.totalorder %v915_v2, %v916_v3 }
 0x232   : > { %v920_v6 = vsel %vm919_vm1, %v915_v2, %v916_v3  ;;  %vm921_vm12 = vcmp.lt.s32.totalorder %v917_v4, %v918_v5 }
 0x233   : > { %v922_v7 = vsel %vm921_vm12, %v917_v4, %v918_v5  ;;  %v1352_v5 = vld [vmem:[#allocation2 + $0x30] sm:$0xff] }
 0x234   : > { %vm923_vm14 = vcmp.lt.s32.totalorder %v920_v6, %v922_v7 }
 0x235   : > { %v924_v8 = vsel %vm923_vm14, %v920_v6, %v922_v7 }
 0x236   : > { %v925_v9 = vrot.slane %v924_v8, 4 }
 0x238   : > { %vm926_vm5 = vcmp.lt.s32.totalorder %v924_v8, %v925_v9 }
 0x239   : > { %v927_v10 = vsel %vm926_vm5, %v924_v8, %v925_v9 }
 0x23a   : > { %v928_v11 = vrot.slane %v927_v10, 2 }
 0x23c   : > { %vm929_vm11 = vcmp.lt.s32.totalorder %v927_v10, %v928_v11 }
 0x23d   : > { %v930_v12 = vsel %vm929_vm11, %v927_v10, %v928_v11 }
 0x23e   : > { %v931_v13 = vrot.slane %v930_v12, 1 }
 0x240   : > { %vm932_vm8 = vcmp.lt.s32.totalorder %v930_v12, %v931_v13 }
 0x241   : > { %v933_v14 = vsel %vm932_vm8, %v930_v12, %v931_v13 }
 0x242   : > { %vm934_vm15 = vcmp.eq.s32.totalorder %v6776_v40, %v933_v14  ;;  %vm935_vm13 = vcmp.eq.s32.totalorder %v6779_v43, %v933_v14  ;;  %vm936_vm3 = vcmp.eq.s32.totalorder %v6782_v44, %v933_v14  ;;  %vm937_vm9 = vcmp.eq.s32.totalorder %v6785_v45, %v933_v14 }
 0x243   : > { %v938_v15 = vsel %vm934_vm15, -inf, %v886_v34  ;;  %v939_v16 = vsel %vm935_vm13, -inf, %v887_v35  ;;  %v940_v17 = vsel %vm936_vm3, -inf, %v888_v36  ;;  %v941_v18 = vsel %vm937_vm9, -inf, %v889_v37  ;;  %vm7058_vm6 = vmor %vm7004_vm4, %vm935_vm13 }
 0x244   : > { %v946_v20 = vsel %vm633_vm2, %v938_v15, -inf  ;;  %v947_v21 = vsel %vm633_vm2, %v939_v16, -inf  ;;  %v948_v22 = vsel %vm633_vm2, %v940_v17, -inf  ;;  %v949_v23 = vsel %vm633_vm2, %v941_v18, -inf  ;;  %vm7068_vm1 = vmor %vm7018_vm0, %vm934_vm15 }
 0x245   : > { %v950_v25 = vmax.f32 %v946_v20, %v947_v21  ;;  %v951_v26 = vmax.f32 %v948_v22, %v949_v23  ;;  %vm7074_vm4 = vmor %vm7028_vm10, %vm937_vm9 }
 0x246   : > { %vm7082_vm12 = vmor %vm7036_vm7, %vm936_vm3 }
 0x247   : > { %v952_v29 = vmax.f32 %v950_v25, %v951_v26 }
 0x249   : > { %v953_v30 = vrot.slane %v952_v29, 4 }
 0x24b   : > { %v954_v31 = vmax.f32 %v952_v29, %v953_v30 }
 0x24d   : > { %v955_v32 = vrot.slane %v954_v31, 2 }
 0x24f   : > { %v956_v33 = vmax.f32 %v954_v31, %v955_v32  ;;  %v6539_v31 = vmov 0.0  }
 0x251   : > { %v957_v34 = vrot.slane %v956_v33, 1 }
 0x253   : > { %v958_v35 = vmax.f32 %v956_v33, %v957_v34 }
 0x255   : > { %vm959_vm0 = vcmp.ge.f32.partialorder %v938_v15, %v958_v35  ;;  %vm960_vm10 = vcmp.ge.f32.partialorder %v939_v16, %v958_v35  ;;  %vm961_vm14 = vcmp.ge.f32.partialorder %v940_v17, %v958_v35  ;;  %vm962_vm5 = vcmp.ge.f32.partialorder %v941_v18, %v958_v35 }
 0x256   : > { %v963_v36 = vsel %vm959_vm0, %v6776_v40, 32  ;;  %v964_v37 = vsel %vm960_vm10, %v6779_v43, 32  ;;  %v965_v38 = vsel %vm961_vm14, %v6782_v44, 32  ;;  %v966_v39 = vsel %vm962_vm5, %v6785_v45, 32 }
 0x257   : > { %v967_v41 = vsel %vm633_vm2, %v963_v36, 2147483647  ;;  %v968_v42 = vsel %vm633_vm2, %v964_v37, 2147483647  ;;  %v969_v46 = vsel %vm633_vm2, %v965_v38, 2147483647 }
 0x258   : > { %v970_v47 = vsel %vm633_vm2, %v966_v39, 2147483647  ;;  %vm971_vm7 = vcmp.lt.s32.totalorder %v967_v41, %v968_v42 }
 0x259   : > { %v972_v48 = vsel %vm971_vm7, %v967_v41, %v968_v42  ;;  %vm973_vm11 = vcmp.lt.s32.totalorder %v969_v46, %v970_v47 }
 0x25a   : > { %v974_v49 = vsel %vm973_vm11, %v969_v46, %v970_v47 }
 0x25b   : > { %vm975_vm8 = vcmp.lt.s32.totalorder %v972_v48, %v974_v49 }
 0x25c   : > { %v976_v50 = vsel %vm975_vm8, %v972_v48, %v974_v49 }
 0x25d   : > { %v977_v51 = vrot.slane %v976_v50, 4 }
 0x25f   : > { %vm978_vm15 = vcmp.lt.s32.totalorder %v976_v50, %v977_v51 }
 0x260   : > { %v979_v52 = vsel %vm978_vm15, %v976_v50, %v977_v51 }
 0x261   : > { %v980_v53 = vrot.slane %v979_v52, 2 }
 0x263   : > { %vm981_vm13 = vcmp.lt.s32.totalorder %v979_v52, %v980_v53 }
 0x264   : > { %v982_v54 = vsel %vm981_vm13, %v979_v52, %v980_v53 }
 0x265   : > { %v983_v55 = vrot.slane %v982_v54, 1 }
 0x267   : > { %vm984_vm3 = vcmp.lt.s32.totalorder %v982_v54, %v983_v55 }
 0x268   : > { %v985_v56 = vsel %vm984_vm3, %v982_v54, %v983_v55  ;;  %v7155_v55 = vsub.s32 0, %v6776_v40 }
 0x269   : > { %vm986_vm9 = vcmp.eq.s32.totalorder %v6776_v40, %v985_v56  ;;  %vm987_vm0 = vcmp.eq.s32.totalorder %v6779_v43, %v985_v56  ;;  %vm988_vm10 = vcmp.eq.s32.totalorder %v6782_v44, %v985_v56  ;;  %vm989_vm14 = vcmp.eq.s32.totalorder %v6785_v45, %v985_v56 }
 0x26a   : > { %v990_v57 = vsel %vm986_vm9, -inf, %v938_v15  ;;  %v991_v58 = vsel %vm987_vm0, -inf, %v939_v16  ;;  %v992_v59 = vsel %vm988_vm10, -inf, %v940_v17  ;;  %v993_v60 = vsel %vm989_vm14, -inf, %v941_v18  ;;  %vm7102_vm5 = vmor %vm7058_vm6, %vm987_vm0 }
 0x26b   : > { %v998_v62 = vsel %vm633_vm2, %v990_v57, -inf  ;;  %v999_v63 = vsel %vm633_vm2, %v991_v58, -inf  ;;  %v1000_v0 = vsel %vm633_vm2, %v992_v59, -inf  ;;  %v1001_v1 = vsel %vm633_vm2, %v993_v60, -inf  ;;  %vm7112_vm7 = vmor %vm7068_vm1, %vm986_vm9 }
 0x26c   : > { %v1002_v3 = vmax.f32 %v998_v62, %v999_v63  ;;  %v1003_v4 = vmax.f32 %v1000_v0, %v1001_v1  ;;  %vm7118_vm6 = vmor %vm7074_vm4, %vm989_vm14 }
 0x26d   : > { %vm7126_vm11 = vmor %vm7082_vm12, %vm988_vm10 }
 0x26e   : > { %v1004_v7 = vmax.f32 %v1002_v3, %v1003_v4  ;;  %v1348_v4 = vld [vmem:[#allocation2 + $0x10] sm:$0xff] }
 0x26f   : > { %v5295_v6 = vcombine.high %v1348_v4, %v1352_v5 }
 0x270   : > { %v1005_v8 = vrot.slane %v1004_v7, 4 }
 0x271   : > { %1836 = vmatprep.subr.bf16.mxu0 %v5295_v6 }
 0x272   : > { %v1006_v9 = vmax.f32 %v1004_v7, %v1005_v8  ;;  %v5294_v7 = vcombine.low %v1348_v4, %v1352_v5  ;;  %v1356_v8 = vld [vmem:[#allocation2 + $0x50] sm:$0xff]  ;;  %v1362_v4 = vld [vmem:[#allocation2 + $0x80] sm:$0xff] }
 0x273   : > { %v1366_v5 = vld [vmem:[#allocation2 + $0xa0] sm:$0xff] }
 0x274   : > { %v1007_v10 = vrot.slane %v1006_v9, 2  ;;  %1837 = vmatpush1.bf16.msra.mxu0 %v5294_v7  ;;  %v5307_v7 = vcombine.high %v1362_v4, %v1366_v5 }
 0x276   : > { %v1008_v11 = vmax.f32 %v1006_v9, %v1007_v10  ;;  %v1360_v9 = vld [vmem:[#allocation2 + $0x70] sm:$0xff] }
 0x277   : > { %v5303_v10 = vcombine.high %v1356_v8, %v1360_v9 }
 0x278   : > { %v1009_v12 = vrot.slane %v1008_v11, 1 }
 0x279   : > { %1838 = vmatprep.subr.bf16.mxu0 %v5303_v10  ;;  %v5306_v10 = vcombine.low %v1362_v4, %v1366_v5  ;;  %v1387_v5 = vld [vmem:[#allocation2 + $0x148] sm:$0xff] }
 0x27a   : > { %v1010_v13 = vmax.f32 %v1008_v11, %v1009_v12  ;;  %v5302_v11 = vcombine.low %v1356_v8, %v1360_v9  ;;  %v1364_v12 = vld [vmem:[#allocation2 + $0x90] sm:$0xff]  ;;  %v1370_v8 = vld [vmem:[#allocation2 + $0xc0] sm:$0xff] }
 0x27b   : > { %v1374_v9 = vld [vmem:[#allocation2 + $0xe0] sm:$0xff] }
 0x27c   : > { %vm1011_vm1 = vcmp.ge.f32.partialorder %v990_v57, %v1010_v13  ;;  %vm1012_vm4 = vcmp.ge.f32.partialorder %v991_v58, %v1010_v13  ;;  %vm1013_vm8 = vcmp.ge.f32.partialorder %v992_v59, %v1010_v13  ;;  %vm1014_vm15 = vcmp.ge.f32.partialorder %v993_v60, %v1010_v13  ;;  %1839 = vmatpush1.bf16.msra.mxu0 %v5302_v11  ;;  %v1368_v13 = vld [vmem:[#allocation2 + $0xb0] sm:$0xff] }
 0x27d   : > { %v1015_v14 = vsel %vm1011_vm1, %v6776_v40, 32  ;;  %v1016_v15 = vsel %vm1012_vm4, %v6779_v43, 32  ;;  %v1017_v16 = vsel %vm1013_vm8, %v6782_v44, 32  ;;  %v1018_v17 = vsel %vm1014_vm15, %v6785_v45, 32 }
 0x27e   : > { %v1019_v18 = vsel %vm633_vm2, %v1015_v14, 2147483647  ;;  %v1020_v19 = vsel %vm633_vm2, %v1016_v15, 2147483647  ;;  %v1021_v20 = vsel %vm633_vm2, %v1017_v16, 2147483647  ;;  %v5311_v14 = vcombine.high %v1364_v12, %v1368_v13 }
 0x27f   : > { %v1022_v21 = vsel %vm633_vm2, %v1018_v17, 2147483647  ;;  %vm1023_vm12 = vcmp.lt.s32.totalorder %v1019_v18, %v1020_v19  ;;  %v5310_v15 = vcombine.low %v1364_v12, %v1368_v13  ;;  %v1372_v16 = vld [vmem:[#allocation2 + $0xd0] sm:$0xff]  ;;  %v5315_v11 = vcombine.high %v1370_v8, %v1374_v9  ;;  %v1378_v12 = vld [vmem:[#allocation2 + $0x100] sm:$0xff] }
 0x280   : > { %v1024_v22 = vsel %vm1023_vm12, %v1019_v18, %v1020_v19  ;;  %vm1025_vm13 = vcmp.lt.s32.totalorder %v1021_v20, %v1022_v21  ;;  %1840 = vmatprep.subr.bf16.mxu0 %v5311_v14  ;;  %v1376_v17 = vld [vmem:[#allocation2 + $0xf0] sm:$0xff]  ;;  %v1382_v13 = vld [vmem:[#allocation2 + $0x120] sm:$0xff]  ;;  %v5314_v14 = vcombine.low %v1370_v8, %v1374_v9 }
 0x281   : > { %v1026_v23 = vsel %vm1025_vm13, %v1021_v20, %v1022_v21  ;;  %1841 = vmatpush1.bf16.msra.mxu0 %v5310_v15  ;;  %v5319_v18 = vcombine.high %v1372_v16, %v1376_v17  ;;  %v5318_v19 = vcombine.low %v1372_v16, %v1376_v17  ;;  %v1380_v20 = vld [vmem:[#allocation2 + $0x110] sm:$0xff]  ;;  %v5323_v15 = vcombine.high %v1378_v12, %v1382_v13  ;;  %v1386_v16 = vld [vmem:[#allocation2 + $0x140] sm:$0xff] }
 0x282   : > { %vm1027_vm3 = vcmp.lt.s32.totalorder %v1024_v22, %v1026_v23  ;;  %v1384_v21 = vld [vmem:[#allocation2 + $0x130] sm:$0xff]  ;;  %v1390_v17 = vld [vmem:[#allocation2 + $0x160] sm:$0xff] }
 0x283   : > { %v1028_v24 = vsel %vm1027_vm3, %v1024_v22, %v1026_v23  ;;  %1842 = vmatprep.subr.bf16.mxu0 %v5319_v18  ;;  %v5327_v22 = vcombine.high %v1380_v20, %v1384_v21  ;;  %v5326_v23 = vcombine.low %v1380_v20, %v1384_v21  ;;  %v5331_v18 = vcombine.high %v1386_v16, %v1390_v17  ;;  %v1398_v20 = vld [vmem:[#allocation2 + $0x1a0] sm:$0xff] }
 0x284   : > { %v1029_v25 = vrot.slane %v1028_v24, 4  ;;  %v5330_v21 = vcombine.low %v1386_v16, %v1390_v17  ;;  %v5914_v8 = vld [vmem:[#allocation4 + $0x84] ss:$16 sps:$4 sm:$0xff]   ;;  %v1403_v17 = vld [vmem:[#allocation2 + $0x1c8] sm:$0xff] }
 0x285   : > { %1843 = vmatpush1.bf16.msra.mxu0 %v5318_v19  ;;  %v1394_v19 = vld [vmem:[#allocation2 + $0x180] sm:$0xff] }
 0x286   : > { %vm1030_vm9 = vcmp.lt.s32.totalorder %v1028_v24, %v1029_v25  ;;  %1844 = vmatprep.subr.bf16.mxu0 %v5327_v22  ;;  %v5339_v22 = vcombine.high %v1394_v19, %v1398_v20 }
 0x287   : > { %v1031_v26 = vsel %vm1030_vm9, %v1028_v24, %v1029_v25  ;;  %v1388_v24 = vld [vmem:[#allocation2 + $0x150] sm:$0xff] }
 0x288   : > { %v1032_v27 = vrot.slane %v1031_v26, 2  ;;  %v1392_v25 = vld [vmem:[#allocation2 + $0x170] sm:$0xff] }
 0x289   : > { %1845 = vmatpush1.bf16.msra.mxu0 %v5326_v23  ;;  %v5338_v23 = vcombine.low %v1394_v19, %v1398_v20  ;;  %v5926_v19 = vld [vmem:[#allocation4 + $0xc4] ss:$16 sps:$4 sm:$0xff]  }
 0x28a   : > { %vm1033_vm0 = vcmp.lt.s32.totalorder %v1031_v26, %v1032_v27 }
 0x28b   : > { %v1034_v28 = vsel %vm1033_vm0, %v1031_v26, %v1032_v27  ;;  %v5335_v26 = vcombine.high %v1388_v24, %v1392_v25  ;;  %v5334_v27 = vcombine.low %v1388_v24, %v1392_v25  ;;  %v1402_v24 = vld [vmem:[#allocation2 + $0x1c0] sm:$0xff] }
 0x28c   : > { %v1035_v29 = vrot.slane %v1034_v28, 1  ;;  %v1406_v25 = vld [vmem:[#allocation2 + $0x1e0] sm:$0xff] }
 0x28d   : > { %1846 = vmatprep.subr.bf16.mxu0 %v5335_v26  ;;  %v5346_v26 = vcombine.low %v1402_v24, %v1406_v25 }
 0x28e   : > { %vm1036_vm10 = vcmp.lt.s32.totalorder %v1034_v28, %v1035_v29  ;;  %1847 = vmatpush1.bf16.msra.mxu0 %v5334_v27  ;;  %v5347_v27 = vcombine.high %v1402_v24, %v1406_v25  ;;  %v5924_v24 = vld [vmem:[#allocation4 + $0xc0] ss:$16 sps:$4 sm:$0xff]   ;;  %v5932_v25 = vld [vmem:[#allocation4 + $0xe4] ss:$16 sps:$4 sm:$0xff]  }
 0x28f   : > { %v1037_v30 = vsel %vm1036_vm10, %v1034_v28, %v1035_v29  ;;  %v1396_v28 = vld [vmem:[#allocation2 + $0x190] sm:$0xff] }
 0x290   : > { %vm1039_vm14 = vcmp.eq.s32.totalorder %v6779_v43, %v1037_v30  ;;  %vm1038_vm1 = vcmp.eq.s32.totalorder %v6776_v40, %v1037_v30  ;;  %vm1041_vm4 = vcmp.eq.s32.totalorder %v6785_v45, %v1037_v30  ;;  %vm1040_vm15 = vcmp.eq.s32.totalorder %v6782_v44, %v1037_v30  ;;  %v1400_v29 = vld [vmem:[#allocation2 + $0x1b0] sm:$0xff] }
 0x291   : > { %vm1043_vm8 = vmor %vm7102_vm5, %vm1039_vm14  ;;  %v5343_v30 = vcombine.high %v1396_v28, %v1400_v29 }
 0x292   : > { %v5278_v32 = vsel %vm1043_vm8, 1.0, %v6539_v31  ;;  %vm1042_vm12 = vmor %vm7112_vm7, %vm1038_vm1 }
 0x293   : > { %v1057_v33 = vsel %vm633_vm2, %v5278_v32, 0.0  ;;  %v5277_v34 = vsel %vm1042_vm12, 1.0, %v6539_v31  ;;  %vm1045_vm13 = vmor %vm7118_vm6, %vm1041_vm4  ;;  %1848 = vmatprep.subr.bf16.mxu0 %v5343_v30 }
 0x294   : > { %1058 = vadd.xlane.f32.xlu1 %v1057_v33  ;;  %v1054_v43 = vsel %vm633_vm2, %v5277_v34, 0.0  ;;  %v5280_v45 = vsel %vm1045_vm13, 1.0, %v6539_v31  ;;  %vm1044_vm5 = vmor %vm7126_vm11, %vm1040_vm15  ;;  %v7168_v33 = vsub.s32 1, %v6776_v40 }
 0x295   : > { %1055 = vadd.xlane.f32.xlu0 %v1054_v43  ;;  %v5279_v44 = vsel %vm1044_vm5, 1.0, %v6539_v31  ;;  %v1063_v35 = vsel %vm633_vm2, %v5280_v45, 0.0  ;;  %v5342_v31 = vcombine.low %v1396_v28, %v1400_v29  ;;  %v1404_v28 = vld [vmem:[#allocation2 + $0x1d0] sm:$0xff] }
 0x296   : > { %v1060_v36 = vsel %vm633_vm2, %v5279_v44, 0.0  ;;  %v1408_v29 = vld [vmem:[#allocation2 + $0x1f0] sm:$0xff] }
 0x297   : > { %1849 = vmatpush1.bf16.msra.mxu0 %v5342_v31  ;;  %v5351_v30 = vcombine.high %v1404_v28, %v1408_v29  ;;  %v5350_v31 = vcombine.low %v1404_v28, %v1408_v29  ;;  %v1357_v28 = vld [vmem:[#allocation2 + $0x58] sm:$0xff] }
 0x298   : > { %1064 = vadd.xlane.f32.xlu1 %v1063_v35  ;;  %v1361_v29 = vld [vmem:[#allocation2 + $0x78] sm:$0xff] }
 0x299   : > { %1061 = vadd.xlane.f32.xlu0 %v1060_v36  ;;  %1850 = vmatprep.subr.bf16.mxu0 %v5351_v30  ;;  %v5930_v30 = vld [vmem:[#allocation4 + $0xe0] ss:$16 sps:$4 sm:$0xff]  }
 0x29b   : > { %1851 = vmatpush1.bf16.msra.mxu0 %v5350_v31  ;;  %v5938_v31 = vld [vmem:[#allocation4 + $0x104] ss:$16 sps:$4 sm:$0xff]  }
 0x2b7   : > { %v5753_v37 = vpop.f32.mrb[4].mxu1 }
 0x2b8   : > { %v1187_v38 = vpop.f32.mrb[5].mxu1 }
 0x2b9   : > { %v1206_v39 = vpack.c.bf16 %v5753_v37, %v1187_v38 }
 0x2bb   : > { %5757 = vmatprep.subr.bf16.mxu1 %v1206_v39 }
 0x2bc   : > { %5758 = vmatpush3.bf16.msra.mxu1 %v1206_v39 }
 0x2c3   : > { %v5756_v41 = vpop.f32.mrb[6].mxu1 }
 0x2c4   : > { %v1197_v42 = vpop.f32.mrb[7].mxu1 }
 0x2c5   : > { %v1207_v46 = vpack.c.bf16 %v5756_v41, %v1197_v42 }
 0x2c7   : > { %5759 = vmatprep.subr.bf16.mxu1 %v1207_v46 }
 0x2c8   : > { %5760 = vmatpush3.bf16.msra.mxu1 %v1207_v46 }
 0x321   : > { %v1059_v48 = vpop.xlane.xlu1 %1058 }
 0x322   : > { %v1056_v47 = vpop.xlane.xlu0 %1055 }
 0x323   : > { %6384 = vrsqrt.f32 %v1056_v47 }
 0x324   : > { %6386 = vrsqrt.f32 %v1059_v48 }
 0x325   : > { %v1065_v50 = vpop.xlane.xlu1 %1064 }
 0x326   : > { %v1062_v49 = vpop.xlane.xlu0 %1061 }
 0x327   : > { %6388 = vrsqrt.f32 %v1062_v49 }
 0x328   : > { %6390 = vrsqrt.f32 %v1065_v50 }
 0x32d   : > { %v6385_v51 = vpop.eup %6384 }
 0x32e   : > { %1074 = vxpose.xlu0.b32.start [1/4] (short) (narrow) %v6385_v51, 8  ;;  %v6387_v52 = vpop.eup %6386  ;;  %v1070_v58 = vmul.f32 %v6385_v51, %v5277_v34 }
 0x32f   : > { %v1071_v56 = vmul.f32 %v6387_v52, %v5278_v32  ;;  %v1116_v32 = vld [vmem:[%s7554_s3] sm:$0x3] }
 0x330   : > { %v1266_v34 = vrot.slane %v1116_v32, %v7155_v55  ;;  %v1274_v43 = vrot.slane %v1116_v32, %v7168_v33  ;;  %v1347_v32 = vld [vmem:[#allocation2 + $0x8] sm:$0xff] }
 0x331   : > { %v6389_v53 = vpop.eup %6388 }
 0x332   : > { %1075 = vxpose.xlu0.b32.cont [2/4] (short) (narrow) %v6387_v52, 8  ;;  %v6391_v54 = vpop.eup %6390  ;;  %v1072_v60 = vmul.f32 %v6389_v53, %v5279_v44 }
 0x333   : > { %v1073_v59 = vmul.f32 %v6391_v54, %v5280_v45 }
 0x336   : > { %1076 = vxpose.xlu0.b32.cont [3/4] (short) (narrow) %v6389_v53, 8 }
 0x33a   : > { %1077 = vxpose.xlu0.b32.end [4/4] (short) (narrow) %v6391_v54, 8 }
 0x3ae   : > { %v1090_v57 = vpop.trf.xlu0 }
 0x3af   : > { %v1109_v61 = vrot.slane %v1090_v57, %v7155_v55 }
 0x3b1   : > { %v1110_v62 = vmul.f32 %v1109_v61, %v1070_v58  ;;  %v1111_v63 = vmul.f32 %v1109_v61, %v1071_v56  ;;  %v1112_v0 = vmul.f32 %v1109_v61, %v1072_v60  ;;  %v1113_v1 = vmul.f32 %v1109_v61, %v1073_v59  ;;  %v1346_v60 = vld [vmem:[#allocation2] sm:$0xff] }
 0x3b2   : > { %v1350_v61 = vld [vmem:[#allocation2 + $0x20] sm:$0xff] }
 0x3b3   : > { %v7158_v2 = vpack.c.bf16 %v1113_v1, %v1112_v0  ;;  %v1114_v3 = vpack.c.bf16 %v1111_v63, %v1110_v62  ;;  %v5291_v62 = vcombine.high %v1346_v60, %v1350_v61  ;;  %v1354_v63 = vld [vmem:[#allocation2 + $0x40] sm:$0xff]  ;;  %v5290_v1 = vcombine.low %v1346_v60, %v1350_v61 }
 0x3b4   : > { %v1358_v0 = vld [vmem:[#allocation2 + $0x60] sm:$0xff] }
 0x3b5   : > { %5761 = vmatprep.mubr.msk.bf16.mxu1 %vm633_vm2, %v1114_v3  ;;  %v5298_v6 = vcombine.low %v1354_v63, %v1358_v0  ;;  %v5902_v61 = vld [vmem:[#allocation4 + $0x44] ss:$16 sps:$4 sm:$0xff]  }
 0x3b6   : > { %5762 = vmatmul.mubr.msk.bf16.vlgmr.msra.gmra.mrb[8].mxu1 %vm633_vm2, %v7158_v2 }
 0x3b7   : > { %5769 = vmatprep.mubr.msk.bf16.mxu1 %vm633_vm2, %v1114_v3  ;;  %v5299_v3 = vcombine.high %v1354_v63, %v1358_v0  ;;  %v1383_v63 = vld [vmem:[#allocation2 + $0x128] sm:$0xff]  ;;  %v5900_v0 = vld [vmem:[#allocation4 + $0x40] ss:$16 sps:$4 sm:$0xff]  }
 0x489   : > { %v5763_v45 = vpop.f32.mrb[8].mxu1 }
 0x48a   : > { %v1269_v44 = vmul.f32 %v5763_v45, %v1266_v34  ;;  %v1248_v35 = vpop.f32.mrb[9].mxu1 }
 0x48b   : > { %v1267_v36 = vmul.f32 %v1266_v34, %v1248_v35  ;;  %v5764_v37 = vpop.f32.mrb[10].mxu1  ;;  %v5890_v35 = vld [vmem:[#allocation4 + $0x4] ss:$16 sps:$4 sm:$0xff]  }
 0x48c   : > { %v1277_v38 = vadd.f32 %v1274_v43, %v1269_v44  ;;  %v1270_v39 = vmul.f32 %v5764_v37, %v1266_v34  ;;  %v1251_v41 = vpop.f32.mrb[11].mxu1  ;;  %3801 = vmatprep.subr.bf16.mxu0 %v5890_v35  ;;  %v5936_v35 = vld [vmem:[#allocation4 + $0x100] ss:$16 sps:$4 sm:$0xff]  }
 0x48d   : > { %v1275_v42 = vadd.f32 %v1274_v43, %v1267_v36  ;;  %v1268_v46 = vmul.f32 %v1266_v34, %v1251_v41  ;;  %v1351_v34 = vld [vmem:[#allocation2 + $0x28] sm:$0xff] }
 0x48e   : > { %v1285_v47 = vmul.f32 0.2, %v1277_v38  ;;  %v1278_v48 = vadd.f32 %v1274_v43, %v1270_v39  ;;  %vm1281_vm7 = vcmp.gt.f32.partialorder %v1277_v38, 0.0  ;;  %v5292_v45 = vcombine.low %v1347_v32, %v1351_v34  ;;  %v1359_v39 = vld [vmem:[#allocation2 + $0x68] sm:$0xff] }
 0x48f   : > { %v1283_v49 = vmul.f32 0.2, %v1275_v42  ;;  %v1276_v50 = vadd.f32 %v1274_v43, %v1268_v46  ;;  %vm1279_vm6 = vcmp.gt.f32.partialorder %v1275_v42, 0.0  ;;  %v6540_v43 = vmov 0  }
 0x490   : > { %vm1282_vm11 = vcmp.gt.f32.partialorder %v1278_v48, 0.0  ;;  %v1286_v51 = vmul.f32 0.2, %v1278_v48  ;;  %v1289_v53 = vsel %vm1281_vm7, %v1277_v38, %v1285_v47  ;;  %v5293_v44 = vcombine.high %v1347_v32, %v1351_v34  ;;  %1868 = vmatprep.mubr.bf16.mxu0 %v6540_v43  ;;  %v1355_v38 = vld [vmem:[#allocation2 + $0x48] sm:$0xff] }
 0x491   : > { %vm1280_vm3 = vcmp.gt.f32.partialorder %v1276_v50, 0.0  ;;  %v1284_v52 = vmul.f32 0.2, %v1276_v50  ;;  %v1287_v56 = vsel %vm1279_vm6, %v1275_v42, %v1283_v49  ;;  %v1363_v49 = vld [vmem:[#allocation2 + $0x88] sm:$0xff]  ;;  %v5305_v34 = vcombine.high %v1357_v28, %v1361_v29 }
 0x492   : > { %v1290_v54 = vsel %vm1282_vm11, %v1278_v48, %v1286_v51  ;;  %v5301_v48 = vcombine.high %v1355_v38, %v1359_v39  ;;  %v5888_v51 = vld [vmem:[#allocation4] ss:$16 sps:$4 sm:$0xff]  }
 0x493   : > { %v1288_v57 = vsel %vm1280_vm3, %v1276_v50, %v1284_v52  ;;  %v1292_v58 = vpack.c.bf16 %v1290_v54, %v1289_v53  ;;  %v1367_v50 = vld [vmem:[#allocation2 + $0xa8] sm:$0xff]  ;;  %v5896_v52 = vld [vmem:[#allocation4 + $0x24] ss:$16 sps:$4 sm:$0xff]   ;;  %v5300_v53 = vcombine.low %v1355_v38, %v1359_v39  ;;  %v1373_v39 = vld [vmem:[#allocation2 + $0xd8] sm:$0xff] }
 0x494   : > { %v1291_v59 = vpack.c.bf16 %v1288_v57, %v1287_v56  ;;  %v5309_v54 = vcombine.high %v1363_v49, %v1367_v50  ;;  %v1371_v56 = vld [vmem:[#allocation2 + $0xc8] sm:$0xff] }
 0x495   : > { %v1375_v57 = vld [vmem:[#allocation2 + $0xe8] sm:$0xff] }
 0x496   : > { %5765 = vmatprep.subr.bf16.mxu1 %v1291_v59  ;;  %v5317_v60 = vcombine.high %v1371_v56, %v1375_v57 }
 0x497   : > { %5766 = vmatpush3.bf16.msra.mxu1 %v1291_v59  ;;  %v5308_v59 = vcombine.low %v1363_v49, %v1367_v50 }
 0x498   : > { %5767 = vmatprep.subr.bf16.mxu1 %v1292_v58 }
 0x49b   : > { %5768 = vmatpush3.bf16.msra.mxu1 %v1292_v58  ;;  %v5894_v58 = vld [vmem:[#allocation4 + $0x20] ss:$16 sps:$4 sm:$0xff]  }
 0x49c   : > { %1730 = vmatprep.subr.bf16.mxu1 %v5291_v62  ;;  %v1379_v62 = vld [vmem:[#allocation2 + $0x108] sm:$0xff] }
 0x49d   : > { %v5325_v4 = vcombine.high %v1379_v62, %v1383_v63  ;;  %v5324_v9 = vcombine.low %v1379_v62, %v1383_v63 }
 0x49e   : > { %5770 = vmatmul.mubr.msk.bf16.vlgmr.msra.gmra.mrb[12].mxu1 %vm633_vm2, %v7158_v2  ;;  %v5322_v2 = vcombine.low %v1378_v12, %v1382_v13  ;;  %v1399_v12 = vld [vmem:[#allocation2 + $0x1a8] sm:$0xff]  ;;  %v5912_v13 = vld [vmem:[#allocation4 + $0x80] ss:$16 sps:$4 sm:$0xff]  }
 0x49f   : > { %1731 = vmatpush1.bf16.msra.mxu1 %v5290_v1  ;;  %1762 = vmatprep.mubr.bf16.mxu1 %v6540_v43  ;;  %v5908_v1 = vld [vmem:[#allocation4 + $0x64] ss:$16 sps:$4 sm:$0xff]  }
 0x4a0   : > { %1732 = vmatprep.subr.bf16.mxu1 %v5299_v3  ;;  %v5316_v3 = vcombine.low %v1371_v56, %v1375_v57 }
 0x4a3   : > { %1733 = vmatpush1.bf16.msra.mxu1 %v5298_v6  ;;  %v1391_v6 = vld [vmem:[#allocation2 + $0x168] sm:$0xff] }
 0x4a4   : > { %1734 = vmatprep.subr.bf16.mxu1 %v5307_v7  ;;  %v5906_v7 = vld [vmem:[#allocation4 + $0x60] ss:$16 sps:$4 sm:$0xff]  }
 0x4a7   : > { %1735 = vmatpush1.bf16.msra.mxu1 %v5306_v10  ;;  %v5333_v10 = vcombine.high %v1387_v5, %v1391_v6 }
 0x4a8   : > { %1736 = vmatprep.subr.bf16.mxu1 %v5315_v11  ;;  %v1395_v11 = vld [vmem:[#allocation2 + $0x188] sm:$0xff] }
 0x4a9   : > { %v5341_v16 = vcombine.high %v1395_v11, %v1399_v12  ;;  %v5340_v20 = vcombine.low %v1395_v11, %v1399_v12  ;;  %v5893_v11 = vld [vmem:[#allocation4 + $0xc] ss:$16 sps:$4 sm:$0xff]   ;;  %v5891_v12 = vld [vmem:[#allocation4 + $0x8] ss:$16 sps:$4 sm:$0xff]  }
 0x4ab   : > { %1737 = vmatpush1.bf16.msra.mxu1 %v5314_v14  ;;  %v5920_v14 = vld [vmem:[#allocation4 + $0xa4] ss:$16 sps:$4 sm:$0xff]  }
 0x4ac   : > { %1738 = vmatprep.subr.bf16.mxu1 %v5323_v15  ;;  %v5332_v15 = vcombine.low %v1387_v5, %v1391_v6  ;;  %v1405_v6 = vld [vmem:[#allocation2 + $0x1d8] sm:$0xff] }
 0x4af   : > { %1739 = vmatpush1.bf16.msra.mxu1 %v5322_v2  ;;  %v1407_v2 = vld [vmem:[#allocation2 + $0x1e8] sm:$0xff] }
 0x4b0   : > { %1740 = vmatprep.subr.bf16.mxu1 %v5331_v18  ;;  %v5918_v18 = vld [vmem:[#allocation4 + $0xa0] ss:$16 sps:$4 sm:$0xff]  }
 0x4b3   : > { %1741 = vmatpush1.bf16.msra.mxu1 %v5330_v21  ;;  %v5349_v21 = vcombine.high %v1403_v17, %v1407_v2 }
 0x4b4   : > { %1742 = vmatprep.subr.bf16.mxu1 %v5339_v22  ;;  %v1349_v22 = vld [vmem:[#allocation2 + $0x18] sm:$0xff] }
 0x4b7   : > { %1743 = vmatpush1.bf16.msra.mxu1 %v5338_v23  ;;  %v1353_v23 = vld [vmem:[#allocation2 + $0x38] sm:$0xff] }
 0x4b8   : > { %1744 = vmatprep.subr.bf16.mxu1 %v5347_v27  ;;  %v5297_v27 = vcombine.high %v1349_v22, %v1353_v23  ;;  %v5296_v32 = vcombine.low %v1349_v22, %v1353_v23  ;;  %v5927_v22 = vld [vmem:[#allocation4 + $0xc8] ss:$16 sps:$4 sm:$0xff]   ;;  %v5966_v23 = vld [vmem:[#allocation4 + $0x1a0] ss:$16 sps:$4 sm:$0xff]  }
 0x4bb   : > { %1745 = vmatpush1.bf16.msra.mxu1 %v5346_v26  ;;  %v5348_v26 = vcombine.low %v1403_v17, %v1407_v2  ;;  %v5911_v17 = vld [vmem:[#allocation4 + $0x6c] ss:$16 sps:$4 sm:$0xff]   ;;  %v5909_v2 = vld [vmem:[#allocation4 + $0x68] ss:$16 sps:$4 sm:$0xff]  }
 0x4bc   : > { %1783 = vmatprep.subr.bf16.mxu1 %v5293_v44  ;;  %v1369_v44 = vld [vmem:[#allocation2 + $0xb8] sm:$0xff] }
 0x571   : > { %v5771_v36 = vpop.f32.mrb[12].mxu1 }
 0x572   : > { %v1329_v37 = vpop.f32.mrb[13].mxu1 }
 0x573   : > { %v5772_v41 = vpop.f32.mrb[14].mxu1 }
 0x574   : > { %v7176_v42 = vpack.c.bf16 %v5772_v41, %v5771_v36  ;;  %v1332_v46 = vpop.f32.mrb[15].mxu1  ;;  %v5944_v36 = vld [vmem:[#allocation4 + $0x124] ss:$16 sps:$4 sm:$0xff]   ;;  %v1377_v41 = vld [vmem:[#allocation2 + $0xf8] sm:$0xff] }
 0x575   : > { %v7178_v47 = vpack.c.bf16 %v1332_v46, %v1329_v37  ;;  %v5304_v37 = vcombine.low %v1357_v28, %v1361_v29  ;;  %v5942_v46 = vld [vmem:[#allocation4 + $0x120] ss:$16 sps:$4 sm:$0xff]   ;;  %v5321_v50 = vcombine.high %v1373_v39, %v1377_v41  ;;  %v5320_v56 = vcombine.low %v1373_v39, %v1377_v41  ;;  %v5980_v28 = vld [vmem:[#allocation4 + $0x1e4] ss:$16 sps:$4 sm:$0xff]   ;;  %v5939_v29 = vld [vmem:[#allocation4 + $0x108] ss:$16 sps:$4 sm:$0xff]  }
 0x576   : > { %v5971_v39 = vld [vmem:[#allocation4 + $0x1ac] ss:$16 sps:$4 sm:$0xff]   ;;  %v5969_v41 = vld [vmem:[#allocation4 + $0x1a8] ss:$16 sps:$4 sm:$0xff]  }
 0x577   : > { %1763 = vmatmul.mubr.bf16.vlgmr.msra.gmra.mrb[16].mxu1 %v7178_v47  ;;  %1869 = vmatmul.mubr.bf16.vlgmr.msra.gmra.mrb[0].mxu0 %v7178_v47 }
 0x578   : > { %1784 = vmatpush1.bf16.msra.mxu1 %v5292_v45  ;;  %1772 = vmatprep.mubr.bf16.mxu1 %v6540_v43  ;;  %v1365_v45 = vld [vmem:[#allocation2 + $0x98] sm:$0xff] }
 0x579   : > { %1785 = vmatprep.subr.bf16.mxu1 %v5301_v48  ;;  %1878 = vmatprep.mubr.bf16.mxu0 %v6540_v43  ;;  %v5313_v38 = vcombine.high %v1365_v45, %v1369_v44  ;;  %v5950_v48 = vld [vmem:[#allocation4 + $0x144] ss:$16 sps:$4 sm:$0xff]   ;;  %v5312_v49 = vcombine.low %v1365_v45, %v1369_v44  ;;  %v5951_v45 = vld [vmem:[#allocation4 + $0x148] ss:$16 sps:$4 sm:$0xff]   ;;  %v5959_v44 = vld [vmem:[#allocation4 + $0x16c] ss:$16 sps:$4 sm:$0xff]  }
 0x57a   : > { %3802 = vmatpush1.bf16.msra.mxu0 %v5888_v51  ;;  %v1381_v51 = vld [vmem:[#allocation2 + $0x118] sm:$0xff] }
 0x57b   : > { %3803 = vmatprep.subr.bf16.mxu0 %v5896_v52  ;;  %v1385_v52 = vld [vmem:[#allocation2 + $0x138] sm:$0xff] }
 0x57c   : > { %1786 = vmatpush1.bf16.msra.mxu1 %v5300_v53  ;;  %v5948_v53 = vld [vmem:[#allocation4 + $0x140] ss:$16 sps:$4 sm:$0xff]   ;;  %v5329_v57 = vcombine.high %v1381_v51, %v1385_v52  ;;  %v5328_v62 = vcombine.low %v1381_v51, %v1385_v52  ;;  %v5989_v51 = vld [vmem:[#allocation4 + $0x20c] ss:$16 sps:$4 sm:$0xff]  }
 0x57d   : > { %1787 = vmatprep.subr.bf16.mxu1 %v5309_v54  ;;  %v5956_v54 = vld [vmem:[#allocation4 + $0x164] ss:$16 sps:$4 sm:$0xff]  }
 0x57e   : > { %3804 = vmatpush1.bf16.msra.mxu0 %v5894_v58  ;;  %v1389_v58 = vld [vmem:[#allocation2 + $0x158] sm:$0xff]  ;;  %v7197_v52 = vld [vmem:[%s7556_s5] sm:$0xff] }
 0x57f   : > { %1773 = vmatmul.mubr.bf16.gmra.mrb[20].mxu1 %v7176_v42  ;;  %1879 = vmatmul.mubr.bf16.gmra.mrb[4].mxu0 %v7176_v42 }
 0x580   : > { %1788 = vmatpush1.bf16.msra.mxu1 %v5308_v59  ;;  %1815 = vmatprep.mubr.bf16.mxu1 %v6540_v43  ;;  %v1393_v59 = vld [vmem:[#allocation2 + $0x178] sm:$0xff] }
 0x581   : > { %1789 = vmatprep.subr.bf16.mxu1 %v5317_v60  ;;  %3805 = vmatprep.subr.bf16.mxu0 %v5902_v61  ;;  %v5954_v60 = vld [vmem:[#allocation4 + $0x160] ss:$16 sps:$4 sm:$0xff]   ;;  %v5962_v61 = vld [vmem:[#allocation4 + $0x184] ss:$16 sps:$4 sm:$0xff]   ;;  %v5337_v63 = vcombine.high %v1389_v58, %v1393_v59 }
 0x582   : > { %3806 = vmatpush1.bf16.msra.mxu0 %v5900_v0  ;;  %v1397_v0 = vld [vmem:[#allocation2 + $0x198] sm:$0xff] }
 0x583   : > { %3807 = vmatprep.subr.bf16.mxu0 %v5908_v1  ;;  %v1401_v1 = vld [vmem:[#allocation2 + $0x1b8] sm:$0xff] }
 0x584   : > { %1790 = vmatpush1.bf16.msra.mxu1 %v5316_v3  ;;  %v5960_v3 = vld [vmem:[#allocation4 + $0x180] ss:$16 sps:$4 sm:$0xff]   ;;  %v5345_v5 = vcombine.high %v1397_v0, %v1401_v1 }
 0x585   : > { %1791 = vmatprep.subr.bf16.mxu1 %v5325_v4  ;;  %v5336_v4 = vcombine.low %v1389_v58, %v1393_v59 }
 0x586   : > { %3808 = vmatpush1.bf16.msra.mxu0 %v5906_v7  ;;  %v1409_v7 = vld [vmem:[#allocation2 + $0x1f8] sm:$0xff] }
 0x587   : > { %3809 = vmatprep.subr.bf16.mxu0 %v5914_v8  ;;  %v5344_v8 = vcombine.low %v1397_v0, %v1401_v1 }
 0x588   : > { %1792 = vmatpush1.bf16.msra.mxu1 %v5324_v9  ;;  %v5353_v9 = vcombine.high %v1405_v6, %v1409_v7 }
 0x589   : > { %1793 = vmatprep.subr.bf16.mxu1 %v5333_v10  ;;  %v5352_v10 = vcombine.low %v1405_v6, %v1409_v7 }
 0x58a   : > { %3810 = vmatpush1.bf16.msra.mxu0 %v5912_v13  ;;  %v5899_v13 = vld [vmem:[#allocation4 + $0x2c] ss:$16 sps:$4 sm:$0xff]  }
 0x58b   : > { %3811 = vmatprep.subr.bf16.mxu0 %v5920_v14  ;;  %v5897_v14 = vld [vmem:[#allocation4 + $0x28] ss:$16 sps:$4 sm:$0xff]  }
 0x58c   : > { %1794 = vmatpush1.bf16.msra.mxu1 %v5332_v15  ;;  %v5905_v15 = vld [vmem:[#allocation4 + $0x4c] ss:$16 sps:$4 sm:$0xff]  }
 0x58d   : > { %1795 = vmatprep.subr.bf16.mxu1 %v5341_v16  ;;  %v5903_v16 = vld [vmem:[#allocation4 + $0x48] ss:$16 sps:$4 sm:$0xff]  }
 0x58e   : > { %3812 = vmatpush1.bf16.msra.mxu0 %v5918_v18  ;;  %v5917_v18 = vld [vmem:[#allocation4 + $0x8c] ss:$16 sps:$4 sm:$0xff]  }
 0x58f   : > { %3813 = vmatprep.subr.bf16.mxu0 %v5926_v19  ;;  %v5915_v19 = vld [vmem:[#allocation4 + $0x88] ss:$16 sps:$4 sm:$0xff]  }
 0x590   : > { %1796 = vmatpush1.bf16.msra.mxu1 %v5340_v20  ;;  %v5929_v20 = vld [vmem:[#allocation4 + $0xcc] ss:$16 sps:$4 sm:$0xff]  }
 0x591   : > { %1797 = vmatprep.subr.bf16.mxu1 %v5349_v21  ;;  %v5968_v21 = vld [vmem:[#allocation4 + $0x1a4] ss:$16 sps:$4 sm:$0xff]  }
 0x592   : > { %3814 = vmatpush1.bf16.msra.mxu0 %v5924_v24  ;;  %v5935_v24 = vld [vmem:[#allocation4 + $0xec] ss:$16 sps:$4 sm:$0xff]  }
 0x593   : > { %3815 = vmatprep.subr.bf16.mxu0 %v5932_v25  ;;  %v5933_v25 = vld [vmem:[#allocation4 + $0xe8] ss:$16 sps:$4 sm:$0xff]  }
 0x594   : > { %1798 = vmatpush1.bf16.msra.mxu1 %v5348_v26  ;;  %v5972_v26 = vld [vmem:[#allocation4 + $0x1c0] ss:$16 sps:$4 sm:$0xff]  }
 0x595   : > { %1889 = vmatprep.subr.bf16.mxu1 %v5297_v27  ;;  %v5941_v27 = vld [vmem:[#allocation4 + $0x10c] ss:$16 sps:$4 sm:$0xff]  }
 0x596   : > { %3816 = vmatpush1.bf16.msra.mxu0 %v5930_v30  ;;  %v5978_v30 = vld [vmem:[#allocation4 + $0x1e0] ss:$16 sps:$4 sm:$0xff]  }
 0x597   : > { %1816 = vmatmul.mubr.bf16.vlgmr.msra.gmra.mrb[24].mxu1 %v7178_v47  ;;  %3817 = vmatprep.subr.bf16.mxu0 %v5938_v31  ;;  %v5947_v31 = vld [vmem:[#allocation4 + $0x12c] ss:$16 sps:$4 sm:$0xff]  }
 0x598   : > { %1890 = vmatpush1.bf16.msra.mxu1 %v5296_v32  ;;  %1825 = vmatprep.mubr.bf16.mxu1 %v6540_v43  ;;  %v5945_v32 = vld [vmem:[#allocation4 + $0x128] ss:$16 sps:$4 sm:$0xff]  }
 0x599   : > { %1891 = vmatprep.subr.bf16.mxu1 %v5305_v34  ;;  %v5953_v34 = vld [vmem:[#allocation4 + $0x14c] ss:$16 sps:$4 sm:$0xff]  }
 0x59a   : > { %3818 = vmatpush1.bf16.msra.mxu0 %v5936_v35  ;;  %v5986_v35 = vld [vmem:[#allocation4 + $0x204] ss:$16 sps:$4 sm:$0xff]  }
 0x59b   : > { %3819 = vmatprep.subr.bf16.mxu0 %v5944_v36  ;;  %v5957_v36 = vld [vmem:[#allocation4 + $0x168] ss:$16 sps:$4 sm:$0xff]  }
 0x59c   : > { %1892 = vmatpush1.bf16.msra.mxu1 %v5304_v37  ;;  %v5965_v37 = vld [vmem:[#allocation4 + $0x18c] ss:$16 sps:$4 sm:$0xff]  }
 0x59d   : > { %1893 = vmatprep.subr.bf16.mxu1 %v5313_v38  ;;  %v5963_v38 = vld [vmem:[#allocation4 + $0x188] ss:$16 sps:$4 sm:$0xff]  }
 0x59e   : > { %3820 = vmatpush1.bf16.msra.mxu0 %v5942_v46  ;;  %v5977_v46 = vld [vmem:[#allocation4 + $0x1cc] ss:$16 sps:$4 sm:$0xff]  }
 0x59f   : > { %1826 = vmatmul.mubr.bf16.gmra.mrb[28].mxu1 %v7176_v42  ;;  %3821 = vmatprep.subr.bf16.mxu0 %v5950_v48  ;;  %v5975_v48 = vld [vmem:[#allocation4 + $0x1c8] ss:$16 sps:$4 sm:$0xff]  }
 0x5a0   : > { %1894 = vmatpush1.bf16.msra.mxu1 %v5312_v49  ;;  %1921 = vmatprep.mubr.bf16.mxu1 %v6540_v43  ;;  %v5983_v49 = vld [vmem:[#allocation4 + $0x1ec] ss:$16 sps:$4 sm:$0xff]  }
 0x5a1   : > { %1895 = vmatprep.subr.bf16.mxu1 %v5321_v50  ;;  %v5981_v50 = vld [vmem:[#allocation4 + $0x1e8] ss:$16 sps:$4 sm:$0xff]  }
 0x5a2   : > { %3822 = vmatpush1.bf16.msra.mxu0 %v5948_v53  ;;  %v7202_v53 = vld [vmem:[%s7556_s5 + $0x8] sm:$0xff] }
 0x5a3   : > { %3823 = vmatprep.subr.bf16.mxu0 %v5956_v54  ;;  %v7205_v54 = vsub.s32 2, %v6776_v40  ;;  %v1963_v58 = vrot.slane %v7202_v53, %v7155_v55 }
 0x5a4   : > { %1896 = vmatpush1.bf16.msra.mxu1 %v5320_v56  ;;  %v7208_v56 = vsub.s32 3, %v6776_v40 }
 0x5a5   : > { %1897 = vmatprep.subr.bf16.mxu1 %v5329_v57  ;;  %v1947_v57 = vrot.slane %v7197_v52, %v7155_v55  ;;  %v1951_v59 = vrot.slane %v7197_v52, %v7205_v54 }
 0x5a6   : > { %3824 = vmatpush1.bf16.msra.mxu0 %v5954_v60  ;;  %v1967_v60 = vrot.slane %v7202_v53, %v7205_v54  ;;  %v2071_v0 = vrot.slane %v7202_v53, %v7208_v56 }
 0x5a7   : > { %3825 = vmatprep.subr.bf16.mxu0 %v5962_v61  ;;  %v2051_v61 = vrot.slane %v7197_v52, %v7168_v33  ;;  %v7227_v1 = vrot.slane %v1947_v57, %v7155_v55 }
 0x5a8   : > { %1898 = vmatpush1.bf16.msra.mxu1 %v5328_v62  ;;  %v2067_v62 = vrot.slane %v7202_v53, %v7168_v33 }
 0x5a9   : > { %1899 = vmatprep.subr.bf16.mxu1 %v5337_v63  ;;  %v2055_v63 = vrot.slane %v7197_v52, %v7208_v56  ;;  %v7239_v6 = vrot.slane %v2051_v61, %v7168_v33 }
 0x5aa   : > { %3826 = vmatpush1.bf16.msra.mxu0 %v5960_v3  ;;  %v7230_v3 = vrot.slane %v1963_v58, %v7155_v55  ;;  %v7242_v7 = vrot.slane %v2067_v62, %v7168_v33 }
 0x5ab   : > { %3827 = vmatprep.subr.bf16.mxu0 %v5968_v21 }
 0x5ac   : > { %1900 = vmatpush1.bf16.msra.mxu1 %v5336_v4  ;;  %v7233_v4 = vrot.slane %v1951_v59, %v7155_v55 }
 0x5ad   : > { %1901 = vmatprep.subr.bf16.mxu1 %v5345_v5  ;;  %v7236_v5 = vrot.slane %v1967_v60, %v7155_v55 }
 0x5ae   : > { %3828 = vmatpush1.bf16.msra.mxu0 %v5966_v23 }
 0x5b0   : > { %1902 = vmatpush1.bf16.msra.mxu1 %v5344_v8 }
 0x5b1   : > { %1903 = vmatprep.subr.bf16.mxu1 %v5353_v9 }
 0x5b4   : > { %1904 = vmatpush1.bf16.msra.mxu1 %v5352_v10  ;;  %v7245_v10 = vrot.slane %v2055_v63, %v7168_v33 }
 0x5b5   : > { %4013 = vmatprep.subr.bf16.mxu1 %v5893_v11  ;;  %v7248_v11 = vrot.slane %v2071_v0, %v7168_v33 }
 0x5b7   : > { %1922 = vmatmul.mubr.bf16.vlgmr.msra.gmra.mrb[32].mxu1 %v7178_v47  ;;  %v5923_v47 = vld [vmem:[#allocation4 + $0xac] ss:$16 sps:$4 sm:$0xff]  }
 0x5b8   : > { %1931 = vmatprep.mubr.bf16.mxu1 %v6540_v43  ;;  %4014 = vmatpush1.bf16.msra.mxu1 %v5891_v12  ;;  %v5921_v43 = vld [vmem:[#allocation4 + $0xa8] ss:$16 sps:$4 sm:$0xff]  }
 0x5b9   : > { %4015 = vmatprep.subr.bf16.mxu1 %v5899_v13 }
 0x5bc   : > { %4016 = vmatpush1.bf16.msra.mxu1 %v5897_v14 }
 0x5bd   : > { %4017 = vmatprep.subr.bf16.mxu1 %v5905_v15 }
 0x5bf   : > { %1932 = vmatmul.mubr.bf16.gmra.mrb[36].mxu1 %v7176_v42  ;;  %v5974_v42 = vld [vmem:[#allocation4 + $0x1c4] ss:$16 sps:$4 sm:$0xff]  }
 0x5c0   : > { %4018 = vmatpush1.bf16.msra.mxu1 %v5903_v16  ;;  %3829 = vmatprep.subr.bf16.mxu0 %v5974_v42 }
 0x5c1   : > { %4019 = vmatprep.subr.bf16.mxu1 %v5911_v17  ;;  %3830 = vmatpush1.bf16.msra.mxu0 %v5972_v26 }
 0x5c2   : > { %3831 = vmatprep.subr.bf16.mxu0 %v5980_v28 }
 0x5c4   : > { %4020 = vmatpush1.bf16.msra.mxu1 %v5909_v2 }
 0x5c5   : > { %4021 = vmatprep.subr.bf16.mxu1 %v5917_v18  ;;  %3832 = vmatpush1.bf16.msra.mxu0 %v5978_v30 }
 0x5c6   : > { %3854 = vmatprep.subr.bf16.mxu0 %v5986_v35 }
 0x5c8   : > { %4022 = vmatpush1.bf16.msra.mxu1 %v5915_v19  ;;  %v7255_v19 = vsub.s32 4, %v6776_v40 }
 0x5c9   : > { %4023 = vmatprep.subr.bf16.mxu1 %v5923_v47  ;;  %v7258_v47 = vsub.s32 6, %v6776_v40 }
 0x5cc   : > { %4024 = vmatpush1.bf16.msra.mxu1 %v5921_v43 }
 0x5cd   : > { %4025 = vmatprep.subr.bf16.mxu1 %v5929_v20 }
 0x5d0   : > { %4026 = vmatpush1.bf16.msra.mxu1 %v5927_v22 }
 0x5d1   : > { %4027 = vmatprep.subr.bf16.mxu1 %v5935_v24 }
 0x5d4   : > { %4028 = vmatpush1.bf16.msra.mxu1 %v5933_v25 }
 0x5d5   : > { %4029 = vmatprep.subr.bf16.mxu1 %v5941_v27 }
 0x5d8   : > { %4030 = vmatpush1.bf16.msra.mxu1 %v5939_v29 }
 0x5d9   : > { %4031 = vmatprep.subr.bf16.mxu1 %v5947_v31 }
 0x5dc   : > { %4032 = vmatpush1.bf16.msra.mxu1 %v5945_v32 }
 0x5dd   : > { %4033 = vmatprep.subr.bf16.mxu1 %v5953_v34 }
 0x5e0   : > { %4034 = vmatpush1.bf16.msra.mxu1 %v5951_v45 }
 0x5e1   : > { %4035 = vmatprep.subr.bf16.mxu1 %v5959_v44 }
 0x5e4   : > { %4036 = vmatpush1.bf16.msra.mxu1 %v5957_v36 }
 0x5e5   : > { %4037 = vmatprep.subr.bf16.mxu1 %v5965_v37 }
 0x5e8   : > { %4038 = vmatpush1.bf16.msra.mxu1 %v5963_v38 }
 0x5e9   : > { %4039 = vmatprep.subr.bf16.mxu1 %v5971_v39 }
 0x5ec   : > { %4040 = vmatpush1.bf16.msra.mxu1 %v5969_v41 }
 0x5ed   : > { %4041 = vmatprep.subr.bf16.mxu1 %v5977_v46 }
 0x5f0   : > { %4042 = vmatpush1.bf16.msra.mxu1 %v5975_v48 }
 0x5f1   : > { %4043 = vmatprep.subr.bf16.mxu1 %v5983_v49 }
 0x5f4   : > { %4044 = vmatpush1.bf16.msra.mxu1 %v5981_v50 }
 0x5f5   : > { %4066 = vmatprep.subr.bf16.mxu1 %v5989_v51 }
 0x64a   : > { %v1764_v8 = vpop.f32.mrb[16].mxu1  ;;  %v1870_v9 = vpop.f32.mrb[0].mxu0 }
 0x64b   : > { %v2016_v12 = vmul.f32 %v7227_v1, %v1764_v8  ;;  %v2020_v13 = vmul.f32 %v7230_v3, %v1870_v9  ;;  %v1766_v14 = vpop.f32.mrb[17].mxu1  ;;  %v1872_v15 = vpop.f32.mrb[1].mxu0 }
 0x64c   : > { %v2017_v16 = vmul.f32 %v7233_v4, %v1766_v14  ;;  %v2021_v17 = vmul.f32 %v7236_v5, %v1872_v15  ;;  %v1768_v2 = vpop.f32.mrb[18].mxu1  ;;  %v1874_v18 = vpop.f32.mrb[2].mxu0 }
 0x64d   : > { %v2120_v43 = vadd.f32 %v7239_v6, %v2016_v12  ;;  %v2124_v20 = vadd.f32 %v7242_v7, %v2020_v13  ;;  %v2024_v21 = vmul.f32 %v7227_v1, %v1768_v2  ;;  %v2028_v22 = vmul.f32 %v7230_v3, %v1874_v18  ;;  %v1770_v23 = vpop.f32.mrb[19].mxu1  ;;  %v1876_v24 = vpop.f32.mrb[3].mxu0 }
 0x64e   : > { %v2121_v42 = vadd.f32 %v7245_v10, %v2017_v16  ;;  %v2125_v25 = vadd.f32 %v7248_v11, %v2021_v17  ;;  %v2025_v26 = vmul.f32 %v7233_v4, %v1770_v23  ;;  %v2029_v27 = vmul.f32 %v7236_v5, %v1876_v24 }
 0x64f   : > { %vm2152_vm2 = vcmp.gt.f32.partialorder %v2120_v43, 0.0  ;;  %v2184_v28 = vmul.f32 0.2, %v2120_v43  ;;  %vm2156_vm9 = vcmp.gt.f32.partialorder %v2124_v20, 0.0  ;;  %v2188_v29 = vmul.f32 0.2, %v2124_v20 }
 0x650   : > { %vm2153_vm0 = vcmp.gt.f32.partialorder %v2121_v42, 0.0  ;;  %v2185_v30 = vmul.f32 0.2, %v2121_v42  ;;  %vm2157_vm10 = vcmp.gt.f32.partialorder %v2125_v25, 0.0  ;;  %v2189_v31 = vmul.f32 0.2, %v2125_v25 }
 0x651   : > { %v2216_v32 = vsel %vm2152_vm2, %v2120_v43, %v2184_v28  ;;  %v2220_v34 = vsel %vm2156_vm9, %v2124_v20, %v2188_v29  ;;  %v2128_v45 = vadd.f32 %v7239_v6, %v2024_v21  ;;  %v2132_v44 = vadd.f32 %v7242_v7, %v2028_v22 }
 0x652   : > { %v2129_v35 = vadd.f32 %v7245_v10, %v2025_v26  ;;  %v2133_v36 = vadd.f32 %v7248_v11, %v2029_v27  ;;  %v1774_v37 = vpop.f32.mrb[20].mxu1  ;;  %v1880_v38 = vpop.f32.mrb[4].mxu0  ;;  %v2217_v39 = vsel %vm2153_vm0, %v2121_v42, %v2185_v30  ;;  %v2221_v41 = vsel %vm2157_vm10, %v2125_v25, %v2189_v31 }
 0x653   : > { %vm2160_vm14 = vcmp.gt.f32.partialorder %v2128_v45, 0.0  ;;  %v2192_v46 = vmul.f32 0.2, %v2128_v45  ;;  %vm2164_vm1 = vcmp.gt.f32.partialorder %v2132_v44, 0.0  ;;  %v2196_v48 = vmul.f32 0.2, %v2132_v44 }
 0x654   : > { %vm2161_vm4 = vcmp.gt.f32.partialorder %v2129_v35, 0.0  ;;  %v2193_v49 = vmul.f32 0.2, %v2129_v35  ;;  %vm2165_vm8 = vcmp.gt.f32.partialorder %v2133_v36, 0.0  ;;  %v2197_v50 = vmul.f32 0.2, %v2133_v36 }
 0x655   : > { %v2224_v51 = vsel %vm2160_vm14, %v2128_v45, %v2192_v46  ;;  %v2228_v57 = vsel %vm2164_vm1, %v2132_v44, %v2196_v48  ;;  %v2032_v58 = vmul.f32 %v7227_v1, %v1774_v37  ;;  %v2036_v59 = vmul.f32 %v7230_v3, %v1880_v38  ;;  %v1776_v60 = vpop.f32.mrb[21].mxu1  ;;  %v1882_v61 = vpop.f32.mrb[5].mxu0  ;;  %v5992_v44 = vld [vmem:[#allocation4 + $0x224] ss:$16 sps:$4 sm:$0xff]  }
 0x656   : > { %v2248_v62 = vpack.c.bf16 %v2224_v51, %v2216_v32  ;;  %v7274_v63 = vpack.c.bf16 %v2228_v57, %v2220_v34  ;;  %v2033_v0 = vmul.f32 %v7233_v4, %v1776_v60  ;;  %v2037_v8 = vmul.f32 %v7236_v5, %v1882_v61  ;;  %v1778_v9 = vpop.f32.mrb[22].mxu1  ;;  %v1884_v12 = vpop.f32.mrb[6].mxu0  ;;  %v5987_v34 = vld [vmem:[#allocation4 + $0x208] ss:$16 sps:$4 sm:$0xff]   ;;  %v5990_v57 = vld [vmem:[#allocation4 + $0x220] ss:$16 sps:$4 sm:$0xff]  }
 0x657   : > { %v2136_v13 = vadd.f32 %v7239_v6, %v2032_v58  ;;  %v2140_v14 = vadd.f32 %v7242_v7, %v2036_v59  ;;  %v2040_v15 = vmul.f32 %v7227_v1, %v1778_v9  ;;  %v2044_v16 = vmul.f32 %v7230_v3, %v1884_v12  ;;  %v1780_v17 = vpop.f32.mrb[23].mxu1  ;;  %v1886_v2 = vpop.f32.mrb[7].mxu0  ;;  %v5993_v58 = vld [vmem:[#allocation4 + $0x228] ss:$16 sps:$4 sm:$0xff]   ;;  %v5998_v60 = vld [vmem:[#allocation4 + $0x244] ss:$16 sps:$4 sm:$0xff]  }
 0x658   : > { %v2137_v18 = vadd.f32 %v7245_v10, %v2033_v0  ;;  %v2141_v43 = vadd.f32 %v7248_v11, %v2037_v8  ;;  %v2041_v20 = vmul.f32 %v7233_v4, %v1780_v17  ;;  %v2045_v21 = vmul.f32 %v7236_v5, %v1886_v2  ;;  %v6001_v61 = vld [vmem:[#allocation4 + $0x24c] ss:$16 sps:$4 sm:$0xff]   ;;  %v5996_v8 = vld [vmem:[#allocation4 + $0x240] ss:$16 sps:$4 sm:$0xff]   ;;  %v5999_v9 = vld [vmem:[#allocation4 + $0x248] ss:$16 sps:$4 sm:$0xff]  }
 0x659   : > { %vm2168_vm15 = vcmp.gt.f32.partialorder %v2136_v13, 0.0  ;;  %v2200_v22 = vmul.f32 0.2, %v2136_v13  ;;  %vm2172_vm12 = vcmp.gt.f32.partialorder %v2140_v14, 0.0  ;;  %v2204_v23 = vmul.f32 0.2, %v2140_v14 }
 0x65a   : > { %vm2169_vm13 = vcmp.gt.f32.partialorder %v2137_v18, 0.0  ;;  %v2201_v24 = vmul.f32 0.2, %v2137_v18  ;;  %vm2173_vm5 = vcmp.gt.f32.partialorder %v2141_v43, 0.0  ;;  %v2205_v1 = vmul.f32 0.2, %v2141_v43 }
 0x65b   : > { %v2144_v3 = vadd.f32 %v7239_v6, %v2040_v15  ;;  %v2148_v42 = vadd.f32 %v7242_v7, %v2044_v16  ;;  %v2145_v25 = vadd.f32 %v7245_v10, %v2041_v20  ;;  %v2149_v26 = vadd.f32 %v7248_v11, %v2045_v21  ;;  %v5984_v7 = vld [vmem:[#allocation4 + $0x200] ss:$16 sps:$4 sm:$0xff]   ;;  %v6010_v21 = vld [vmem:[#allocation4 + $0x284] ss:$16 sps:$4 sm:$0xff]  }
 0x65c   : > { %v2225_v4 = vsel %vm2161_vm4, %v2129_v35, %v2193_v49  ;;  %v2233_v27 = vsel %vm2169_vm13, %v2137_v18, %v2201_v24  ;;  %v2232_v5 = vsel %vm2168_vm15, %v2136_v13, %v2200_v22  ;;  %v2229_v28 = vsel %vm2165_vm8, %v2133_v36, %v2197_v50  ;;  %v5995_v35 = vld [vmem:[#allocation4 + $0x22c] ss:$16 sps:$4 sm:$0xff]   ;;  %v6004_v13 = vld [vmem:[#allocation4 + $0x264] ss:$16 sps:$4 sm:$0xff]   ;;  %v6002_v2 = vld [vmem:[#allocation4 + $0x260] ss:$16 sps:$4 sm:$0xff]  }
 0x65d   : > { %vm2176_vm7 = vcmp.gt.f32.partialorder %v2144_v3, 0.0  ;;  %v2208_v29 = vmul.f32 0.2, %v2144_v3  ;;  %vm2180_vm6 = vcmp.gt.f32.partialorder %v2148_v42, 0.0  ;;  %v2212_v30 = vmul.f32 0.2, %v2148_v42 }
 0x65e   : > { %vm2177_vm11 = vcmp.gt.f32.partialorder %v2145_v25, 0.0  ;;  %v2209_v31 = vmul.f32 0.2, %v2145_v25  ;;  %vm2181_vm3 = vcmp.gt.f32.partialorder %v2149_v26, 0.0  ;;  %v2213_v6 = vmul.f32 0.2, %v2149_v26 }
 0x65f   : > { %v2249_v32 = vpack.c.bf16 %v2225_v4, %v2217_v39  ;;  %v2240_v10 = vsel %vm2176_vm7, %v2144_v3, %v2208_v29  ;;  %v7292_v45 = vpack.c.bf16 %v2229_v28, %v2221_v41  ;;  %v2237_v11 = vsel %vm2173_vm5, %v2141_v43, %v2205_v1  ;;  %v6005_v18 = vld [vmem:[#allocation4 + $0x268] ss:$16 sps:$4 sm:$0xff]   ;;  %v6013_v22 = vld [vmem:[#allocation4 + $0x28c] ss:$16 sps:$4 sm:$0xff]   ;;  %v6016_v29 = vld [vmem:[#allocation4 + $0x2a4] ss:$16 sps:$4 sm:$0xff]  }
 0x660   : > { %v2241_v37 = vsel %vm2177_vm11, %v2145_v25, %v2209_v31  ;;  %v2256_v36 = vpack.c.bf16 %v2240_v10, %v2232_v5  ;;  %v2245_v38 = vsel %vm2181_vm3, %v2149_v26, %v2213_v6  ;;  %v2236_v46 = vsel %vm2172_vm12, %v2140_v14, %v2204_v23  ;;  %v6007_v14 = vld [vmem:[#allocation4 + $0x26c] ss:$16 sps:$4 sm:$0xff]   ;;  %v6008_v25 = vld [vmem:[#allocation4 + $0x280] ss:$16 sps:$4 sm:$0xff]   ;;  %v6011_v26 = vld [vmem:[#allocation4 + $0x288] ss:$16 sps:$4 sm:$0xff]  }
 0x661   : > { %3833 = vmatprep.mubr.bf16.mxu0 %v2249_v32  ;;  %4045 = vmatprep.mubr.bf16.mxu1 %v2249_v32  ;;  %v2257_v48 = vpack.c.bf16 %v2241_v37, %v2233_v27  ;;  %v7297_v49 = vsub.s32 5, %v6776_v40  ;;  %v7299_v39 = vpack.c.bf16 %v2245_v38, %v2237_v11  ;;  %v2244_v41 = vsel %vm2180_vm6, %v2148_v42, %v2212_v30  ;;  %v6019_v31 = vld [vmem:[#allocation4 + $0x2ac] ss:$16 sps:$4 sm:$0xff]  }
 0x662   : > { %3834 = vmatmul.mubr.bf16.vlgmr.msra.gmra.mrb[8].mxu0 %v2248_v62  ;;  %4046 = vmatmul.mubr.bf16.vlgmr.msra.gmra.mrb[40].mxu1 %v2248_v62  ;;  %v7303_v50 = vsub.s32 7, %v6776_v40  ;;  %v7305_v51 = vpack.c.bf16 %v2244_v41, %v2236_v46  ;;  %v1955_v59 = vrot.slane %v7197_v52, %v7255_v19  ;;  %v1959_v0 = vrot.slane %v7197_v52, %v7258_v47  ;;  %v6025_v41 = vld [vmem:[#allocation4 + $0x2cc] ss:$16 sps:$4 sm:$0xff]  }
 0x663   : > { %3855 = vmatpush1.bf16.msra.mxu0 %v5984_v7  ;;  %4067 = vmatpush1.bf16.msra.mxu1 %v5987_v34  ;;  %v2059_v40 = vrot.slane %v7197_v52, %v7297_v49 }
 0x664   : > { %3856 = vmatprep.subr.bf16.mxu0 %v5992_v44  ;;  %4068 = vmatprep.subr.bf16.mxu1 %v5995_v35  ;;  %v2063_v62 = vrot.slane %v7197_v52, %v7303_v50  ;;  %v7316_v12 = vrot.slane %v1955_v59, %v7155_v55  ;;  %v7319_v15 = vrot.slane %v1959_v0, %v7155_v55  ;;  %v6014_v44 = vld [vmem:[#allocation4 + $0x2a0] ss:$16 sps:$4 sm:$0xff]   ;;  %v6017_v35 = vld [vmem:[#allocation4 + $0x2a8] ss:$16 sps:$4 sm:$0xff]  }
 0x665   : > { %3843 = vmatprep.mubr.bf16.mxu0 %v2257_v48  ;;  %4055 = vmatprep.mubr.bf16.mxu1 %v2257_v48  ;;  %v7322_v16 = vrot.slane %v2059_v40, %v7168_v33  ;;  %v6022_v48 = vld [vmem:[#allocation4 + $0x2c4] ss:$16 sps:$4 sm:$0xff]  }
 0x666   : > { %v7325_v17 = vrot.slane %v2063_v62, %v7168_v33  ;;  %v6020_v62 = vld [vmem:[#allocation4 + $0x2c0] ss:$16 sps:$4 sm:$0xff]  }
 0x667   : > { %3857 = vmatpush1.bf16.msra.mxu0 %v5990_v57  ;;  %4069 = vmatpush1.bf16.msra.mxu1 %v5993_v58 }
 0x668   : > { %3858 = vmatprep.subr.bf16.mxu0 %v5998_v60  ;;  %4070 = vmatprep.subr.bf16.mxu1 %v6001_v61 }
 0x66a   : > { %3844 = vmatmul.mubr.bf16.gmra.mrb[12].mxu0 %v2256_v36  ;;  %4056 = vmatmul.mubr.bf16.gmra.mrb[44].mxu1 %v2256_v36  ;;  %v1817_v52 = vpop.f32.mrb[24].mxu1 }
 0x66b   : > { %3859 = vmatpush1.bf16.msra.mxu0 %v5996_v8  ;;  %4071 = vmatpush1.bf16.msra.mxu1 %v5999_v9  ;;  %v2018_v43 = vmul.f32 %v7316_v12, %v1817_v52  ;;  %v1819_v20 = vpop.f32.mrb[25].mxu1 }
 0x66c   : > { %3860 = vmatprep.subr.bf16.mxu0 %v6004_v13  ;;  %4072 = vmatprep.subr.bf16.mxu1 %v6007_v14  ;;  %v2019_v23 = vmul.f32 %v7319_v15, %v1819_v20  ;;  %v1821_v24 = vpop.f32.mrb[26].mxu1  ;;  %v6023_v13 = vld [vmem:[#allocation4 + $0x2c8] ss:$16 sps:$4 sm:$0xff]  }
 0x66d   : > { %v2122_v1 = vadd.f32 %v7322_v16, %v2018_v43  ;;  %v2026_v3 = vmul.f32 %v7316_v12, %v1821_v24  ;;  %v1823_v42 = vpop.f32.mrb[27].mxu1  ;;  %v6031_v43 = vld [vmem:[#allocation4 + $0x2ec] ss:$16 sps:$4 sm:$0xff]   ;;  %v6034_v24 = vld [vmem:[#allocation4 + $0x304] ss:$16 sps:$4 sm:$0xff]  }
 0x66e   : > { %v2123_v4 = vadd.f32 %v7325_v17, %v2019_v23  ;;  %v2027_v27 = vmul.f32 %v7319_v15, %v1823_v42 }
 0x66f   : > { %3861 = vmatpush1.bf16.msra.mxu0 %v6002_v2  ;;  %4073 = vmatpush1.bf16.msra.mxu1 %v6005_v18  ;;  %vm2154_vm2 = vcmp.gt.f32.partialorder %v2122_v1, 0.0  ;;  %v2186_v5 = vmul.f32 0.2, %v2122_v1  ;;  %v2130_v28 = vadd.f32 %v7322_v16, %v2026_v3  ;;  %v6028_v2 = vld [vmem:[#allocation4 + $0x2e4] ss:$16 sps:$4 sm:$0xff]  }
 0x670   : > { %3862 = vmatprep.subr.bf16.mxu0 %v6010_v21  ;;  %4074 = vmatprep.subr.bf16.mxu1 %v6013_v22  ;;  %vm2155_vm9 = vcmp.gt.f32.partialorder %v2123_v4, 0.0  ;;  %v2187_v30 = vmul.f32 0.2, %v2123_v4  ;;  %v2131_v6 = vadd.f32 %v7325_v17, %v2027_v27  ;;  %v6026_v21 = vld [vmem:[#allocation4 + $0x2e0] ss:$16 sps:$4 sm:$0xff]  }
 0x671   : > { %vm2162_vm0 = vcmp.gt.f32.partialorder %v2130_v28, 0.0  ;;  %v2194_v32 = vmul.f32 0.2, %v2130_v28  ;;  %v2218_v7 = vsel %vm2154_vm2, %v2122_v1, %v2186_v5  ;;  %v6029_v22 = vld [vmem:[#allocation4 + $0x2e8] ss:$16 sps:$4 sm:$0xff]  }
 0x672   : > { %vm2163_vm10 = vcmp.gt.f32.partialorder %v2131_v6, 0.0  ;;  %v2195_v34 = vmul.f32 0.2, %v2131_v6  ;;  %v1827_v10 = vpop.f32.mrb[28].mxu1  ;;  %v2219_v38 = vsel %vm2155_vm9, %v2123_v4, %v2187_v30  ;;  %v6037_v1 = vld [vmem:[#allocation4 + $0x30c] ss:$16 sps:$4 sm:$0xff]   ;;  %v1971_v30 = vrot.slane %v7202_v53, %v7255_v19 }
 0x673   : > { %3863 = vmatpush1.bf16.msra.mxu0 %v6008_v25  ;;  %4075 = vmatpush1.bf16.msra.mxu1 %v6011_v26  ;;  %v2226_v11 = vsel %vm2162_vm0, %v2130_v28, %v2194_v32  ;;  %v2034_v37 = vmul.f32 %v7316_v12, %v1827_v10  ;;  %v1829_v36 = vpop.f32.mrb[29].mxu1  ;;  %v6032_v26 = vld [vmem:[#allocation4 + $0x300] ss:$16 sps:$4 sm:$0xff]   ;;  %v6035_v4 = vld [vmem:[#allocation4 + $0x308] ss:$16 sps:$4 sm:$0xff]   ;;  %v1975_v32 = vrot.slane %v7202_v53, %v7258_v47 }
 0x674   : > { %v7337_v46 = vpack.c.bf16 %v2226_v11, %v2218_v7  ;;  %3864 = vmatprep.subr.bf16.mxu0 %v6016_v29  ;;  %4076 = vmatprep.subr.bf16.mxu1 %v6019_v31  ;;  %v2035_v57 = vmul.f32 %v7319_v15, %v1829_v36  ;;  %v1831_v58 = vpop.f32.mrb[30].mxu1  ;;  %v2227_v59 = vsel %vm2163_vm10, %v2131_v6, %v2195_v34  ;;  %v6040_v27 = vld [vmem:[#allocation4 + $0x324] ss:$16 sps:$4 sm:$0xff]   ;;  %v6043_v5 = vld [vmem:[#allocation4 + $0x32c] ss:$16 sps:$4 sm:$0xff]  }
 0x675   : > { %v2138_v60 = vadd.f32 %v7322_v16, %v2034_v37  ;;  %v2042_v61 = vmul.f32 %v7316_v12, %v1831_v58  ;;  %v1833_v0 = vpop.f32.mrb[31].mxu1  ;;  %v2251_v40 = vpack.c.bf16 %v2227_v59, %v2219_v38  ;;  %v6038_v28 = vld [vmem:[#allocation4 + $0x320] ss:$16 sps:$4 sm:$0xff]   ;;  %v6041_v29 = vld [vmem:[#allocation4 + $0x328] ss:$16 sps:$4 sm:$0xff]   ;;  %v2075_v7 = vrot.slane %v7202_v53, %v7297_v49 }
 0x676   : > { %v2139_v8 = vadd.f32 %v7325_v17, %v2035_v57  ;;  %v2043_v9 = vmul.f32 %v7319_v15, %v1833_v0  ;;  %v6046_v31 = vld [vmem:[#allocation4 + $0x344] ss:$16 sps:$4 sm:$0xff]   ;;  %v6049_v6 = vld [vmem:[#allocation4 + $0x34c] ss:$16 sps:$4 sm:$0xff]   ;;  %v2079_v34 = vrot.slane %v7202_v53, %v7303_v50  ;;  %v6044_v10 = vld [vmem:[#allocation4 + $0x340] ss:$16 sps:$4 sm:$0xff]   ;;  %v7364_v36 = vrot.slane %v1975_v32, %v7155_v55 }
 0x677   : > { %3865 = vmatpush1.bf16.msra.mxu0 %v6014_v44  ;;  %4077 = vmatpush1.bf16.msra.mxu1 %v6017_v35  ;;  %v2202_v14 = vmul.f32 0.2, %v2138_v60  ;;  %v2146_v52 = vadd.f32 %v7322_v16, %v2042_v61  ;;  %vm2170_vm14 = vcmp.gt.f32.partialorder %v2138_v60, 0.0  ;;  %v6047_v11 = vld [vmem:[#allocation4 + $0x348] ss:$16 sps:$4 sm:$0xff]   ;;  %v7361_v44 = vrot.slane %v1971_v30, %v7155_v55 }
 0x678   : > { %3866 = vmatprep.subr.bf16.mxu0 %v6022_v48  ;;  %4078 = vmatprep.subr.bf16.mxu1 %v6025_v41  ;;  %v2203_v18 = vmul.f32 0.2, %v2139_v8  ;;  %v2147_v12 = vadd.f32 %v7325_v17, %v2043_v9  ;;  %vm2171_vm1 = vcmp.gt.f32.partialorder %v2139_v8, 0.0  ;;  %v6052_v35 = vld [vmem:[#allocation4 + $0x364] ss:$16 sps:$4 sm:$0xff]   ;;  %v7367_v38 = vrot.slane %v2075_v7, %v7168_v33 }
 0x679   : > { %vm2178_vm4 = vcmp.gt.f32.partialorder %v2146_v52, 0.0  ;;  %v2210_v20 = vmul.f32 0.2, %v2146_v52  ;;  %3886 = vmatprep.mubr.bf16.mxu0 %v2251_v40  ;;  %4098 = vmatprep.mubr.bf16.mxu1 %v2251_v40  ;;  %v2234_v16 = vsel %vm2170_vm14, %v2138_v60, %v2202_v14  ;;  %v6055_v37 = vld [vmem:[#allocation4 + $0x36c] ss:$16 sps:$4 sm:$0xff]   ;;  %v7370_v53 = vrot.slane %v2079_v34, %v7168_v33 }
 0x67a   : > { %vm2179_vm8 = vcmp.gt.f32.partialorder %v2147_v12, 0.0  ;;  %v2211_v15 = vmul.f32 0.2, %v2147_v12  ;;  %v2235_v3 = vsel %vm2171_vm1, %v2139_v8, %v2203_v18  ;;  %v6050_v41 = vld [vmem:[#allocation4 + $0x360] ss:$16 sps:$4 sm:$0xff]  }
 0x67b   : > { %3867 = vmatpush1.bf16.msra.mxu0 %v6020_v62  ;;  %4079 = vmatpush1.bf16.msra.mxu1 %v6023_v13  ;;  %v2242_v23 = vsel %vm2178_vm4, %v2146_v52, %v2210_v20  ;;  %v6053_v57 = vld [vmem:[#allocation4 + $0x368] ss:$16 sps:$4 sm:$0xff]   ;;  %v6058_v60 = vld [vmem:[#allocation4 + $0x384] ss:$16 sps:$4 sm:$0xff]   ;;  %v6061_v61 = vld [vmem:[#allocation4 + $0x38c] ss:$16 sps:$4 sm:$0xff]  }
 0x67c   : > { %3868 = vmatprep.subr.bf16.mxu0 %v6028_v2  ;;  %4080 = vmatprep.subr.bf16.mxu1 %v6031_v43  ;;  %v2243_v17 = vsel %vm2179_vm8, %v2147_v12, %v2211_v15  ;;  %v7348_v42 = vpack.c.bf16 %v2242_v23, %v2234_v16  ;;  %v6056_v13 = vld [vmem:[#allocation4 + $0x380] ss:$16 sps:$4 sm:$0xff]   ;;  %v6059_v14 = vld [vmem:[#allocation4 + $0x388] ss:$16 sps:$4 sm:$0xff]   ;;  %v6064_v12 = vld [vmem:[#allocation4 + $0x3a4] ss:$16 sps:$4 sm:$0xff]  }
 0x67d   : > { %v7350_v25 = vpack.c.bf16 %v2243_v17, %v2235_v3  ;;  %v6067_v15 = vld [vmem:[#allocation4 + $0x3ac] ss:$16 sps:$4 sm:$0xff]   ;;  %v6062_v3 = vld [vmem:[#allocation4 + $0x3a0] ss:$16 sps:$4 sm:$0xff]   ;;  %v6065_v17 = vld [vmem:[#allocation4 + $0x3a8] ss:$16 sps:$4 sm:$0xff]  }
 0x67f   : > { %3869 = vmatpush1.bf16.msra.mxu0 %v6026_v21  ;;  %4081 = vmatpush1.bf16.msra.mxu1 %v6029_v22 }
 0x680   : > { %3870 = vmatprep.subr.bf16.mxu0 %v6034_v24  ;;  %4082 = vmatprep.subr.bf16.mxu1 %v6037_v1 }
 0x683   : > { %3871 = vmatpush1.bf16.msra.mxu0 %v6032_v26  ;;  %4083 = vmatpush1.bf16.msra.mxu1 %v6035_v4 }
 0x684   : > { %3872 = vmatprep.subr.bf16.mxu0 %v6040_v27  ;;  %4084 = vmatprep.subr.bf16.mxu1 %v6043_v5 }
 0x687   : > { %3873 = vmatpush1.bf16.msra.mxu0 %v6038_v28  ;;  %4085 = vmatpush1.bf16.msra.mxu1 %v6041_v29  ;;  %v6070_v28 = vld [vmem:[#allocation4 + $0x3c4] ss:$16 sps:$4 sm:$0xff]   ;;  %v6073_v29 = vld [vmem:[#allocation4 + $0x3cc] ss:$16 sps:$4 sm:$0xff]  }
 0x688   : > { %3874 = vmatprep.subr.bf16.mxu0 %v6046_v31  ;;  %4086 = vmatprep.subr.bf16.mxu1 %v6049_v6 }
 0x68a   : > { %v1923_v48 = vpop.f32.mrb[32].mxu1 }
 0x68b   : > { %3875 = vmatpush1.bf16.msra.mxu0 %v6044_v10  ;;  %4087 = vmatpush1.bf16.msra.mxu1 %v6047_v11  ;;  %v2022_v58 = vmul.f32 %v7361_v44, %v1923_v48  ;;  %v1925_v59 = vpop.f32.mrb[33].mxu1  ;;  %v6068_v11 = vld [vmem:[#allocation4 + $0x3c0] ss:$16 sps:$4 sm:$0xff]   ;;  %v6071_v48 = vld [vmem:[#allocation4 + $0x3c8] ss:$16 sps:$4 sm:$0xff]  }
 0x68c   : > { %3876 = vmatprep.subr.bf16.mxu0 %v6052_v35  ;;  %4088 = vmatprep.subr.bf16.mxu1 %v6055_v37  ;;  %v2023_v0 = vmul.f32 %v7364_v36, %v1925_v59  ;;  %v1927_v40 = vpop.f32.mrb[34].mxu1 }
 0x68d   : > { %v2126_v62 = vadd.f32 %v7367_v38, %v2022_v58  ;;  %v2030_v8 = vmul.f32 %v7361_v44, %v1927_v40  ;;  %v1929_v9 = vpop.f32.mrb[35].mxu1  ;;  %v6076_v58 = vld [vmem:[#allocation4 + $0x3e4] ss:$16 sps:$4 sm:$0xff]   ;;  %v6077_v40 = vld [vmem:[#allocation4 + $0x3e8] ss:$16 sps:$4 sm:$0xff]  }
 0x68e   : > { %v2127_v52 = vadd.f32 %v7370_v53, %v2023_v0  ;;  %v2031_v2 = vmul.f32 %v7364_v36, %v1929_v9  ;;  %v6085_v9 = vld [vmem:[#allocation4 + $0x40c] ss:$16 sps:$4 sm:$0xff]  }
 0x68f   : > { %3877 = vmatpush1.bf16.msra.mxu0 %v6050_v41  ;;  %4089 = vmatpush1.bf16.msra.mxu1 %v6053_v57  ;;  %vm2158_vm15 = vcmp.gt.f32.partialorder %v2126_v62, 0.0  ;;  %v2190_v18 = vmul.f32 0.2, %v2126_v62  ;;  %v2134_v43 = vadd.f32 %v7367_v38, %v2030_v8 }
 0x690   : > { %3878 = vmatprep.subr.bf16.mxu0 %v6058_v60  ;;  %4090 = vmatprep.subr.bf16.mxu1 %v6061_v61  ;;  %vm2159_vm12 = vcmp.gt.f32.partialorder %v2127_v52, 0.0  ;;  %v2191_v20 = vmul.f32 0.2, %v2127_v52  ;;  %v2135_v21 = vadd.f32 %v7370_v53, %v2031_v2  ;;  %v6080_v2 = vld [vmem:[#allocation4 + $0x400] ss:$16 sps:$4 sm:$0xff]  }
 0x691   : > { %vm2166_vm13 = vcmp.gt.f32.partialorder %v2134_v43, 0.0  ;;  %v2198_v22 = vmul.f32 0.2, %v2134_v43  ;;  %v2222_v16 = vsel %vm2158_vm15, %v2126_v62, %v2190_v18  ;;  %v6083_v18 = vld [vmem:[#allocation4 + $0x408] ss:$16 sps:$4 sm:$0xff]  }
 0x692   : > { %vm2167_vm5 = vcmp.gt.f32.partialorder %v2135_v21, 0.0  ;;  %v2199_v23 = vmul.f32 0.2, %v2135_v21  ;;  %v1933_v24 = vpop.f32.mrb[36].mxu1  ;;  %v2223_v27 = vsel %vm2159_vm12, %v2127_v52, %v2191_v20  ;;  %v6086_v20 = vld [vmem:[#allocation4 + $0x420] ss:$16 sps:$4 sm:$0xff]  }
 0x693   : > { %3879 = vmatpush1.bf16.msra.mxu0 %v6056_v13  ;;  %4091 = vmatpush1.bf16.msra.mxu1 %v6059_v14  ;;  %v2230_v1 = vsel %vm2166_vm13, %v2134_v43, %v2198_v22  ;;  %v2038_v26 = vmul.f32 %v7361_v44, %v1933_v24  ;;  %v1935_v4 = vpop.f32.mrb[37].mxu1  ;;  %v6088_v43 = vld [vmem:[#allocation4 + $0x424] ss:$16 sps:$4 sm:$0xff]   ;;  %v6097_v22 = vld [vmem:[#allocation4 + $0x44c] ss:$16 sps:$4 sm:$0xff]  }
 0x694   : > { %v7382_v5 = vpack.c.bf16 %v2230_v1, %v2222_v16  ;;  %3880 = vmatprep.subr.bf16.mxu0 %v6064_v12  ;;  %4092 = vmatprep.subr.bf16.mxu1 %v6067_v15  ;;  %v2039_v30 = vmul.f32 %v7364_v36, %v1935_v4  ;;  %v1937_v31 = vpop.f32.mrb[38].mxu1  ;;  %v2231_v6 = vsel %vm2167_vm5, %v2135_v21, %v2199_v23  ;;  %v6091_v12 = vld [vmem:[#allocation4 + $0x42c] ss:$16 sps:$4 sm:$0xff]   ;;  %v6089_v15 = vld [vmem:[#allocation4 + $0x428] ss:$16 sps:$4 sm:$0xff]  }
 0x695   : > { %v2142_v32 = vadd.f32 %v7367_v38, %v2038_v26  ;;  %v2046_v7 = vmul.f32 %v7361_v44, %v1937_v31  ;;  %v1939_v34 = vpop.f32.mrb[39].mxu1  ;;  %v7388_v10 = vpack.c.bf16 %v2231_v6, %v2223_v27  ;;  %v6079_v44 = vld [vmem:[#allocation4 + $0x3ec] ss:$16 sps:$4 sm:$0xff]   ;;  %v6094_v21 = vld [vmem:[#allocation4 + $0x444] ss:$16 sps:$4 sm:$0xff]  }
 0x696   : > { %v2143_v35 = vadd.f32 %v7370_v53, %v2039_v30  ;;  %v2047_v37 = vmul.f32 %v7364_v36, %v1939_v34  ;;  %v6074_v36 = vld [vmem:[#allocation4 + $0x3e0] ss:$16 sps:$4 sm:$0xff]   ;;  %v6095_v23 = vld [vmem:[#allocation4 + $0x448] ss:$16 sps:$4 sm:$0xff]   ;;  %v6100_v24 = vld [vmem:[#allocation4 + $0x464] ss:$16 sps:$4 sm:$0xff]  }
 0x697   : > { %3881 = vmatpush1.bf16.msra.mxu0 %v6062_v3  ;;  %4093 = vmatpush1.bf16.msra.mxu1 %v6065_v17  ;;  %v2206_v41 = vmul.f32 0.2, %v2142_v32  ;;  %v2150_v57 = vadd.f32 %v7367_v38, %v2046_v7  ;;  %vm2174_vm7 = vcmp.gt.f32.partialorder %v2142_v32, 0.0  ;;  %v6082_v38 = vld [vmem:[#allocation4 + $0x404] ss:$16 sps:$4 sm:$0xff]  }
 0x698   : > { %3882 = vmatprep.subr.bf16.mxu0 %v6070_v28  ;;  %4094 = vmatprep.subr.bf16.mxu1 %v6073_v29  ;;  %v2207_v59 = vmul.f32 0.2, %v2143_v35  ;;  %v2151_v60 = vadd.f32 %v7370_v53, %v2047_v37  ;;  %vm2175_vm6 = vcmp.gt.f32.partialorder %v2143_v35, 0.0  ;;  %v6092_v16 = vld [vmem:[#allocation4 + $0x440] ss:$16 sps:$4 sm:$0xff]  }
 0x699   : > { %vm2182_vm11 = vcmp.gt.f32.partialorder %v2150_v57, 0.0  ;;  %v2214_v61 = vmul.f32 0.2, %v2150_v57  ;;  %v2238_v62 = vsel %vm2174_vm7, %v2142_v32, %v2206_v41  ;;  %v6101_v1 = vld [vmem:[#allocation4 + $0x468] ss:$16 sps:$4 sm:$0xff]  }
 0x69a   : > { %vm2183_vm3 = vcmp.gt.f32.partialorder %v2151_v60, 0.0  ;;  %v2215_v0 = vmul.f32 0.2, %v2151_v60  ;;  %v2239_v13 = vsel %vm2175_vm6, %v2143_v35, %v2207_v59  ;;  %v6106_v3 = vld [vmem:[#allocation4 + $0x484] ss:$16 sps:$4 sm:$0xff]  }
 0x69b   : > { %3883 = vmatpush1.bf16.msra.mxu0 %v6068_v11  ;;  %4095 = vmatpush1.bf16.msra.mxu1 %v6071_v48  ;;  %v2246_v8 = vsel %vm2182_vm11, %v2150_v57, %v2214_v61  ;;  %v6109_v17 = vld [vmem:[#allocation4 + $0x48c] ss:$16 sps:$4 sm:$0xff]   ;;  %v6104_v26 = vld [vmem:[#allocation4 + $0x480] ss:$16 sps:$4 sm:$0xff]   ;;  %v6107_v4 = vld [vmem:[#allocation4 + $0x488] ss:$16 sps:$4 sm:$0xff]  }
 0x69c   : > { %3884 = vmatprep.subr.bf16.mxu0 %v6076_v58  ;;  %4096 = vmatprep.subr.bf16.mxu1 %v6079_v44  ;;  %v2247_v14 = vsel %vm2183_vm3, %v2151_v60, %v2215_v0  ;;  %v7394_v52 = vpack.c.bf16 %v2246_v8, %v2238_v62  ;;  %v6112_v27 = vld [vmem:[#allocation4 + $0x4a4] ss:$16 sps:$4 sm:$0xff]   ;;  %v6110_v28 = vld [vmem:[#allocation4 + $0x4a0] ss:$16 sps:$4 sm:$0xff]   ;;  %v6113_v29 = vld [vmem:[#allocation4 + $0x4a8] ss:$16 sps:$4 sm:$0xff]  }
 0x69d   : > { %v7396_v53 = vpack.c.bf16 %v2247_v14, %v2239_v13  ;;  %v6118_v30 = vld [vmem:[#allocation4 + $0x4c4] ss:$16 sps:$4 sm:$0xff]   ;;  %v6116_v31 = vld [vmem:[#allocation4 + $0x4c0] ss:$16 sps:$4 sm:$0xff]   ;;  %v6119_v6 = vld [vmem:[#allocation4 + $0x4c8] ss:$16 sps:$4 sm:$0xff]  }
 0x69e   : > { %v6124_v32 = vld [vmem:[#allocation4 + $0x4e4] ss:$16 sps:$4 sm:$0xff]   ;;  %v6127_v7 = vld [vmem:[#allocation4 + $0x4ec] ss:$16 sps:$4 sm:$0xff]   ;;  %v6122_v34 = vld [vmem:[#allocation4 + $0x4e0] ss:$16 sps:$4 sm:$0xff]  }
 0x69f   : > { %3885 = vmatpush1.bf16.msra.mxu0 %v6074_v36  ;;  %4097 = vmatpush1.bf16.msra.mxu1 %v6077_v40  ;;  %v6125_v11 = vld [vmem:[#allocation4 + $0x4e8] ss:$16 sps:$4 sm:$0xff]   ;;  %v6130_v35 = vld [vmem:[#allocation4 + $0x504] ss:$16 sps:$4 sm:$0xff]   ;;  %v6133_v37 = vld [vmem:[#allocation4 + $0x50c] ss:$16 sps:$4 sm:$0xff]  }
 0x6a0   : > { %3907 = vmatprep.subr.bf16.mxu0 %v6082_v38  ;;  %4119 = vmatprep.subr.bf16.mxu1 %v6085_v9  ;;  %v6128_v48 = vld [vmem:[#allocation4 + $0x500] ss:$16 sps:$4 sm:$0xff]   ;;  %v6131_v41 = vld [vmem:[#allocation4 + $0x508] ss:$16 sps:$4 sm:$0xff]   ;;  %v6136_v57 = vld [vmem:[#allocation4 + $0x524] ss:$16 sps:$4 sm:$0xff]  }
 0x6a1   : > { %v6139_v58 = vld [vmem:[#allocation4 + $0x52c] ss:$16 sps:$4 sm:$0xff]   ;;  %v6134_v59 = vld [vmem:[#allocation4 + $0x520] ss:$16 sps:$4 sm:$0xff]   ;;  %v6137_v44 = vld [vmem:[#allocation4 + $0x528] ss:$16 sps:$4 sm:$0xff]  }
 0x6a2   : > { %3887 = vmatmul.mubr.bf16.vlgmr.msra.gmra.mrb[8].mxu0 %v7337_v46  ;;  %4099 = vmatmul.mubr.bf16.vlgmr.msra.gmra.mrb[40].mxu1 %v7337_v46  ;;  %v6103_v46 = vld [vmem:[#allocation4 + $0x46c] ss:$16 sps:$4 sm:$0xff]   ;;  %v6142_v60 = vld [vmem:[#allocation4 + $0x544] ss:$16 sps:$4 sm:$0xff]   ;;  %v6140_v0 = vld [vmem:[#allocation4 + $0x540] ss:$16 sps:$4 sm:$0xff]  }
 0x6a3   : > { %3896 = vmatprep.mubr.bf16.mxu0 %v7350_v25  ;;  %3908 = vmatpush1.bf16.msra.mxu0 %v6080_v2  ;;  %v6145_v61 = vld [vmem:[#allocation4 + $0x54c] ss:$16 sps:$4 sm:$0xff]   ;;  %v6143_v36 = vld [vmem:[#allocation4 + $0x548] ss:$16 sps:$4 sm:$0xff]   ;;  %v6148_v40 = vld [vmem:[#allocation4 + $0x564] ss:$16 sps:$4 sm:$0xff]  }
 0x6a4   : > { %4108 = vmatprep.mubr.bf16.mxu1 %v7350_v25  ;;  %4120 = vmatpush1.bf16.msra.mxu1 %v6083_v18  ;;  %v6098_v25 = vld [vmem:[#allocation4 + $0x460] ss:$16 sps:$4 sm:$0xff]   ;;  %v6151_v62 = vld [vmem:[#allocation4 + $0x56c] ss:$16 sps:$4 sm:$0xff]   ;;  %v6149_v38 = vld [vmem:[#allocation4 + $0x568] ss:$16 sps:$4 sm:$0xff]  }
 0x6a5   : > { %3909 = vmatprep.subr.bf16.mxu0 %v6088_v43  ;;  %4121 = vmatprep.subr.bf16.mxu1 %v6091_v12  ;;  %v6146_v8 = vld [vmem:[#allocation4 + $0x560] ss:$16 sps:$4 sm:$0xff]   ;;  %v6154_v9 = vld [vmem:[#allocation4 + $0x584] ss:$16 sps:$4 sm:$0xff]   ;;  %v6157_v13 = vld [vmem:[#allocation4 + $0x58c] ss:$16 sps:$4 sm:$0xff]  }
 0x6a6   : > { %v6152_v14 = vld [vmem:[#allocation4 + $0x580] ss:$16 sps:$4 sm:$0xff]   ;;  %v6155_v2 = vld [vmem:[#allocation4 + $0x588] ss:$16 sps:$4 sm:$0xff]   ;;  %v6160_v18 = vld [vmem:[#allocation4 + $0x5a4] ss:$16 sps:$4 sm:$0xff]  }
 0x6a7   : > { %3910 = vmatpush1.bf16.msra.mxu0 %v6086_v20  ;;  %v6163_v43 = vld [vmem:[#allocation4 + $0x5ac] ss:$16 sps:$4 sm:$0xff]   ;;  %v6158_v12 = vld [vmem:[#allocation4 + $0x5a0] ss:$16 sps:$4 sm:$0xff]   ;;  %v6161_v20 = vld [vmem:[#allocation4 + $0x5a8] ss:$16 sps:$4 sm:$0xff]  }
 0x6a8   : > { %4122 = vmatpush1.bf16.msra.mxu1 %v6089_v15  ;;  %3911 = vmatprep.subr.bf16.mxu0 %v6094_v21  ;;  %v6166_v15 = vld [vmem:[#allocation4 + $0x5c4] ss:$16 sps:$4 sm:$0xff]   ;;  %v6169_v21 = vld [vmem:[#allocation4 + $0x5cc] ss:$16 sps:$4 sm:$0xff]  }
 0x6a9   : > { %4123 = vmatprep.subr.bf16.mxu1 %v6097_v22  ;;  %v6164_v22 = vld [vmem:[#allocation4 + $0x5c0] ss:$16 sps:$4 sm:$0xff]  }
 0x6aa   : > { %3897 = vmatmul.mubr.bf16.gmra.mrb[12].mxu0 %v7348_v42  ;;  %4109 = vmatmul.mubr.bf16.gmra.mrb[44].mxu1 %v7348_v42  ;;  %v6115_v42 = vld [vmem:[#allocation4 + $0x4ac] ss:$16 sps:$4 sm:$0xff]  }
 0x6ab   : > { %3912 = vmatpush1.bf16.msra.mxu0 %v6092_v16  ;;  %3939 = vmatprep.mubr.bf16.mxu0 %v7292_v45  ;;  %v6167_v16 = vld [vmem:[#allocation4 + $0x5c8] ss:$16 sps:$4 sm:$0xff]  }
 0x6ac   : > { %4124 = vmatpush1.bf16.msra.mxu1 %v6095_v23  ;;  %4151 = vmatprep.mubr.bf16.mxu1 %v7292_v45  ;;  %v6121_v45 = vld [vmem:[#allocation4 + $0x4cc] ss:$16 sps:$4 sm:$0xff]   ;;  %v6172_v23 = vld [vmem:[#allocation4 + $0x5e4] ss:$16 sps:$4 sm:$0xff]  }
 0x6ad   : > { %3913 = vmatprep.subr.bf16.mxu0 %v6100_v24  ;;  %4125 = vmatprep.subr.bf16.mxu1 %v6103_v46  ;;  %v6175_v24 = vld [vmem:[#allocation4 + $0x5ec] ss:$16 sps:$4 sm:$0xff]   ;;  %v6170_v46 = vld [vmem:[#allocation4 + $0x5e0] ss:$16 sps:$4 sm:$0xff]  }
 0x6af   : > { %3914 = vmatpush1.bf16.msra.mxu0 %v6098_v25  ;;  %v6173_v25 = vld [vmem:[#allocation4 + $0x5e8] ss:$16 sps:$4 sm:$0xff]  }
 0x6b0   : > { %4126 = vmatpush1.bf16.msra.mxu1 %v6101_v1  ;;  %3915 = vmatprep.subr.bf16.mxu0 %v6106_v3  ;;  %v6178_v1 = vld [vmem:[#allocation4 + $0x604] ss:$16 sps:$4 sm:$0xff]   ;;  %v6181_v3 = vld [vmem:[#allocation4 + $0x60c] ss:$16 sps:$4 sm:$0xff]  }
 0x6b1   : > { %4127 = vmatprep.subr.bf16.mxu1 %v6109_v17  ;;  %v6176_v17 = vld [vmem:[#allocation4 + $0x600] ss:$16 sps:$4 sm:$0xff]  }
 0x6b3   : > { %3916 = vmatpush1.bf16.msra.mxu0 %v6104_v26  ;;  %v6179_v26 = vld [vmem:[#allocation4 + $0x608] ss:$16 sps:$4 sm:$0xff]  }
 0x6b4   : > { %4128 = vmatpush1.bf16.msra.mxu1 %v6107_v4  ;;  %3917 = vmatprep.subr.bf16.mxu0 %v6112_v27  ;;  %v6184_v4 = vld [vmem:[#allocation4 + $0x624] ss:$16 sps:$4 sm:$0xff]   ;;  %v6187_v27 = vld [vmem:[#allocation4 + $0x62c] ss:$16 sps:$4 sm:$0xff]  }
 0x6b5   : > { %4129 = vmatprep.subr.bf16.mxu1 %v6115_v42  ;;  %v6182_v42 = vld [vmem:[#allocation4 + $0x620] ss:$16 sps:$4 sm:$0xff]  }
 0x6b7   : > { %3918 = vmatpush1.bf16.msra.mxu0 %v6110_v28  ;;  %v6185_v28 = vld [vmem:[#allocation4 + $0x628] ss:$16 sps:$4 sm:$0xff]  }
 0x6b8   : > { %4130 = vmatpush1.bf16.msra.mxu1 %v6113_v29  ;;  %3919 = vmatprep.subr.bf16.mxu0 %v6118_v30  ;;  %v6190_v29 = vld [vmem:[#allocation4 + $0x644] ss:$16 sps:$4 sm:$0xff]   ;;  %v6193_v30 = vld [vmem:[#allocation4 + $0x64c] ss:$16 sps:$4 sm:$0xff]  }
 0x6b9   : > { %4131 = vmatprep.subr.bf16.mxu1 %v6121_v45  ;;  %v6188_v45 = vld [vmem:[#allocation4 + $0x640] ss:$16 sps:$4 sm:$0xff]  }
 0x6bb   : > { %3920 = vmatpush1.bf16.msra.mxu0 %v6116_v31  ;;  %v6191_v31 = vld [vmem:[#allocation4 + $0x648] ss:$16 sps:$4 sm:$0xff]  }
 0x6bc   : > { %4132 = vmatpush1.bf16.msra.mxu1 %v6119_v6  ;;  %3921 = vmatprep.subr.bf16.mxu0 %v6124_v32  ;;  %v6196_v6 = vld [vmem:[#allocation4 + $0x664] ss:$16 sps:$4 sm:$0xff]   ;;  %v6197_v32 = vld [vmem:[#allocation4 + $0x668] ss:$16 sps:$4 sm:$0xff]  }
 0x6bd   : > { %4133 = vmatprep.subr.bf16.mxu1 %v6127_v7  ;;  %v6202_v7 = vld [vmem:[#allocation4 + $0x684] ss:$16 sps:$4 sm:$0xff]  }
 0x6bf   : > { %3922 = vmatpush1.bf16.msra.mxu0 %v6122_v34  ;;  %v6205_v34 = vld [vmem:[#allocation4 + $0x68c] ss:$16 sps:$4 sm:$0xff]  }
 0x6c0   : > { %4134 = vmatpush1.bf16.msra.mxu1 %v6125_v11  ;;  %3923 = vmatprep.subr.bf16.mxu0 %v6130_v35  ;;  %v6200_v11 = vld [vmem:[#allocation4 + $0x680] ss:$16 sps:$4 sm:$0xff]   ;;  %v6203_v35 = vld [vmem:[#allocation4 + $0x688] ss:$16 sps:$4 sm:$0xff]  }
 0x6c1   : > { %4135 = vmatprep.subr.bf16.mxu1 %v6133_v37  ;;  %v6208_v37 = vld [vmem:[#allocation4 + $0x6a4] ss:$16 sps:$4 sm:$0xff]  }
 0x6c3   : > { %3924 = vmatpush1.bf16.msra.mxu0 %v6128_v48  ;;  %v6206_v48 = vld [vmem:[#allocation4 + $0x6a0] ss:$16 sps:$4 sm:$0xff]  }
 0x6c4   : > { %4136 = vmatpush1.bf16.msra.mxu1 %v6131_v41  ;;  %3925 = vmatprep.subr.bf16.mxu0 %v6136_v57  ;;  %v6214_v41 = vld [vmem:[#allocation4 + $0x6c4] ss:$16 sps:$4 sm:$0xff]   ;;  %v6217_v57 = vld [vmem:[#allocation4 + $0x6cc] ss:$16 sps:$4 sm:$0xff]  }
 0x6c5   : > { %4137 = vmatprep.subr.bf16.mxu1 %v6139_v58  ;;  %v6212_v58 = vld [vmem:[#allocation4 + $0x6c0] ss:$16 sps:$4 sm:$0xff]  }
 0x6c7   : > { %3926 = vmatpush1.bf16.msra.mxu0 %v6134_v59  ;;  %v6215_v59 = vld [vmem:[#allocation4 + $0x6c8] ss:$16 sps:$4 sm:$0xff]  }
 0x6c8   : > { %4138 = vmatpush1.bf16.msra.mxu1 %v6137_v44  ;;  %3927 = vmatprep.subr.bf16.mxu0 %v6142_v60  ;;  %v6220_v44 = vld [vmem:[#allocation4 + $0x6e4] ss:$16 sps:$4 sm:$0xff]   ;;  %v6223_v60 = vld [vmem:[#allocation4 + $0x6ec] ss:$16 sps:$4 sm:$0xff]  }
 0x6c9   : > { %4139 = vmatprep.subr.bf16.mxu1 %v6145_v61  ;;  %v6218_v61 = vld [vmem:[#allocation4 + $0x6e0] ss:$16 sps:$4 sm:$0xff]  }
 0x6cb   : > { %3928 = vmatpush1.bf16.msra.mxu0 %v6140_v0  ;;  %v6221_v0 = vld [vmem:[#allocation4 + $0x6e8] ss:$16 sps:$4 sm:$0xff]  }
 0x6cc   : > { %4140 = vmatpush1.bf16.msra.mxu1 %v6143_v36  ;;  %3929 = vmatprep.subr.bf16.mxu0 %v6148_v40  ;;  %v6226_v36 = vld [vmem:[#allocation4 + $0x704] ss:$16 sps:$4 sm:$0xff]   ;;  %v6229_v40 = vld [vmem:[#allocation4 + $0x70c] ss:$16 sps:$4 sm:$0xff]  }
 0x6cd   : > { %4141 = vmatprep.subr.bf16.mxu1 %v6151_v62  ;;  %v6224_v62 = vld [vmem:[#allocation4 + $0x700] ss:$16 sps:$4 sm:$0xff]  }
 0x6cf   : > { %3930 = vmatpush1.bf16.msra.mxu0 %v6146_v8  ;;  %v6227_v8 = vld [vmem:[#allocation4 + $0x708] ss:$16 sps:$4 sm:$0xff]  }
 0x6d0   : > { %4142 = vmatpush1.bf16.msra.mxu1 %v6149_v38  ;;  %3931 = vmatprep.subr.bf16.mxu0 %v6154_v9  ;;  %v6232_v38 = vld [vmem:[#allocation4 + $0x724] ss:$16 sps:$4 sm:$0xff]   ;;  %v6235_v9 = vld [vmem:[#allocation4 + $0x72c] ss:$16 sps:$4 sm:$0xff]  }
 0x6d1   : > { %4143 = vmatprep.subr.bf16.mxu1 %v6157_v13  ;;  %v6230_v13 = vld [vmem:[#allocation4 + $0x720] ss:$16 sps:$4 sm:$0xff]  }
 0x6d3   : > { %3932 = vmatpush1.bf16.msra.mxu0 %v6152_v14  ;;  %v6233_v14 = vld [vmem:[#allocation4 + $0x728] ss:$16 sps:$4 sm:$0xff]  }
 0x6d4   : > { %4144 = vmatpush1.bf16.msra.mxu1 %v6155_v2  ;;  %3933 = vmatprep.subr.bf16.mxu0 %v6160_v18  ;;  %v6238_v2 = vld [vmem:[#allocation4 + $0x744] ss:$16 sps:$4 sm:$0xff]   ;;  %v6241_v18 = vld [vmem:[#allocation4 + $0x74c] ss:$16 sps:$4 sm:$0xff]  }
 0x6d5   : > { %4145 = vmatprep.subr.bf16.mxu1 %v6163_v43  ;;  %v6236_v43 = vld [vmem:[#allocation4 + $0x740] ss:$16 sps:$4 sm:$0xff]  }
 0x6d7   : > { %3934 = vmatpush1.bf16.msra.mxu0 %v6158_v12  ;;  %v6239_v12 = vld [vmem:[#allocation4 + $0x748] ss:$16 sps:$4 sm:$0xff]  }
 0x6d8   : > { %4146 = vmatpush1.bf16.msra.mxu1 %v6161_v20  ;;  %3935 = vmatprep.subr.bf16.mxu0 %v6166_v15  ;;  %v6244_v20 = vld [vmem:[#allocation4 + $0x764] ss:$16 sps:$4 sm:$0xff]   ;;  %v6247_v15 = vld [vmem:[#allocation4 + $0x76c] ss:$16 sps:$4 sm:$0xff]  }
 0x6d9   : > { %4147 = vmatprep.subr.bf16.mxu1 %v6169_v21  ;;  %v6242_v21 = vld [vmem:[#allocation4 + $0x760] ss:$16 sps:$4 sm:$0xff]  }
 0x6db   : > { %3936 = vmatpush1.bf16.msra.mxu0 %v6164_v22  ;;  %v6245_v22 = vld [vmem:[#allocation4 + $0x768] ss:$16 sps:$4 sm:$0xff]  }
 0x6dc   : > { %4148 = vmatpush1.bf16.msra.mxu1 %v6167_v16  ;;  %3937 = vmatprep.subr.bf16.mxu0 %v6172_v23  ;;  %v6250_v16 = vld [vmem:[#allocation4 + $0x784] ss:$16 sps:$4 sm:$0xff]   ;;  %v6253_v23 = vld [vmem:[#allocation4 + $0x78c] ss:$16 sps:$4 sm:$0xff]  }
 0x6dd   : > { %4149 = vmatprep.subr.bf16.mxu1 %v6175_v24  ;;  %v6248_v24 = vld [vmem:[#allocation4 + $0x780] ss:$16 sps:$4 sm:$0xff]  }
 0x6df   : > { %3938 = vmatpush1.bf16.msra.mxu0 %v6170_v46  ;;  %v6251_v46 = vld [vmem:[#allocation4 + $0x788] ss:$16 sps:$4 sm:$0xff]  }
 0x6e0   : > { %4150 = vmatpush1.bf16.msra.mxu1 %v6173_v25  ;;  %3960 = vmatprep.subr.bf16.mxu0 %v6178_v1  ;;  %v6256_v25 = vld [vmem:[#allocation4 + $0x7a4] ss:$16 sps:$4 sm:$0xff]   ;;  %v6259_v1 = vld [vmem:[#allocation4 + $0x7ac] ss:$16 sps:$4 sm:$0xff]  }
 0x6e1   : > { %4172 = vmatprep.subr.bf16.mxu1 %v6181_v3  ;;  %v6254_v3 = vld [vmem:[#allocation4 + $0x7a0] ss:$16 sps:$4 sm:$0xff]  }
 0x6e2   : > { %3940 = vmatmul.mubr.bf16.vlgmr.msra.gmra.mrb[8].mxu0 %v7274_v63 }
 0x6e3   : > { %4152 = vmatmul.mubr.bf16.vlgmr.msra.gmra.mrb[40].mxu1 %v7274_v63  ;;  %3949 = vmatprep.mubr.bf16.mxu0 %v7299_v39  ;;  %v6199_v63 = vld [vmem:[#allocation4 + $0x66c] ss:$16 sps:$4 sm:$0xff]  }
 0x6e4   : > { %3961 = vmatpush1.bf16.msra.mxu0 %v6176_v17  ;;  %4161 = vmatprep.mubr.bf16.mxu1 %v7299_v39  ;;  %v6194_v39 = vld [vmem:[#allocation4 + $0x660] ss:$16 sps:$4 sm:$0xff]   ;;  %v6257_v17 = vld [vmem:[#allocation4 + $0x7a8] ss:$16 sps:$4 sm:$0xff]  }
 0x6e5   : > { %4173 = vmatpush1.bf16.msra.mxu1 %v6179_v26  ;;  %3962 = vmatprep.subr.bf16.mxu0 %v6184_v4  ;;  %v6262_v26 = vld [vmem:[#allocation4 + $0x7c4] ss:$16 sps:$4 sm:$0xff]   ;;  %v6265_v4 = vld [vmem:[#allocation4 + $0x7cc] ss:$16 sps:$4 sm:$0xff]  }
 0x6e6   : > { %4174 = vmatprep.subr.bf16.mxu1 %v6187_v27  ;;  %v6260_v27 = vld [vmem:[#allocation4 + $0x7c0] ss:$16 sps:$4 sm:$0xff]  }
 0x6e8   : > { %3963 = vmatpush1.bf16.msra.mxu0 %v6182_v42  ;;  %v6263_v42 = vld [vmem:[#allocation4 + $0x7c8] ss:$16 sps:$4 sm:$0xff]  }
 0x6e9   : > { %4175 = vmatpush1.bf16.msra.mxu1 %v6185_v28  ;;  %3964 = vmatprep.subr.bf16.mxu0 %v6190_v29  ;;  %v6268_v28 = vld [vmem:[#allocation4 + $0x7e4] ss:$16 sps:$4 sm:$0xff]   ;;  %v6271_v29 = vld [vmem:[#allocation4 + $0x7ec] ss:$16 sps:$4 sm:$0xff]  }
 0x6ea   : > { %3950 = vmatmul.mubr.bf16.gmra.mrb[12].mxu0 %v7305_v51  ;;  %4176 = vmatprep.subr.bf16.mxu1 %v6193_v30  ;;  %v6266_v30 = vld [vmem:[#allocation4 + $0x7e0] ss:$16 sps:$4 sm:$0xff]  }
 0x6eb   : > { %4162 = vmatmul.mubr.bf16.gmra.mrb[44].mxu1 %v7305_v51  ;;  %3992 = vmatprep.mubr.bf16.mxu0 %v7388_v10  ;;  %v6211_v51 = vld [vmem:[#allocation4 + $0x6ac] ss:$16 sps:$4 sm:$0xff]  }
 0x6ec   : > { %3965 = vmatpush1.bf16.msra.mxu0 %v6188_v45  ;;  %4204 = vmatprep.mubr.bf16.mxu1 %v7388_v10  ;;  %v6209_v10 = vld [vmem:[#allocation4 + $0x6a8] ss:$16 sps:$4 sm:$0xff]  }
 0x6ed   : > { %4177 = vmatpush1.bf16.msra.mxu1 %v6191_v31  ;;  %3966 = vmatprep.subr.bf16.mxu0 %v6196_v6  ;;  %v6269_v45 = vld [vmem:[#allocation4 + $0x7e8] ss:$16 sps:$4 sm:$0xff]   ;;  %v6274_v31 = vld [vmem:[#allocation6 + $0x4] ss:$8 sps:$4 sm:$0xff]  }
 0x6ee   : > { %4178 = vmatprep.subr.bf16.mxu1 %v6199_v63  ;;  %v6272_v6 = vld [vmem:[#allocation6] ss:$8 sps:$4 sm:$0xff]   ;;  %v6277_v63 = vld [vmem:[#allocation6 + $0x14] ss:$8 sps:$4 sm:$0xff]  }
 0x6f0   : > { %3967 = vmatpush1.bf16.msra.mxu0 %v6194_v39  ;;  %v6275_v39 = vld [vmem:[#allocation6 + $0x10] ss:$8 sps:$4 sm:$0xff]  }
 0x6f1   : > { %4179 = vmatpush1.bf16.msra.mxu1 %v6197_v32  ;;  %3968 = vmatprep.subr.bf16.mxu0 %v6202_v7  ;;  %v6280_v32 = vld [vmem:[#allocation6 + $0x24] ss:$8 sps:$4 sm:$0xff]   ;;  %v6278_v7 = vld [vmem:[#allocation6 + $0x20] ss:$8 sps:$4 sm:$0xff]  }
 0x6f2   : > { %4180 = vmatprep.subr.bf16.mxu1 %v6205_v34  ;;  %v6283_v34 = vld [vmem:[#allocation6 + $0x34] ss:$8 sps:$4 sm:$0xff]  }
 0x6f4   : > { %3969 = vmatpush1.bf16.msra.mxu0 %v6200_v11  ;;  %v6281_v11 = vld [vmem:[#allocation6 + $0x30] ss:$8 sps:$4 sm:$0xff]  }
 0x6f5   : > { %4181 = vmatpush1.bf16.msra.mxu1 %v6203_v35  ;;  %3970 = vmatprep.subr.bf16.mxu0 %v6208_v37  ;;  %v6284_v35 = vld [vmem:[#allocation6 + $0x40] ss:$8 sps:$4 sm:$0xff]   ;;  %v6287_v37 = vld [vmem:[#allocation6 + $0x50] ss:$8 sps:$4 sm:$0xff]  }
 0x6f6   : > { %4182 = vmatprep.subr.bf16.mxu1 %v6211_v51  ;;  %v6292_v51 = vld [vmem:[#allocation6 + $0x64] ss:$8 sps:$4 sm:$0xff]  }
 0x6f8   : > { %3971 = vmatpush1.bf16.msra.mxu0 %v6206_v48  ;;  %v6290_v48 = vld [vmem:[#allocation6 + $0x60] ss:$8 sps:$4 sm:$0xff]  }
 0x6f9   : > { %4183 = vmatpush1.bf16.msra.mxu1 %v6209_v10  ;;  %3972 = vmatprep.subr.bf16.mxu0 %v6214_v41  ;;  %v6295_v10 = vld [vmem:[#allocation6 + $0x74] ss:$8 sps:$4 sm:$0xff]   ;;  %v6293_v41 = vld [vmem:[#allocation6 + $0x70] ss:$8 sps:$4 sm:$0xff]  }
 0x6fa   : > { %4184 = vmatprep.subr.bf16.mxu1 %v6217_v57  ;;  %v6296_v57 = vld [vmem:[#allocation6 + $0x80] ss:$8 sps:$4 sm:$0xff]  }
 0x6fc   : > { %3973 = vmatpush1.bf16.msra.mxu0 %v6212_v58  ;;  %v6301_v58 = vld [vmem:[#allocation6 + $0x94] ss:$8 sps:$4 sm:$0xff]  }
 0x6fd   : > { %4185 = vmatpush1.bf16.msra.mxu1 %v6215_v59  ;;  %3974 = vmatprep.subr.bf16.mxu0 %v6220_v44  ;;  %v6299_v59 = vld [vmem:[#allocation6 + $0x90] ss:$8 sps:$4 sm:$0xff]   ;;  %v6304_v44 = vld [vmem:[#allocation6 + $0xa4] ss:$8 sps:$4 sm:$0xff]  }
 0x6fe   : > { %4186 = vmatprep.subr.bf16.mxu1 %v6223_v60  ;;  %v6302_v60 = vld [vmem:[#allocation6 + $0xa0] ss:$8 sps:$4 sm:$0xff]  }
 0x700   : > { %3975 = vmatpush1.bf16.msra.mxu0 %v6218_v61  ;;  %v6307_v61 = vld [vmem:[#allocation6 + $0xb4] ss:$8 sps:$4 sm:$0xff]  }
 0x701   : > { %4187 = vmatpush1.bf16.msra.mxu1 %v6221_v0  ;;  %3976 = vmatprep.subr.bf16.mxu0 %v6226_v36  ;;  %v6305_v0 = vld [vmem:[#allocation6 + $0xb0] ss:$8 sps:$4 sm:$0xff]   ;;  %v6310_v36 = vld [vmem:[#allocation6 + $0xc4] ss:$8 sps:$4 sm:$0xff]  }
 0x702   : > { %4188 = vmatprep.subr.bf16.mxu1 %v6229_v40  ;;  %v6308_v40 = vld [vmem:[#allocation6 + $0xc0] ss:$8 sps:$4 sm:$0xff]  }
 0x704   : > { %3977 = vmatpush1.bf16.msra.mxu0 %v6224_v62  ;;  %v6313_v62 = vld [vmem:[#allocation6 + $0xd4] ss:$8 sps:$4 sm:$0xff]  }
 0x705   : > { %4189 = vmatpush1.bf16.msra.mxu1 %v6227_v8  ;;  %3978 = vmatprep.subr.bf16.mxu0 %v6232_v38  ;;  %v6311_v8 = vld [vmem:[#allocation6 + $0xd0] ss:$8 sps:$4 sm:$0xff]   ;;  %v6316_v38 = vld [vmem:[#allocation6 + $0xe4] ss:$8 sps:$4 sm:$0xff]  }
 0x706   : > { %4190 = vmatprep.subr.bf16.mxu1 %v6235_v9  ;;  %v6314_v9 = vld [vmem:[#allocation6 + $0xe0] ss:$8 sps:$4 sm:$0xff]  }
 0x708   : > { %3979 = vmatpush1.bf16.msra.mxu0 %v6230_v13  ;;  %v6319_v13 = vld [vmem:[#allocation6 + $0xf4] ss:$8 sps:$4 sm:$0xff]  }
 0x709   : > { %4191 = vmatpush1.bf16.msra.mxu1 %v6233_v14  ;;  %3980 = vmatprep.subr.bf16.mxu0 %v6238_v2  ;;  %v6317_v14 = vld [vmem:[#allocation6 + $0xf0] ss:$8 sps:$4 sm:$0xff]   ;;  %v6322_v2 = vld [vmem:[#allocation6 + $0x104] ss:$8 sps:$4 sm:$0xff]  }
 0x70a   : > { %4192 = vmatprep.subr.bf16.mxu1 %v6241_v18  ;;  %v6368_v18 = vld [vmem:[#allocation7 + $0x40] sm:$0xff]  }
 0x70c   : > { %3981 = vmatpush1.bf16.msra.mxu0 %v6236_v43  ;;  %v6369_v43 = vld [vmem:[#allocation7] sm:$0xff]  }
 0x70d   : > { %4193 = vmatpush1.bf16.msra.mxu1 %v6239_v12  ;;  %3982 = vmatprep.subr.bf16.mxu0 %v6244_v20  ;;  %v6370_v12 = vld [vmem:[#allocation7 + $0x48] sm:$0xff]  }
 0x70e   : > { %4194 = vmatprep.subr.bf16.mxu1 %v6247_v15  ;;  %v6371_v20 = vld [vmem:[#allocation7 + $0x8] sm:$0xff]   ;;  %v6372_v15 = vld [vmem:[#allocation7 + $0x50] sm:$0xff]  }
 0x710   : > { %3983 = vmatpush1.bf16.msra.mxu0 %v6242_v21  ;;  %v6373_v21 = vld [vmem:[#allocation7 + $0x10] sm:$0xff]  }
 0x711   : > { %4195 = vmatpush1.bf16.msra.mxu1 %v6245_v22  ;;  %3984 = vmatprep.subr.bf16.mxu0 %v6250_v16  ;;  %v6374_v22 = vld [vmem:[#allocation7 + $0x58] sm:$0xff]  }
 0x712   : > { %4196 = vmatprep.subr.bf16.mxu1 %v6253_v23  ;;  %v6375_v16 = vld [vmem:[#allocation7 + $0x18] sm:$0xff]   ;;  %v6376_v23 = vld [vmem:[#allocation7 + $0x60] sm:$0xff]  }
 0x714   : > { %3985 = vmatpush1.bf16.msra.mxu0 %v6248_v24  ;;  %v6377_v24 = vld [vmem:[#allocation7 + $0x20] sm:$0xff]  }
 0x715   : > { %4197 = vmatpush1.bf16.msra.mxu1 %v6251_v46  ;;  %3986 = vmatprep.subr.bf16.mxu0 %v6256_v25  ;;  %v2264_v46 = vld [vmem:[%s7558_s7] sm:$0xff] }
 0x716   : > { %4198 = vmatprep.subr.bf16.mxu1 %v6259_v1  ;;  %v4229_v25 = vrot.slane %v2264_v46, %v7155_v55  ;;  %v4237_v1 = vrot.slane %v2264_v46, %v7255_v19 }
 0x718   : > { %3987 = vmatpush1.bf16.msra.mxu0 %v6254_v3  ;;  %v4233_v3 = vrot.slane %v2264_v46, %v7205_v54 }
 0x719   : > { %4199 = vmatpush1.bf16.msra.mxu1 %v6257_v17  ;;  %3988 = vmatprep.subr.bf16.mxu0 %v6262_v26  ;;  %v4281_v17 = vrot.slane %v2264_v46, %v7168_v33  ;;  %v4241_v26 = vrot.slane %v2264_v46, %v7258_v47 }
 0x71a   : > { %4200 = vmatprep.subr.bf16.mxu1 %v6265_v4  ;;  %v4289_v4 = vrot.slane %v2264_v46, %v7297_v49  ;;  %v7438_v19 = vrot.slane %v4233_v3, %v7155_v55 }
 0x71b   : > { %v7444_v47 = vrot.slane %v4241_v26, %v7155_v55 }
 0x71c   : > { %3989 = vmatpush1.bf16.msra.mxu0 %v6260_v27  ;;  %v4285_v27 = vrot.slane %v2264_v46, %v7208_v56 }
 0x71d   : > { %4201 = vmatpush1.bf16.msra.mxu1 %v6263_v42  ;;  %3990 = vmatprep.subr.bf16.mxu0 %v6268_v28  ;;  %v7431_v42 = vrot.slane %v4229_v25, %v7155_v55  ;;  %v4293_v28 = vrot.slane %v2264_v46, %v7303_v50 }
 0x71e   : > { %4202 = vmatprep.subr.bf16.mxu1 %v6271_v29  ;;  %v7435_v29 = vrot.slane %v4237_v1, %v7155_v55 }
 0x720   : > { %3991 = vmatpush1.bf16.msra.mxu0 %v6266_v30  ;;  %v7441_v30 = vrot.slane %v4281_v17, %v7168_v33 }
 0x721   : > { %4203 = vmatpush1.bf16.msra.mxu1 %v6269_v45  ;;  %4771 = vmatprep.subr.bf16.mxu0 %v6274_v31  ;;  %v7447_v45 = vrot.slane %v4289_v4, %v7168_v33  ;;  %v7450_v31 = vrot.slane %v4285_v27, %v7168_v33 }
 0x722   : > { %5713 = vmatprep.subr.bf16.mxu1 %v6368_v18 }
 0x723   : > { %3993 = vmatmul.mubr.bf16.vlgmr.msra.gmra.mrb[8].mxu0 %v7382_v5 }
 0x724   : > { %4205 = vmatmul.mubr.bf16.vlgmr.msra.gmra.mrb[40].mxu1 %v7382_v5  ;;  %4002 = vmatprep.mubr.bf16.mxu0 %v7396_v53  ;;  %v6286_v5 = vld [vmem:[#allocation6 + $0x44] ss:$8 sps:$4 sm:$0xff]  }
 0x725   : > { %4214 = vmatprep.mubr.bf16.mxu1 %v7396_v53  ;;  %4772 = vmatpush1.bf16.msra.mxu0 %v6272_v6  ;;  %v6289_v53 = vld [vmem:[#allocation6 + $0x54] ss:$8 sps:$4 sm:$0xff]  }
 0x726   : > { %4773 = vmatprep.subr.bf16.mxu0 %v6277_v63  ;;  %5714 = vmatpush3.bf16.msra.mxu1 %v6369_v43 }
 0x727   : > { %5715 = vmatprep.subr.bf16.mxu1 %v6370_v12 }
 0x729   : > { %4774 = vmatpush1.bf16.msra.mxu0 %v6275_v39  ;;  %v7454_v39 = vrot.slane %v4293_v28, %v7168_v33 }
 0x72a   : > { %4775 = vmatprep.subr.bf16.mxu0 %v6280_v32  ;;  %5716 = vmatpush3.bf16.msra.mxu1 %v6371_v20 }
 0x72b   : > { %4003 = vmatmul.mubr.bf16.gmra.mrb[12].mxu0 %v7394_v52  ;;  %5717 = vmatprep.subr.bf16.mxu1 %v6372_v15 }
 0x72c   : > { %4215 = vmatmul.mubr.bf16.gmra.mrb[44].mxu1 %v7394_v52  ;;  %v6298_v52 = vld [vmem:[#allocation6 + $0x84] ss:$8 sps:$4 sm:$0xff]  }
 0x72d   : > { %4776 = vmatpush1.bf16.msra.mxu0 %v6278_v7 }
 0x72e   : > { %4777 = vmatprep.subr.bf16.mxu0 %v6283_v34  ;;  %5718 = vmatpush3.bf16.msra.mxu1 %v6373_v21 }
 0x72f   : > { %5719 = vmatprep.subr.bf16.mxu1 %v6374_v22 }
 0x731   : > { %4778 = vmatpush1.bf16.msra.mxu0 %v6281_v11 }
 0x732   : > { %4779 = vmatprep.subr.bf16.mxu0 %v6286_v5  ;;  %5720 = vmatpush3.bf16.msra.mxu1 %v6375_v16 }
 0x733   : > { %5721 = vmatprep.subr.bf16.mxu1 %v6376_v23 }
 0x735   : > { %4780 = vmatpush1.bf16.msra.mxu0 %v6284_v35 }
 0x736   : > { %4781 = vmatprep.subr.bf16.mxu0 %v6289_v53  ;;  %5722 = vmatpush3.bf16.msra.mxu1 %v6377_v24 }
 0x739   : > { %4782 = vmatpush1.bf16.msra.mxu0 %v6287_v37 }
 0x73a   : > { %4783 = vmatprep.subr.bf16.mxu0 %v6292_v51 }
 0x73d   : > { %4784 = vmatpush1.bf16.msra.mxu0 %v6290_v48 }
 0x73e   : > { %4785 = vmatprep.subr.bf16.mxu0 %v6295_v10 }
 0x741   : > { %4786 = vmatpush1.bf16.msra.mxu0 %v6293_v41 }
 0x742   : > { %4787 = vmatprep.subr.bf16.mxu0 %v6298_v52 }
 0x745   : > { %4788 = vmatpush1.bf16.msra.mxu0 %v6296_v57 }
 0x746   : > { %4789 = vmatprep.subr.bf16.mxu0 %v6301_v58 }
 0x749   : > { %4790 = vmatpush1.bf16.msra.mxu0 %v6299_v59 }
 0x74a   : > { %4791 = vmatprep.subr.bf16.mxu0 %v6304_v44 }
 0x74d   : > { %4792 = vmatpush1.bf16.msra.mxu0 %v6302_v60 }
 0x74e   : > { %4793 = vmatprep.subr.bf16.mxu0 %v6307_v61 }
 0x751   : > { %4794 = vmatpush1.bf16.msra.mxu0 %v6305_v0 }
 0x752   : > { %4795 = vmatprep.subr.bf16.mxu0 %v6310_v36 }
 0x755   : > { %4796 = vmatpush1.bf16.msra.mxu0 %v6308_v40 }
 0x756   : > { %4797 = vmatprep.subr.bf16.mxu0 %v6313_v62 }
 0x759   : > { %4798 = vmatpush1.bf16.msra.mxu0 %v6311_v8 }
 0x75a   : > { %4799 = vmatprep.subr.bf16.mxu0 %v6316_v38 }
 0x75d   : > { %4800 = vmatpush1.bf16.msra.mxu0 %v6314_v9 }
 0x75e   : > { %4801 = vmatprep.subr.bf16.mxu0 %v6319_v13 }
 0x761   : > { %4802 = vmatpush1.bf16.msra.mxu0 %v6317_v14 }
 0x762   : > { %4824 = vmatprep.subr.bf16.mxu0 %v6322_v2 }
 0x7f6   : > { %v3994_v49 = vpop.f32.mrb[8].mxu0 }
 0x7f7   : > { %v4262_v50 = vmul.f32 %v7431_v42, %v3994_v49  ;;  %v4206_v6 = vpop.f32.mrb[40].mxu1  ;;  %v3996_v63 = vpop.f32.mrb[9].mxu0 }
 0x7f8   : > { %v4264_v32 = vmul.f32 %v7435_v29, %v4206_v6  ;;  %v4263_v7 = vmul.f32 %v7438_v19, %v3996_v63  ;;  %v4208_v34 = vpop.f32.mrb[41].mxu1  ;;  %v3998_v11 = vpop.f32.mrb[10].mxu0 }
 0x7f9   : > { %v4314_v5 = vadd.f32 %v7441_v30, %v4262_v50  ;;  %v4265_v35 = vmul.f32 %v7444_v47, %v4208_v34  ;;  %v4266_v53 = vmul.f32 %v7431_v42, %v3998_v11  ;;  %v4210_v37 = vpop.f32.mrb[42].mxu1  ;;  %v4000_v51 = vpop.f32.mrb[11].mxu0 }
 0x7fa   : > { %v4316_v48 = vadd.f32 %v7447_v45, %v4264_v32  ;;  %v4315_v10 = vadd.f32 %v7450_v31, %v4263_v7  ;;  %v4268_v41 = vmul.f32 %v7435_v29, %v4210_v37  ;;  %v4267_v52 = vmul.f32 %v7438_v19, %v4000_v51  ;;  %v4212_v57 = vpop.f32.mrb[43].mxu1 }
 0x7fb   : > { %vm4330_vm2 = vcmp.gt.f32.partialorder %v4314_v5, 0.0  ;;  %v4346_v58 = vmul.f32 0.2, %v4314_v5  ;;  %v4317_v59 = vadd.f32 %v7454_v39, %v4265_v35  ;;  %v4318_v44 = vadd.f32 %v7441_v30, %v4266_v53 }
 0x7fc   : > { %vm4332_vm9 = vcmp.gt.f32.partialorder %v4316_v48, 0.0  ;;  %v4348_v60 = vmul.f32 0.2, %v4316_v48  ;;  %vm4331_vm0 = vcmp.gt.f32.partialorder %v4315_v10, 0.0  ;;  %v4347_v61 = vmul.f32 0.2, %v4315_v10 }
 0x7fd   : > { %v7467_v0 = vsel %vm4330_vm2, %v4314_v5, %v4346_v58  ;;  %vm4333_vm10 = vcmp.gt.f32.partialorder %v4317_v59, 0.0  ;;  %v4349_v36 = vmul.f32 0.2, %v4317_v59  ;;  %vm4334_vm14 = vcmp.gt.f32.partialorder %v4318_v44, 0.0 }
 0x7fe   : > { %v7469_v40 = vsel %vm4332_vm9, %v4316_v48, %v4348_v60  ;;  %v4350_v62 = vmul.f32 0.2, %v4318_v44  ;;  %v4320_v8 = vadd.f32 %v7447_v45, %v4268_v41  ;;  %v4319_v38 = vadd.f32 %v7450_v31, %v4267_v52  ;;  %v4004_v9 = vpop.f32.mrb[12].mxu0 }
 0x7ff   : > { %v4269_v13 = vmul.f32 %v7444_v47, %v4212_v57  ;;  %v4270_v14 = vmul.f32 %v7431_v42, %v4004_v9  ;;  %v4216_v2 = vpop.f32.mrb[44].mxu1  ;;  %v4006_v18 = vpop.f32.mrb[13].mxu0  ;;  %v4363_v43 = vsel %vm4331_vm0, %v4315_v10, %v4347_v61  ;;  %v7475_v12 = vsel %vm4333_vm10, %v4317_v59, %v4349_v36  ;;  %v6320_v59 = vld [vmem:[#allocation6 + $0x100] ss:$8 sps:$4 sm:$0xff]  }
 0x800   : > { %v7477_v20 = vsel %vm4334_vm14, %v4318_v44, %v4350_v62  ;;  %vm4336_vm1 = vcmp.gt.f32.partialorder %v4320_v8, 0.0  ;;  %v4352_v15 = vmul.f32 0.2, %v4320_v8  ;;  %vm4335_vm4 = vcmp.gt.f32.partialorder %v4319_v38, 0.0  ;;  %v4218_v21 = vpop.f32.mrb[45].mxu1  ;;  %v4008_v22 = vpop.f32.mrb[14].mxu0 }
 0x801   : > { %v4378_v16 = vpack.c.bf16 %v7477_v20, %v7467_v0  ;;  %v4351_v23 = vmul.f32 0.2, %v4319_v38  ;;  %v4321_v24 = vadd.f32 %v7454_v39, %v4269_v13  ;;  %v4322_v46 = vadd.f32 %v7441_v30, %v4270_v14  ;;  %v4220_v25 = vpop.f32.mrb[46].mxu1  ;;  %v4010_v1 = vpop.f32.mrb[15].mxu0  ;;  %v6325_v44 = vld [vmem:[#allocation6 + $0x114] ss:$8 sps:$4 sm:$0xff]  }
 0x802   : > { %v7483_v3 = vsel %vm4336_vm1, %v4320_v8, %v4352_v15  ;;  %v4272_v17 = vmul.f32 %v7435_v29, %v4216_v2  ;;  %v4271_v26 = vmul.f32 %v7438_v19, %v4006_v18  ;;  %v4273_v4 = vmul.f32 %v7444_v47, %v4218_v21  ;;  %v4222_v27 = vpop.f32.mrb[47].mxu1  ;;  %v6323_v14 = vld [vmem:[#allocation6 + $0x110] ss:$8 sps:$4 sm:$0xff]   ;;  %v6328_v2 = vld [vmem:[#allocation6 + $0x124] ss:$8 sps:$4 sm:$0xff]  }
 0x803   : > { %v4380_v28 = vpack.c.bf16 %v7483_v3, %v7469_v40  ;;  %vm4337_vm8 = vcmp.gt.f32.partialorder %v4321_v24, 0.0  ;;  %v4353_v49 = vmul.f32 0.2, %v4321_v24  ;;  %vm4338_vm15 = vcmp.gt.f32.partialorder %v4322_v46, 0.0  ;;  %v6326_v18 = vld [vmem:[#allocation6 + $0x120] ss:$8 sps:$4 sm:$0xff]  }
 0x804   : > { %v4354_v50 = vmul.f32 0.2, %v4322_v46  ;;  %v4324_v6 = vadd.f32 %v7447_v45, %v4272_v17  ;;  %v4323_v63 = vadd.f32 %v7450_v31, %v4271_v26  ;;  %v4325_v32 = vadd.f32 %v7454_v39, %v4273_v4  ;;  %v6334_v20 = vld [vmem:[#allocation6 + $0x144] ss:$8 sps:$4 sm:$0xff]   ;;  %v6332_v15 = vld [vmem:[#allocation6 + $0x140] ss:$8 sps:$4 sm:$0xff]  }
 0x805   : > { %v4274_v7 = vmul.f32 %v7431_v42, %v4008_v22  ;;  %v4276_v34 = vmul.f32 %v7435_v29, %v4220_v25  ;;  %v4275_v11 = vmul.f32 %v7438_v19, %v4010_v1  ;;  %v4277_v5 = vmul.f32 %v7444_v47, %v4222_v27  ;;  %v6337_v21 = vld [vmem:[#allocation6 + $0x154] ss:$8 sps:$4 sm:$0xff]   ;;  %v6335_v22 = vld [vmem:[#allocation6 + $0x150] ss:$8 sps:$4 sm:$0xff]   ;;  %v6346_v25 = vld [vmem:[#allocation6 + $0x184] ss:$8 sps:$4 sm:$0xff]  }
 0x806   : > { %vm4340_vm12 = vcmp.gt.f32.partialorder %v4324_v6, 0.0  ;;  %v4356_v35 = vmul.f32 0.2, %v4324_v6  ;;  %vm4339_vm13 = vcmp.gt.f32.partialorder %v4323_v63, 0.0  ;;  %v4355_v53 = vmul.f32 0.2, %v4323_v63 }
 0x807   : > { %vm4341_vm5 = vcmp.gt.f32.partialorder %v4325_v32, 0.0  ;;  %v4357_v37 = vmul.f32 0.2, %v4325_v32  ;;  %v4326_v51 = vadd.f32 %v7441_v30, %v4274_v7  ;;  %v4328_v48 = vadd.f32 %v7447_v45, %v4276_v34  ;;  %v6344_v1 = vld [vmem:[#allocation6 + $0x180] ss:$8 sps:$4 sm:$0xff]  }
 0x808   : > { %v4327_v10 = vadd.f32 %v7450_v31, %v4275_v11  ;;  %v4329_v42 = vadd.f32 %v7454_v39, %v4277_v5  ;;  %v4367_v29 = vsel %vm4335_vm4, %v4319_v38, %v4351_v23  ;;  %v4371_v41 = vsel %vm4339_vm13, %v4323_v63, %v4355_v53  ;;  %v6338_v23 = vld [vmem:[#allocation6 + $0x160] ss:$8 sps:$4 sm:$0xff]   ;;  %v6349_v17 = vld [vmem:[#allocation6 + $0x194] ss:$8 sps:$4 sm:$0xff]   ;;  %v6347_v26 = vld [vmem:[#allocation6 + $0x190] ss:$8 sps:$4 sm:$0xff]  }
 0x809   : > { %vm4342_vm7 = vcmp.gt.f32.partialorder %v4326_v51, 0.0  ;;  %v4358_v19 = vmul.f32 0.2, %v4326_v51  ;;  %vm4344_vm6 = vcmp.gt.f32.partialorder %v4328_v48, 0.0  ;;  %v4360_v47 = vmul.f32 0.2, %v4328_v48 }
 0x80a   : > { %vm4343_vm11 = vcmp.gt.f32.partialorder %v4327_v10, 0.0  ;;  %v4359_v52 = vmul.f32 0.2, %v4327_v10  ;;  %vm4345_vm3 = vcmp.gt.f32.partialorder %v4329_v42, 0.0  ;;  %v4361_v57 = vmul.f32 0.2, %v4329_v42 }
 0x80b   : > { %v4379_v58 = vpack.c.bf16 %v4367_v29, %v4363_v43  ;;  %v4370_v30 = vsel %vm4338_vm15, %v4322_v46, %v4354_v50  ;;  %v4374_v45 = vsel %vm4342_vm7, %v4326_v51, %v4358_v19  ;;  %v4369_v31 = vsel %vm4337_vm8, %v4321_v24, %v4353_v49  ;;  %v6331_v43 = vld [vmem:[#allocation6 + $0x134] ss:$8 sps:$4 sm:$0xff]   ;;  %v6341_v46 = vld [vmem:[#allocation6 + $0x170] ss:$8 sps:$4 sm:$0xff]   ;;  %v6352_v4 = vld [vmem:[#allocation6 + $0x1a4] ss:$8 sps:$4 sm:$0xff]  }
 0x80c   : > { %v4375_v39 = vsel %vm4343_vm11, %v4327_v10, %v4359_v52  ;;  %v4382_v60 = vpack.c.bf16 %v4374_v45, %v4370_v30  ;;  %v4381_v61 = vpack.c.bf16 %v4369_v31, %v7475_v12  ;;  %v7506_v0 = vsel %vm4341_vm5, %v4325_v32, %v4357_v37  ;;  %v6329_v12 = vld [vmem:[#allocation6 + $0x130] ss:$8 sps:$4 sm:$0xff]   ;;  %v6343_v24 = vld [vmem:[#allocation6 + $0x174] ss:$8 sps:$4 sm:$0xff]   ;;  %v6350_v27 = vld [vmem:[#allocation6 + $0x1a0] ss:$8 sps:$4 sm:$0xff]  }
 0x80d   : > { %4803 = vmatprep.mubr.bf16.mxu0 %v4379_v58  ;;  %v4383_v36 = vpack.c.bf16 %v4375_v39, %v4371_v41  ;;  %v7508_v62 = vsel %vm4345_vm3, %v4329_v42, %v4361_v57  ;;  %v7511_v8 = vsel %vm4340_vm12, %v4324_v6, %v4356_v35  ;;  %v7514_v38 = vsel %vm4344_vm6, %v4328_v48, %v4360_v47  ;;  %v6355_v49 = vld [vmem:[#allocation6 + $0x1b4] ss:$8 sps:$4 sm:$0xff]   ;;  %v6353_v50 = vld [vmem:[#allocation6 + $0x1b0] ss:$8 sps:$4 sm:$0xff]   ;;  %v6358_v6 = vld [vmem:[#allocation6 + $0x1c4] ss:$8 sps:$4 sm:$0xff]  }
 0x80e   : > { %4804 = vmatmul.mubr.bf16.vlgmr.msra.gmra.mrb[16].mxu0 %v4378_v16  ;;  %v4385_v9 = vpack.c.bf16 %v7508_v62, %v7506_v0  ;;  %v4384_v13 = vpack.c.bf16 %v7514_v38, %v7511_v8  ;;  %v6340_v16 = vld [vmem:[#allocation6 + $0x164] ss:$8 sps:$4 sm:$0xff]   ;;  %v6356_v63 = vld [vmem:[#allocation6 + $0x1c0] ss:$8 sps:$4 sm:$0xff]   ;;  %v6361_v32 = vld [vmem:[#allocation6 + $0x1d4] ss:$8 sps:$4 sm:$0xff]  }
 0x80f   : > { %4825 = vmatpush1.bf16.msra.mxu0 %v6320_v59  ;;  %4813 = vmatprep.mubr.bf16.mxu0 %v4383_v36  ;;  %v6359_v7 = vld [vmem:[#allocation6 + $0x1d0] ss:$8 sps:$4 sm:$0xff]   ;;  %v6364_v34 = vld [vmem:[#allocation6 + $0x1e4] ss:$8 sps:$4 sm:$0xff]   ;;  %v6362_v11 = vld [vmem:[#allocation6 + $0x1e0] ss:$8 sps:$4 sm:$0xff]  }
 0x810   : > { %4826 = vmatprep.subr.bf16.mxu0 %v6325_v44  ;;  %v6367_v5 = vld [vmem:[#allocation6 + $0x1f4] ss:$8 sps:$4 sm:$0xff]   ;;  %v6365_v35 = vld [vmem:[#allocation6 + $0x1f0] ss:$8 sps:$4 sm:$0xff]   ;;  %v6378_v53 = vld [vmem:[#allocation7 + $0x68] sm:$0xff]  }
 0x811   : > { %v6379_v37 = vld [vmem:[#allocation7 + $0x28] sm:$0xff]   ;;  %5723 = vmatprep.subr.bf16.mxu1 %v6378_v53  ;;  %v6380_v51 = vld [vmem:[#allocation7 + $0x70] sm:$0xff]   ;;  %v6382_v10 = vld [vmem:[#allocation7 + $0x78] sm:$0xff]  }
 0x812   : > { %5724 = vmatpush3.bf16.msra.mxu1 %v6379_v37  ;;  %v6381_v48 = vld [vmem:[#allocation7 + $0x30] sm:$0xff]   ;;  %v6383_v42 = vld [vmem:[#allocation7 + $0x38] sm:$0xff]   ;;  %v4386_v40 = vld [vmem:[%s7560_s9] sm:$0xf] }
 0x813   : > { %4827 = vmatpush1.bf16.msra.mxu0 %v6323_v14  ;;  %5725 = vmatprep.subr.bf16.mxu1 %v6380_v51  ;;  %v4881_v3 = vrot.slane %v4386_v40, %v7155_v55  ;;  %v4907_v29 = vrot.slane %v4386_v40, %v7168_v33  ;;  %v4911_v41 = vrot.slane %v4386_v40, %v7208_v56 }
 0x814   : > { %4828 = vmatprep.subr.bf16.mxu0 %v6328_v2 }
 0x815   : > { %v4891_v19 = vrot.slane %v4881_v3, %v7155_v55  ;;  %v4917_v52 = vrot.slane %v4907_v29, %v7168_v33  ;;  %v4921_v58 = vrot.slane %v4911_v41, %v7168_v33 }
 0x816   : > { %4814 = vmatmul.mubr.bf16.gmra.mrb[20].mxu0 %v4382_v60  ;;  %5726 = vmatpush3.bf16.msra.mxu1 %v6381_v48 }
 0x817   : > { %4829 = vmatpush1.bf16.msra.mxu0 %v6326_v18  ;;  %4856 = vmatprep.mubr.bf16.mxu0 %v4381_v61 }
 0x818   : > { %4830 = vmatprep.subr.bf16.mxu0 %v6331_v43  ;;  %5727 = vmatprep.subr.bf16.mxu1 %v6382_v10 }
 0x81a   : > { %5728 = vmatpush3.bf16.msra.mxu1 %v6383_v42 }
 0x81b   : > { %4831 = vmatpush1.bf16.msra.mxu0 %v6329_v12 }
 0x81c   : > { %4832 = vmatprep.subr.bf16.mxu0 %v6334_v20 }
 0x81f   : > { %4833 = vmatpush1.bf16.msra.mxu0 %v6332_v15 }
 0x820   : > { %4834 = vmatprep.subr.bf16.mxu0 %v6337_v21 }
 0x823   : > { %4835 = vmatpush1.bf16.msra.mxu0 %v6335_v22 }
 0x824   : > { %4836 = vmatprep.subr.bf16.mxu0 %v6340_v16 }
 0x827   : > { %4837 = vmatpush1.bf16.msra.mxu0 %v6338_v23 }
 0x828   : > { %4838 = vmatprep.subr.bf16.mxu0 %v6343_v24 }
 0x82b   : > { %4839 = vmatpush1.bf16.msra.mxu0 %v6341_v46 }
 0x82c   : > { %4840 = vmatprep.subr.bf16.mxu0 %v6346_v25 }
 0x82f   : > { %4841 = vmatpush1.bf16.msra.mxu0 %v6344_v1 }
 0x830   : > { %4842 = vmatprep.subr.bf16.mxu0 %v6349_v17 }
 0x833   : > { %4843 = vmatpush1.bf16.msra.mxu0 %v6347_v26 }
 0x834   : > { %4844 = vmatprep.subr.bf16.mxu0 %v6352_v4 }
 0x837   : > { %4845 = vmatpush1.bf16.msra.mxu0 %v6350_v27 }
 0x838   : > { %4846 = vmatprep.subr.bf16.mxu0 %v6355_v49 }
 0x83b   : > { %4847 = vmatpush1.bf16.msra.mxu0 %v6353_v50 }
 0x83c   : > { %4848 = vmatprep.subr.bf16.mxu0 %v6358_v6 }
 0x83f   : > { %4849 = vmatpush1.bf16.msra.mxu0 %v6356_v63 }
 0x840   : > { %4850 = vmatprep.subr.bf16.mxu0 %v6361_v32 }
 0x843   : > { %4851 = vmatpush1.bf16.msra.mxu0 %v6359_v7 }
 0x844   : > { %4852 = vmatprep.subr.bf16.mxu0 %v6364_v34  ;;  %v5674_v34 = vld [vmem:[%s7562_s11] ss:$0 sm:$0xff] }
 0x847   : > { %4853 = vmatpush1.bf16.msra.mxu0 %v6362_v11 }
 0x848   : > { %4854 = vmatprep.subr.bf16.mxu0 %v6367_v5 }
 0x84b   : > { %4855 = vmatpush1.bf16.msra.mxu0 %v6365_v35 }
 0x84e   : > { %4857 = vmatmul.mubr.bf16.vlgmr.msra.gmra.mrb[16].mxu0 %v4380_v28  ;;  %v4885_v28 = vrot.slane %v4386_v40, %v7205_v54 }
 0x84f   : > { %4866 = vmatprep.mubr.bf16.mxu0 %v4385_v9 }
 0x850   : > { %v4895_v47 = vrot.slane %v4885_v28, %v7155_v55 }
 0x856   : > { %4867 = vmatmul.mubr.bf16.gmra.mrb[20].mxu0 %v4384_v13 }
 0x921   : > { %v4858_v57 = vpop.f32.mrb[16].mxu0 }
 0x922   : > { %v4896_v59 = vmul.f32 %v4891_v19, %v4858_v57  ;;  %v4860_v30 = vpop.f32.mrb[17].mxu0 }
 0x923   : > { %v4897_v45 = vmul.f32 %v4895_v47, %v4860_v30  ;;  %v4862_v31 = vpop.f32.mrb[18].mxu0 }
 0x924   : > { %v4922_v44 = vadd.f32 %v4917_v52, %v4896_v59  ;;  %v4898_v39 = vmul.f32 %v4891_v19, %v4862_v31  ;;  %v4864_v54 = vpop.f32.mrb[19].mxu0 }
 0x925   : > { %v4923_v60 = vadd.f32 %v4921_v58, %v4897_v45  ;;  %v4899_v61 = vmul.f32 %v4895_v47, %v4864_v54 }
 0x926   : > { %v4938_v0 = vmul.f32 0.2, %v4922_v44  ;;  %v4924_v56 = vadd.f32 %v4917_v52, %v4898_v39  ;;  %vm4930_vm2 = vcmp.gt.f32.partialorder %v4922_v44, 0.0 }
 0x927   : > { %v4939_v36 = vmul.f32 0.2, %v4923_v60  ;;  %v4925_v62 = vadd.f32 %v4921_v58, %v4899_v61  ;;  %vm4931_vm9 = vcmp.gt.f32.partialorder %v4923_v60, 0.0 }
 0x928   : > { %vm4932_vm0 = vcmp.gt.f32.partialorder %v4924_v56, 0.0  ;;  %v4940_v55 = vmul.f32 0.2, %v4924_v56  ;;  %v4946_v38 = vsel %vm4930_vm2, %v4922_v44, %v4938_v0 }
 0x929   : > { %vm4933_vm10 = vcmp.gt.f32.partialorder %v4925_v62, 0.0  ;;  %v4941_v8 = vmul.f32 0.2, %v4925_v62  ;;  %v4868_v33 = vpop.f32.mrb[20].mxu0  ;;  %v4947_v12 = vsel %vm4931_vm9, %v4923_v60, %v4939_v36 }
 0x92a   : > { %v4948_v9 = vsel %vm4932_vm0, %v4924_v56, %v4940_v55  ;;  %v4900_v13 = vmul.f32 %v4891_v19, %v4868_v33  ;;  %v4870_v14 = vpop.f32.mrb[21].mxu0 }
 0x92b   : > { %v4954_v2 = vpack.c.bf16 %v4948_v9, %v4946_v38  ;;  %v4901_v18 = vmul.f32 %v4895_v47, %v4870_v14  ;;  %v4872_v43 = vpop.f32.mrb[22].mxu0  ;;  %v4949_v20 = vsel %vm4933_vm10, %v4925_v62, %v4941_v8 }
 0x92c   : > { %v4926_v15 = vadd.f32 %v4917_v52, %v4900_v13  ;;  %v4902_v21 = vmul.f32 %v4891_v19, %v4872_v43  ;;  %v4874_v22 = vpop.f32.mrb[23].mxu0  ;;  %v4955_v16 = vpack.c.bf16 %v4949_v20, %v4947_v12 }
 0x92d   : > { %v4927_v23 = vadd.f32 %v4921_v58, %v4901_v18  ;;  %v4903_v24 = vmul.f32 %v4895_v47, %v4874_v22 }
 0x92e   : > { %v4942_v46 = vmul.f32 0.2, %v4926_v15  ;;  %v4928_v25 = vadd.f32 %v4917_v52, %v4902_v21  ;;  %5125 = vmatprep.mubr.bf16.mxu1 %v4955_v16  ;;  %vm4934_vm14 = vcmp.gt.f32.partialorder %v4926_v15, 0.0 }
 0x92f   : > { %v4943_v1 = vmul.f32 0.2, %v4927_v23  ;;  %v4929_v17 = vadd.f32 %v4921_v58, %v4903_v24  ;;  %5126 = vmatmul.mubr.bf16.vlgmr.msra.gmra.mrb[48].mxu1 %v4954_v2  ;;  %vm4935_vm1 = vcmp.gt.f32.partialorder %v4927_v23, 0.0 }
 0x930   : > { %vm4936_vm4 = vcmp.gt.f32.partialorder %v4928_v25, 0.0  ;;  %v4944_v26 = vmul.f32 0.2, %v4928_v25  ;;  %v4950_v27 = vsel %vm4934_vm14, %v4926_v15, %v4942_v46 }
 0x931   : > { %vm4937_vm8 = vcmp.gt.f32.partialorder %v4929_v17, 0.0  ;;  %v4945_v4 = vmul.f32 0.2, %v4929_v17  ;;  %v4951_v50 = vsel %vm4935_vm1, %v4927_v23, %v4943_v1 }
 0x932   : > { %v4952_v49 = vsel %vm4936_vm4, %v4928_v25, %v4944_v26 }
 0x933   : > { %v4953_v6 = vsel %vm4937_vm8, %v4929_v17, %v4945_v4  ;;  %v4956_v63 = vpack.c.bf16 %v4952_v49, %v4950_v27 }
 0x934   : > { %v4957_v32 = vpack.c.bf16 %v4953_v6, %v4951_v50 }
 0x936   : > { %5133 = vmatprep.mubr.bf16.mxu1 %v4957_v32 }
 0x937   : > { %5134 = vmatmul.mubr.bf16.gmra.mrb[52].mxu1 %v4956_v63 }
 0xa02   : > { %v5729_v7 = vpop.f32.mrb[48].mxu1 }
 0xa03   : > { %v5730_v11 = vpop.f32.mrb[49].mxu1 }
 0xa04   : > { %v5731_v5 = vadd.f32 %v5730_v11, %v5729_v7  ;;  %v5732_v35 = vpop.f32.mrb[50].mxu1 }
 0xa05   : > { %v5733_v53 = vpop.f32.mrb[51].mxu1 }
 0xa06   : > { %v5128_v37 = vadd.f32 %v5731_v5, %v5674_v34  ;;  %v5734_v51 = vadd.f32 %v5733_v53, %v5732_v35 }
 0xa08   : > { %5142 = vst [vmem:[%s489_s19] sm:$0xff] %v5128_v37  ;;  %v5131_v48 = vadd.f32 %v5734_v51, %v5674_v34 }
 0xa0a   : > { %5143 = vst [vmem:[%s489_s19 + $0x8] sm:$0xff] %v5131_v48  ;;  %v5735_v10 = vpop.f32.mrb[52].mxu1 }
 0xa0b   : > { %v5736_v42 = vpop.f32.mrb[53].mxu1 }
 0xa0c   : > { %v5737_v40 = vadd.f32 %v5736_v42, %v5735_v10  ;;  %v5738_v3 = vpop.f32.mrb[54].mxu1 }
 0xa0d   : > { %v5739_v28 = vpop.f32.mrb[55].mxu1 }
 0xa0e   : > { %v5136_v29 = vadd.f32 %v5737_v40, %v5674_v34  ;;  %v5740_v41 = vadd.f32 %v5739_v28, %v5738_v3 }
 0xa10   : > { %5144 = vst [vmem:[%s489_s19 + $0x10] sm:$0xff] %v5136_v29  ;;  %v5139_v19 = vadd.f32 %v5740_v41, %v5674_v34 }
 0xa12   : > { %5145 = vst [vmem:[%s489_s19 + $0x18] sm:$0xff] %v5139_v19 }
 0xa13 PF: > { %s7634_s24 = sld [smem:[#allocation12_spill]] }
 0xa19   : > { %s25_s21 = sadd.s32 1, %s7634_s24  }
 0xa1a   : > { %p22_p1 = scmp.ge.s32.totalorder %s25_s21, 4  }
 0xa1c   :  { %24 = sbr.rel (!%p22_p1) target bundleno = 3 (0x3), region = 118 }
 0xa23   :  { %5167 = vsyncpa [#allocation3], 1 }
 0xa24   :  { %5169 = vsyncpa [#allocation3 + $0x1], 1 }
 0xa25   :  { %5170 = vsyncpa [#allocation5], 1 }
 0xa26   :  { %5171 = vsyncpa [#allocation8], 1 }

</bundles_post_ra>
